<compile_context>
chip_gen: v5e
topology: v5e:2x2
jax: 0.10.0
libtpu: 0.0.40
codegen_flags: <defaults>
</compile_context>

<pallas_src>
import math
from functools import partial

import jax
import jax.numpy as jnp
from jax.experimental import pallas as pl
from jax.experimental.pallas import tpu as pltpu

EPS = 1e-5                 # BatchNorm eps
ALPHA0 = 0.25              # nn.PReLU() default single shared parameter
ACT_DTYPE = jnp.bfloat16   # HBM activation / MXU input dtype


def pad_fn(kernel, stride):
    # inferred "SAME"-style padding helper used by the original module
    return (kernel - stride) // 2


# ----------------------------------------------------------------------------
# Fused  BN -> PReLU -> zero-pad -> conv(stride 1) -> +bias [-> +add]  kernel
# ----------------------------------------------------------------------------
def _make_fused_conv_kernel(n_src, src_ch, KH, KW, pads, H, W, Cout,
                            has_act, has_add):
    p_t, p_b, p_l, p_r = pads
    has_pad = bool(p_t or p_b or p_l or p_r)
    Hp, Wp = H + p_t + p_b, W + p_l + p_r
    Ho, Wo = Hp - KH + 1, Wp - KW + 1

    # Content is stored at a sublane-aligned column offset inside the padded
    # VMEM scratch so every store is tile-aligned; only tap *reads* are shifted.
    assert p_l <= 8, "left padding larger than a sublane tile not supported"
    w_off = 0 if p_l == 0 else 8
    W_alloc = w_off + W + p_r

    def kernel(*args):
        idx = 0
        x_refs = args[idx:idx + n_src]; idx += n_src
        w_refs = args[idx:idx + n_src]; idx += n_src
        if has_act:
            scale_refs = args[idx:idx + n_src]; idx += n_src
            shift_refs = args[idx:idx + n_src]; idx += n_src
            alpha_ref = args[idx]; idx += 1
        b_ref = args[idx]; idx += 1
        if has_add:
            add_ref = args[idx]; idx += 1
        o_ref = args[idx]; idx += 1
        if has_pad:
            xpad_refs = args[idx:idx + n_src]; idx += n_src
        else:
            xpad_refs = ()
        acc_ref = args[idx]; idx += 1

        # --- prologue: folded BatchNorm + PReLU (f32 math, bf16 result) written
        #     into a zeroed padded bf16 VMEM scratch (one per source).  This
        #     realizes both the zero padding and the implicit DenseNet concat
        #     without any extra HBM traffic. ------------------------------------
        if has_act:
            alpha = alpha_ref[0, 0]
        acts = []
        for s in range(n_src):
            if has_act:
                x = x_refs[s][0].astype(jnp.float32)               # (H, W, Cs)
                y = x * scale_refs[s][...] + shift_refs[s][...]
                y = jnp.where(y >= 0, y, alpha * y).astype(ACT_DTYPE)
            else:
                y = x_refs[s][0].astype(ACT_DTYPE)                 # identity
            if has_pad:
                xpad_refs[s][...] = jnp.zeros_like(xpad_refs[s])
                xpad_refs[s][p_t:p_t + H, w_off:w_off + W, :] = y
                acts.append(None)
            else:
                acts.append(y)

        # --- conv: per-source / per-tap bf16 MXU matmuls accumulated into a
        #     single f32 VMEM accumulator (first tap assigns, rest add). --------
        first = True
        for s in range(n_src):
            Cs = src_ch[s]
            for dy in range(KH):
                for dx in range(KW):
                    if has_pad:
                        c0 = w_off - p_l + dx
                        patch = xpad_refs[s][dy:dy + Ho, c0:c0 + Wo, :]
                    else:
                        patch = acts[s][dy:dy + Ho, dx:dx + Wo, :]
                    part = jnp.dot(patch.reshape(Ho * Wo, Cs),
                                   w_refs[s][dy, dx],
                                   preferred_element_type=jnp.float32)
                    if first:
                        acc_ref[...] = part
                        first = False
                    else:
                        acc_ref[...] += part

        res = acc_ref[...] + b_ref[...]                            # (Ho*Wo, Cout)
        if has_add:
            res = res + add_ref[0].astype(jnp.float32).reshape(Ho * Wo, Cout)
        o_ref[...] = res.reshape(1, Ho, Wo, Cout).astype(o_ref.dtype)

    return kernel, (Hp, W_alloc, Ho, Wo, has_pad)


def fused_conv(xs, w, b, *, pads=(0, 0, 0, 0), act=None, add=None,
               out_dtype=ACT_DTYPE):
    """Fused (BatchNorm -> PReLU -> zero-pad -> conv2d(stride=1) -> +bias [+add]).

    xs  : list of NHWC tensors treated as an implicit channel-concat
          (the DenseNet `torch.cat`) -- the concat is never materialized.
    w   : (KH, KW, sum(Cin_s), Cout) weight, channel order == concat order.
    b   : (Cout,) bias.
    pads: (top, bottom, left, right) zero padding applied AFTER the activation
          (matches Conv2d(padding=..) / F.pad semantics of the reference model).
    act : None for Identity norm/act, else (scale, shift, alpha) of the folded
          inference BatchNorm + PReLU.
    add : optional NHWC tensor (same shape as output) added in the epilogue
          (fuses the UpBlock residual add).
    """
    N, H, W, _ = xs[0].shape
    n_src = len(xs)
    src_ch = tuple(int(x.shape[-1]) for x in xs)
    KH, KW, Cin, Cout = w.shape
    assert Cin == sum(src_ch)
    has_act = act is not None
    has_add = add is not None

    kernel, (Hp, W_alloc, Ho, Wo, has_pad) = _make_fused_conv_kernel(
        n_src, src_ch, KH, KW, pads, H, W, Cout, has_act, has_add)

    # split weight / BN params along Cin to line up with the implicit concat
    offs = [0]
    for c in src_ch:
        offs.append(offs[-1] + c)
    w_srcs = [w[:, :, offs[s]:offs[s + 1], :].astype(ACT_DTYPE)
              for s in range(n_src)]

    args = [x.astype(ACT_DTYPE) for x in xs] + w_srcs
    in_specs = (
        [pl.BlockSpec((1, H, W, c), lambda n: (n, 0, 0, 0)) for c in src_ch]
        + [pl.BlockSpec((KH, KW, c, Cout), lambda n: (0, 0, 0, 0)) for c in src_ch])

    if has_act:
        scale, shift, alpha = act
        sc_srcs = [scale[offs[s]:offs[s + 1]].reshape(1, 1, src_ch[s])
                   .astype(jnp.float32) for s in range(n_src)]
        sh_srcs = [shift[offs[s]:offs[s + 1]].reshape(1, 1, src_ch[s])
                   .astype(jnp.float32) for s in range(n_src)]
        alpha2 = jnp.asarray(alpha, jnp.float32).reshape(1, 1)
        args += sc_srcs + sh_srcs + [alpha2]
        in_specs += (
            [pl.BlockSpec((1, 1, c), lambda n: (0, 0, 0)) for c in src_ch]
            + [pl.BlockSpec((1, 1, c), lambda n: (0, 0, 0)) for c in src_ch]
            + [pl.BlockSpec(memory_space=pltpu.MemorySpace.SMEM)])

    b2 = b.reshape(1, Cout).astype(jnp.float32)
    args += [b2]
    in_specs += [pl.BlockSpec((1, Cout), lambda n: (0, 0))]

    if has_add:
        assert add.shape == (N, Ho, Wo, Cout)
        args += [add.astype(ACT_DTYPE)]
        in_specs += [pl.BlockSpec((1, Ho, Wo, Cout), lambda n: (n, 0, 0, 0))]

    scratch_shapes = (
        [pltpu.VMEM((Hp, W_alloc, c), ACT_DTYPE) for c in src_ch] if has_pad else []
    ) + [pltpu.VMEM((Ho * Wo, Cout), jnp.float32)]

    return pl.pallas_call(
        kernel,
        out_shape=jax.ShapeDtypeStruct((N, Ho, Wo, Cout), out_dtype),
        grid=(N,),
        in_specs=in_specs,
        out_specs=pl.BlockSpec((1, Ho, Wo, Cout), lambda n: (n, 0, 0, 0)),
        scratch_shapes=scratch_shapes,
        compiler_params=pltpu.CompilerParams(
            dimension_semantics=("parallel",)),
    )(*args)


def conv2d_2x2_stride2(x, w, b):
    # 2x2 kernel / stride 2 / pad 0  ==  space-to-depth + fused 1x1 conv (exact).
    # TODO(synk): move the space-to-depth inside the kernel via stride-2 sublane
    # reads once that lowering path is proven safe.
    N, H, W, C = x.shape
    Cout = w.shape[-1]
    x2 = x.reshape(N, H // 2, 2, W // 2, 2, C)
    x2 = jnp.transpose(x2, (0, 1, 3, 2, 4, 5)).reshape(N, H // 2, W // 2, 4 * C)
    w2 = w.reshape(1, 1, 4 * C, Cout)     # (dy, dx, cin) flatten order matches x2
    return fused_conv([x2], w2, b)


# ----------------------------------------------------------------------------
# Deterministic parameter construction (mirrors the module __init__ shapes)
# ----------------------------------------------------------------------------
class _Keys:
    def __init__(self, seed):
        self._key = jax.random.PRNGKey(seed)

    def __call__(self):
        self._key, sub = jax.random.split(self._key)
        return sub


def init_conv(kg, cin, cout, kh, kw):
    w = 0.1 * jax.random.normal(kg(), (kh, kw, cin, cout), jnp.float32)
    b = 0.01 * jax.random.normal(kg(), (cout,), jnp.float32)
    return {"w": w, "b": b}


def init_bn(c):
    gamma = jnp.ones((c,), jnp.float32)
    beta = jnp.zeros((c,), jnp.float32)
    mean = jnp.zeros((c,), jnp.float32)
    var = jnp.ones((c,), jnp.float32)
    scale = gamma / jnp.sqrt(var + EPS)
    shift = beta - mean * scale
    return {"scale": scale, "shift": shift}


def init_dense(kg, channels, n_layers=6):
    factors = math.ceil(math.log2(n_layers))
    blocks, residuals = [], []
    for i in range(1, n_layers + 1):
        residual = [i - 2 ** k for k in range(factors) if i - 2 ** k > 0]
        kernel = 3
        in_ch = channels * max(1, len(residual))
        if i == 1 or i == n_layers:
            kernel = 1
        blocks.append({
            "bn": init_bn(in_ch),
            "alpha": ALPHA0,
            "conv": init_conv(kg, in_ch, channels, kernel, kernel),
            "kernel": kernel,
        })
        residuals.append(residual)
    return {"blocks": blocks, "residuals": residuals}


def init_down(kg, cin, cout, is_head):
    p = {"is_head": is_head}
    if not is_head:
        p["bn1"] = init_bn(cin)
        p["alpha1"] = ALPHA0
    p["conv1"] = init_conv(kg, cin, cout, 3, 3)
    p["dense"] = init_dense(kg, cout)
    p["bn2"] = init_bn(cout)
    p["alpha2"] = ALPHA0
    p["conv2"] = init_conv(kg, cout, cout, 2, 2)
    p["conv3"] = init_conv(kg, cout, cout, 2, 2)
    return p


def init_bridge(kg, cin, cout):
    return {
        "bn1": init_bn(cin), "alpha1": ALPHA0,
        "conv1": init_conv(kg, cin, cout, 2, 2),
        "dense": init_dense(kg, cout),
        "bn2": init_bn(cout), "alpha2": ALPHA0,
        "conv2": init_conv(kg, cout, cout, 2, 2),
    }


def init_up(kg, cin, cout):
    return {
        "bn1": init_bn(cin), "alpha1": ALPHA0,
        "conv1": init_conv(kg, cin, cout, 3, 3),
        "dense": init_dense(kg, cout),
        "bn2": init_bn(cout), "alpha2": ALPHA0,
        "conv2": init_conv(kg, cout, cout, 2, 2),
    }


def init_rdunet(seed, dimension, classes, channels=64, depth=4):
    kg = _Keys(seed)
    params = {"depth": depth, "down": [], "up": [None] * depth}
    for level in range(depth):
        is_head = level == 0
        cin = dimension[0] if is_head else channels * 2 ** (level - 1)
        cout = channels * 2 ** level
        params["down"].append(init_down(kg, cin, cout, is_head))
    params["bridge"] = init_bridge(kg, channels * 2 ** (depth - 1),
                                   channels * 2 ** depth)
    for level in range(depth - 1, -1, -1):
        params["up"][level] = init_up(kg, channels * 2 ** (level + 1),
                                      channels * 2 ** level)
    params["output"] = init_conv(kg, channels, classes, 1, 1)
    return params


# ----------------------------------------------------------------------------
# Forward passes (mirror the PyTorch module structure)
# ----------------------------------------------------------------------------
def dense_forward(p, x):
    outputs = []
    for idx0, blk in enumerate(p["blocks"]):
        i = idx0 + 1
        if i == 1:
            srcs = [x]
        else:
            srcs = [outputs[-1]] + [outputs[j - 1] for j in p["residuals"][idx0][1:]]
        pad = pad_fn(blk["kernel"], 1)
        y = fused_conv(srcs, blk["conv"]["w"], blk["conv"]["b"],
                       pads=(pad, pad, pad, pad),
                       act=(blk["bn"]["scale"], blk["bn"]["shift"], blk["alpha"]))
        outputs.append(y)
    return outputs[-1]


def down_forward(p, x):
    act1 = None if p["is_head"] else (p["bn1"]["scale"], p["bn1"]["shift"], p["alpha1"])
    y = fused_conv([x], p["conv1"]["w"], p["conv1"]["b"],
                   pads=(1, 1, 1, 1), act=act1)
    y = dense_forward(p["dense"], y)
    residual = fused_conv([y], p["conv2"]["w"], p["conv2"]["b"],
                          pads=(0, 1, 0, 1),
                          act=(p["bn2"]["scale"], p["bn2"]["shift"], p["alpha2"]))
    out = conv2d_2x2_stride2(residual, p["conv3"]["w"], p["conv3"]["b"])
    return out, residual


def bridge_forward(p, x):
    y = fused_conv([x], p["conv1"]["w"], p["conv1"]["b"], pads=(0, 1, 0, 1),
                   act=(p["bn1"]["scale"], p["bn1"]["shift"], p["alpha1"]))
    y = dense_forward(p["dense"], y)
    y = fused_conv([y], p["conv2"]["w"], p["conv2"]["b"], pads=(0, 1, 0, 1),
                   act=(p["bn2"]["scale"], p["bn2"]["shift"], p["alpha2"]))
    return y


def up_forward(p, x, residual):
    # TODO(synk): fuse the nearest-neighbour 2x upsample into the conv kernel
    # (sub-pixel weight decomposition) to remove this HBM round trip.
    up = jnp.repeat(jnp.repeat(x, 2, axis=1), 2, axis=2)
    # residual add fused into the conv1 kernel epilogue (no extra HBM pass)
    out = fused_conv([up], p["conv1"]["w"], p["conv1"]["b"], pads=(1, 1, 1, 1),
                     act=(p["bn1"]["scale"], p["bn1"]["shift"], p["alpha1"]),
                     add=residual)
    out = dense_forward(p["dense"], out)
    out = fused_conv([out], p["conv2"]["w"], p["conv2"]["b"], pads=(0, 1, 0, 1),
                     act=(p["bn2"]["scale"], p["bn2"]["shift"], p["alpha2"]))
    return out


def rdunet_forward(params, x_nchw):
    x = jnp.transpose(x_nchw, (0, 2, 3, 1)).astype(ACT_DTYPE)   # NCHW -> NHWC
    out = x
    residuals = []
    for level in range(params["depth"]):
        out, res = down_forward(params["down"][level], out)
        residuals.append(res)
    out = bridge_forward(params["bridge"], out)
    for level in range(params["depth"] - 1, -1, -1):
        out = up_forward(params["up"][level], out, residuals[level])
    out = fused_conv([out], params["output"]["w"], params["output"]["b"],
                     out_dtype=jnp.float32)                     # 1x1 conv
    return jnp.transpose(out, (0, 3, 1, 2))                     # back to NCHW


# ----------------------------------------------------------------------------
# Pure-JAX reference for the fused kernel (same bf16 quantization points)
# ----------------------------------------------------------------------------
def _ref_fused_conv(xs, w, b, pads, act, add=None):
    x = jnp.concatenate([a.astype(jnp.float32) for a in xs], axis=-1)
    x = x.astype(ACT_DTYPE).astype(jnp.float32)
    if act is not None:
        scale, shift, alpha = act
        x = x * scale.reshape(1, 1, 1, -1) + shift.reshape(1, 1, 1, -1)
        x = jnp.where(x >= 0, x, alpha * x)
    p_t, p_b, p_l, p_r = pads
    x = jnp.pad(x, ((0, 0), (p_t, p_b), (p_l, p_r), (0, 0)))
    xq = x.astype(ACT_DTYPE).astype(jnp.float32)
    wq = w.astype(ACT_DTYPE).astype(jnp.float32)
    out = jax.lax.conv_general_dilated(
        xq, wq, window_strides=(1, 1), padding="VALID",
        dimension_numbers=("NHWC", "HWIO", "NHWC"))
    out = out + b.reshape(1, 1, 1, -1)
    if add is not None:
        out = out + add.astype(ACT_DTYPE).astype(jnp.float32)
    return out


# ----------------------------------------------------------------------------
if __name__ == "__main__":
    dimension = (4, 16, 16)   # (C, H, W) of the input
    classes = 3
    channels = 8
    depth = 2

    params = init_rdunet(0, dimension, classes, channels=channels, depth=depth)
    x = jax.random.normal(jax.random.PRNGKey(0),
                          (2, dimension[0], dimension[1], dimension[2]),
                          jnp.float32)
    x_nhwc = jnp.transpose(x, (0, 2, 3, 1))

    # --- check 1: plain 3x3 pad-1 conv (identity act) vs lax.conv -----------
    w0 = params["down"][0]["conv1"]["w"]
    b0 = params["down"][0]["conv1"]["b"]
    got = fused_conv([x_nhwc], w0, b0, pads=(1, 1, 1, 1), act=None,
                     out_dtype=jnp.float32)
    ref = _ref_fused_conv([x_nhwc], w0, b0, (1, 1, 1, 1), None)
    assert jnp.allclose(ref, got, atol=2e-2, rtol=2e-2), "conv kernel mismatch"

    # --- check 2: fused BN+PReLU, multi-source (implicit concat), 3x3 pad 1 -
    kg = _Keys(123)
    c1, c2 = 8, 8
    a1 = jax.random.normal(kg(), (2, 16, 16, c1), jnp.float32)
    a2 = jax.random.normal(kg(), (2, 16, 16, c2), jnp.float32)
    wz = 0.1 * jax.random.normal(kg(), (3, 3, c1 + c2, 16), jnp.float32)
    bz = 0.01 * jax.random.normal(kg(), (16,), jnp.float32)
    sc = 1.0 + 0.1 * jax.random.normal(kg(), (c1 + c2,), jnp.float32)
    sh = 0.1 * jax.random.normal(kg(), (c1 + c2,), jnp.float32)
    act = (sc, sh, 0.25)
    got2 = fused_conv([a1, a2], wz, bz, pads=(1, 1, 1, 1), act=act,
                      out_dtype=jnp.float32)
    ref2 = _ref_fused_conv([a1, a2], wz, bz, (1, 1, 1, 1), act)
    assert jnp.allclose(ref2, got2, atol=2e-2, rtol=2e-2), \
        "fused multi-source conv mismatch"

    # --- check 3: asymmetric-pad 2x2 conv (Bridge / conv2 path) -------------
    w3 = 0.1 * jax.random.normal(kg(), (2, 2, c1, 8), jnp.float32)
    b3 = 0.01 * jax.random.normal(kg(), (8,), jnp.float32)
    act3 = (sc[:c1], sh[:c1], 0.25)
    got3 = fused_conv([a1], w3, b3, pads=(0, 1, 0, 1), act=act3,
                      out_dtype=jnp.float32)
    ref3 = _ref_fused_conv([a1], w3, b3, (0, 1, 0, 1), act3)
    assert jnp.allclose(ref3, got3, atol=2e-2, rtol=2e-2), "asym-pad conv mismatch"

    # --- check 4: fused residual add (UpBlock conv1 path) -------------------
    w4 = 0.1 * jax.random.normal(kg(), (3, 3, c1, 16), jnp.float32)
    b4 = 0.01 * jax.random.normal(kg(), (16,), jnp.float32)
    add4 = jax.random.normal(kg(), (2, 16, 16, 16), jnp.float32)
    got4 = fused_conv([a1], w4, b4, pads=(1, 1, 1, 1), act=act3, add=add4,
                      out_dtype=jnp.float32)
    ref4 = _ref_fused_conv([a1], w4, b4, (1, 1, 1, 1), act3, add=add4)
    assert jnp.allclose(ref4, got4, atol=2e-2, rtol=2e-2), \
        "fused residual-add conv mismatch"

    # --- full RDUNet forward -------------------------------------------------
    fwd = jax.jit(partial(rdunet_forward, params))
    out = jax.block_until_ready(fwd(x))
    assert out.shape == (2, classes, dimension[1], dimension[2])
    assert jnp.all(jnp.isfinite(out))
    print("KERNEL_OK")
</pallas_src>

<mosaic_0001>
module attributes {stable_mosaic.version = 11 : i64} {
  func.func @kernel(%arg0: i32, %arg1: memref<1x16x16x4xbf16, #tpu.memory_space<vmem>>, %arg2: memref<3x3x4x8xbf16, #tpu.memory_space<vmem>>, %arg3: memref<1x8xf32, #tpu.memory_space<vmem>>, %arg4: memref<1x16x16x8xf32, #tpu.memory_space<vmem>>, %arg5: memref<18x25x4xbf16, #tpu.memory_space<vmem>>, %arg6: memref<256x8xf32, #tpu.memory_space<vmem>>) attributes {dimension_semantics = [#tpu.dimension_semantics<parallel>], iteration_bounds = array<i64: 2>, scalar_prefetch = 0 : i64, scratch_operands = 2 : i64, tpu.core_type = #tpu.core_type<tc>, window_params = [{transform_indices = @transform_0, window_bounds = array<i64: 1, 16, 16, 4>}, {pipeline_mode = #tpu.pipeline_mode<synchronous>, transform_indices = @transform_1, window_bounds = array<i64: 3, 3, 4, 8>}, {pipeline_mode = #tpu.pipeline_mode<synchronous>, transform_indices = @transform_2, window_bounds = array<i64: 1, 8>}, {transform_indices = @transform_3, window_bounds = array<i64: 1, 16, 16, 8>}]} {
    %c0 = arith.constant 0 : index
    %c0_0 = arith.constant 0 : index
    %c0_1 = arith.constant 0 : index
    %c0_2 = arith.constant 0 : index
    %0 = vector.load %arg1[%c0, %c0_0, %c0_1, %c0_2] : memref<1x16x16x4xbf16, #tpu.memory_space<vmem>>, vector<1x16x16x4xbf16>
    %1 = vector.shape_cast %0 : vector<1x16x16x4xbf16> to vector<16x16x4xbf16>
    %cst = arith.constant 0.000000e+00 : bf16
    %2 = vector.broadcast %cst : bf16 to vector<18x25x4xbf16>
    %c0_3 = arith.constant 0 : index
    %c0_4 = arith.constant 0 : index
    %c0_5 = arith.constant 0 : index
    %3 = vector.load %arg5[%c0_3, %c0_4, %c0_5] : memref<18x25x4xbf16, #tpu.memory_space<vmem>>, vector<18x25x4xbf16>
    tpu.vector_store %arg5[%c0_3, %c0_4, %c0_5], %2 {strides = array<i32>} : memref<18x25x4xbf16, #tpu.memory_space<vmem>>, vector<18x25x4xbf16>,
    %c1 = arith.constant 1 : index
    %c8 = arith.constant 8 : index
    %c0_6 = arith.constant 0 : index
    %4 = vector.load %arg5[%c1, %c8, %c0_6] : memref<18x25x4xbf16, #tpu.memory_space<vmem>>, vector<16x16x4xbf16>
    tpu.vector_store %arg5[%c1, %c8, %c0_6], %1 {strides = array<i32>} : memref<18x25x4xbf16, #tpu.memory_space<vmem>>, vector<16x16x4xbf16>,
    %c0_7 = arith.constant 0 : index
    %c7 = arith.constant 7 : index
    %c0_8 = arith.constant 0 : index
    %5 = vector.load %arg5[%c0_7, %c7, %c0_8] : memref<18x25x4xbf16, #tpu.memory_space<vmem>>, vector<16x16x4xbf16>
    %6 = vector.shape_cast %5 : vector<16x16x4xbf16> to vector<256x4xbf16>
    %c0_9 = arith.constant 0 : index
    %c0_10 = arith.constant 0 : index
    %c0_11 = arith.constant 0 : index
    %c0_12 = arith.constant 0 : index
    %7 = vector.load %arg2[%c0_9, %c0_10, %c0_11, %c0_12] : memref<3x3x4x8xbf16, #tpu.memory_space<vmem>>, vector<1x1x4x8xbf16>
    %8 = vector.shape_cast %7 : vector<1x1x4x8xbf16> to vector<4x8xbf16>
    %cst_13 = arith.constant dense<0.000000e+00> : vector<256x8xf32>
    %9 = tpu.matmul %6, %8, %cst_13 {dimension_numbers = #tpu.dot_dimension_numbers<[1], [0], [0], [1], [0, 0, 1, 1], [], []>} : vector<256x4xbf16>, vector<4x8xbf16>, vector<256x8xf32> -> vector<256x8xf32>
    %c0_14 = arith.constant 0 : index
    %c0_15 = arith.constant 0 : index
    %10 = vector.load %arg6[%c0_14, %c0_15] : memref<256x8xf32, #tpu.memory_space<vmem>>, vector<256x8xf32>
    tpu.vector_store %arg6[%c0_14, %c0_15], %9 {strides = array<i32>} : memref<256x8xf32, #tpu.memory_space<vmem>>, vector<256x8xf32>,
    %c0_16 = arith.constant 0 : index
    %c8_17 = arith.constant 8 : index
    %c0_18 = arith.constant 0 : index
    %11 = vector.load %arg5[%c0_16, %c8_17, %c0_18] : memref<18x25x4xbf16, #tpu.memory_space<vmem>>, vector<16x16x4xbf16>
    %12 = vector.shape_cast %11 : vector<16x16x4xbf16> to vector<256x4xbf16>
    %c0_19 = arith.constant 0 : index
    %c1_20 = arith.constant 1 : index
    %c0_21 = arith.constant 0 : index
    %c0_22 = arith.constant 0 : index
    %13 = vector.load %arg2[%c0_19, %c1_20, %c0_21, %c0_22] : memref<3x3x4x8xbf16, #tpu.memory_space<vmem>>, vector<1x1x4x8xbf16>
    %14 = vector.shape_cast %13 : vector<1x1x4x8xbf16> to vector<4x8xbf16>
    %cst_23 = arith.constant dense<0.000000e+00> : vector<256x8xf32>
    %15 = tpu.matmul %12, %14, %cst_23 {dimension_numbers = #tpu.dot_dimension_numbers<[1], [0], [0], [1], [0, 0, 1, 1], [], []>} : vector<256x4xbf16>, vector<4x8xbf16>, vector<256x8xf32> -> vector<256x8xf32>
    %c0_24 = arith.constant 0 : index
    %c0_25 = arith.constant 0 : index
    %16 = vector.load %arg6[%c0_24, %c0_25] : memref<256x8xf32, #tpu.memory_space<vmem>>, vector<256x8xf32>
    %17 = arith.addf %16, %15 : vector<256x8xf32>
    %c0_26 = arith.constant 0 : index
    %c0_27 = arith.constant 0 : index
    %18 = vector.load %arg6[%c0_26, %c0_27] : memref<256x8xf32, #tpu.memory_space<vmem>>, vector<256x8xf32>
    tpu.vector_store %arg6[%c0_26, %c0_27], %17 {strides = array<i32>} : memref<256x8xf32, #tpu.memory_space<vmem>>, vector<256x8xf32>,
    %c0_28 = arith.constant 0 : index
    %c9 = arith.constant 9 : index
    %c0_29 = arith.constant 0 : index
    %19 = vector.load %arg5[%c0_28, %c9, %c0_29] : memref<18x25x4xbf16, #tpu.memory_space<vmem>>, vector<16x16x4xbf16>
    %20 = vector.shape_cast %19 : vector<16x16x4xbf16> to vector<256x4xbf16>
    %c0_30 = arith.constant 0 : index
    %c2 = arith.constant 2 : index
    %c0_31 = arith.constant 0 : index
    %c0_32 = arith.constant 0 : index
    %21 = vector.load %arg2[%c0_30, %c2, %c0_31, %c0_32] : memref<3x3x4x8xbf16, #tpu.memory_space<vmem>>, vector<1x1x4x8xbf16>
    %22 = vector.shape_cast %21 : vector<1x1x4x8xbf16> to vector<4x8xbf16>
    %cst_33 = arith.constant dense<0.000000e+00> : vector<256x8xf32>
    %23 = tpu.matmul %20, %22, %cst_33 {dimension_numbers = #tpu.dot_dimension_numbers<[1], [0], [0], [1], [0, 0, 1, 1], [], []>} : vector<256x4xbf16>, vector<4x8xbf16>, vector<256x8xf32> -> vector<256x8xf32>
    %c0_34 = arith.constant 0 : index
    %c0_35 = arith.constant 0 : index
    %24 = vector.load %arg6[%c0_34, %c0_35] : memref<256x8xf32, #tpu.memory_space<vmem>>, vector<256x8xf32>
    %25 = arith.addf %24, %23 : vector<256x8xf32>
    %c0_36 = arith.constant 0 : index
    %c0_37 = arith.constant 0 : index
    %26 = vector.load %arg6[%c0_36, %c0_37] : memref<256x8xf32, #tpu.memory_space<vmem>>, vector<256x8xf32>
    tpu.vector_store %arg6[%c0_36, %c0_37], %25 {strides = array<i32>} : memref<256x8xf32, #tpu.memory_space<vmem>>, vector<256x8xf32>,
    %c1_38 = arith.constant 1 : index
    %c7_39 = arith.constant 7 : index
    %c0_40 = arith.constant 0 : index
    %27 = vector.load %arg5[%c1_38, %c7_39, %c0_40] : memref<18x25x4xbf16, #tpu.memory_space<vmem>>, vector<16x16x4xbf16>
    %28 = vector.shape_cast %27 : vector<16x16x4xbf16> to vector<256x4xbf16>
    %c1_41 = arith.constant 1 : index
    %c0_42 = arith.constant 0 : index
    %c0_43 = arith.constant 0 : index
    %c0_44 = arith.constant 0 : index
    %29 = vector.load %arg2[%c1_41, %c0_42, %c0_43, %c0_44] : memref<3x3x4x8xbf16, #tpu.memory_space<vmem>>, vector<1x1x4x8xbf16>
    %30 = vector.shape_cast %29 : vector<1x1x4x8xbf16> to vector<4x8xbf16>
    %cst_45 = arith.constant dense<0.000000e+00> : vector<256x8xf32>
    %31 = tpu.matmul %28, %30, %cst_45 {dimension_numbers = #tpu.dot_dimension_numbers<[1], [0], [0], [1], [0, 0, 1, 1], [], []>} : vector<256x4xbf16>, vector<4x8xbf16>, vector<256x8xf32> -> vector<256x8xf32>
    %c0_46 = arith.constant 0 : index
    %c0_47 = arith.constant 0 : index
    %32 = vector.load %arg6[%c0_46, %c0_47] : memref<256x8xf32, #tpu.memory_space<vmem>>, vector<256x8xf32>
    %33 = arith.addf %32, %31 : vector<256x8xf32>
    %c0_48 = arith.constant 0 : index
    %c0_49 = arith.constant 0 : index
    %34 = vector.load %arg6[%c0_48, %c0_49] : memref<256x8xf32, #tpu.memory_space<vmem>>, vector<256x8xf32>
    tpu.vector_store %arg6[%c0_48, %c0_49], %33 {strides = array<i32>} : memref<256x8xf32, #tpu.memory_space<vmem>>, vector<256x8xf32>,
    %c1_50 = arith.constant 1 : index
    %c8_51 = arith.constant 8 : index
    %c0_52 = arith.constant 0 : index
    %35 = vector.load %arg5[%c1_50, %c8_51, %c0_52] : memref<18x25x4xbf16, #tpu.memory_space<vmem>>, vector<16x16x4xbf16>
    %36 = vector.shape_cast %35 : vector<16x16x4xbf16> to vector<256x4xbf16>
    %c1_53 = arith.constant 1 : index
    %c1_54 = arith.constant 1 : index
    %c0_55 = arith.constant 0 : index
    %c0_56 = arith.constant 0 : index
    %37 = vector.load %arg2[%c1_53, %c1_54, %c0_55, %c0_56] : memref<3x3x4x8xbf16, #tpu.memory_space<vmem>>, vector<1x1x4x8xbf16>
    %38 = vector.shape_cast %37 : vector<1x1x4x8xbf16> to vector<4x8xbf16>
    %cst_57 = arith.constant dense<0.000000e+00> : vector<256x8xf32>
    %39 = tpu.matmul %36, %38, %cst_57 {dimension_numbers = #tpu.dot_dimension_numbers<[1], [0], [0], [1], [0, 0, 1, 1], [], []>} : vector<256x4xbf16>, vector<4x8xbf16>, vector<256x8xf32> -> vector<256x8xf32>
    %c0_58 = arith.constant 0 : index
    %c0_59 = arith.constant 0 : index
    %40 = vector.load %arg6[%c0_58, %c0_59] : memref<256x8xf32, #tpu.memory_space<vmem>>, vector<256x8xf32>
    %41 = arith.addf %40, %39 : vector<256x8xf32>
    %c0_60 = arith.constant 0 : index
    %c0_61 = arith.constant 0 : index
    %42 = vector.load %arg6[%c0_60, %c0_61] : memref<256x8xf32, #tpu.memory_space<vmem>>, vector<256x8xf32>
    tpu.vector_store %arg6[%c0_60, %c0_61], %41 {strides = array<i32>} : memref<256x8xf32, #tpu.memory_space<vmem>>, vector<256x8xf32>,
    %c1_62 = arith.constant 1 : index
    %c9_63 = arith.constant 9 : index
    %c0_64 = arith.constant 0 : index
    %43 = vector.load %arg5[%c1_62, %c9_63, %c0_64] : memref<18x25x4xbf16, #tpu.memory_space<vmem>>, vector<16x16x4xbf16>
    %44 = vector.shape_cast %43 : vector<16x16x4xbf16> to vector<256x4xbf16>
    %c1_65 = arith.constant 1 : index
    %c2_66 = arith.constant 2 : index
    %c0_67 = arith.constant 0 : index
    %c0_68 = arith.constant 0 : index
    %45 = vector.load %arg2[%c1_65, %c2_66, %c0_67, %c0_68] : memref<3x3x4x8xbf16, #tpu.memory_space<vmem>>, vector<1x1x4x8xbf16>
    %46 = vector.shape_cast %45 : vector<1x1x4x8xbf16> to vector<4x8xbf16>
    %cst_69 = arith.constant dense<0.000000e+00> : vector<256x8xf32>
    %47 = tpu.matmul %44, %46, %cst_69 {dimension_numbers = #tpu.dot_dimension_numbers<[1], [0], [0], [1], [0, 0, 1, 1], [], []>} : vector<256x4xbf16>, vector<4x8xbf16>, vector<256x8xf32> -> vector<256x8xf32>
    %c0_70 = arith.constant 0 : index
    %c0_71 = arith.constant 0 : index
    %48 = vector.load %arg6[%c0_70, %c0_71] : memref<256x8xf32, #tpu.memory_space<vmem>>, vector<256x8xf32>
    %49 = arith.addf %48, %47 : vector<256x8xf32>
    %c0_72 = arith.constant 0 : index
    %c0_73 = arith.constant 0 : index
    %50 = vector.load %arg6[%c0_72, %c0_73] : memref<256x8xf32, #tpu.memory_space<vmem>>, vector<256x8xf32>
    tpu.vector_store %arg6[%c0_72, %c0_73], %49 {strides = array<i32>} : memref<256x8xf32, #tpu.memory_space<vmem>>, vector<256x8xf32>,
    %c2_74 = arith.constant 2 : index
    %c7_75 = arith.constant 7 : index
    %c0_76 = arith.constant 0 : index
    %51 = vector.load %arg5[%c2_74, %c7_75, %c0_76] : memref<18x25x4xbf16, #tpu.memory_space<vmem>>, vector<16x16x4xbf16>
    %52 = vector.shape_cast %51 : vector<16x16x4xbf16> to vector<256x4xbf16>
    %c2_77 = arith.constant 2 : index
    %c0_78 = arith.constant 0 : index
    %c0_79 = arith.constant 0 : index
    %c0_80 = arith.constant 0 : index
    %53 = vector.load %arg2[%c2_77, %c0_78, %c0_79, %c0_80] : memref<3x3x4x8xbf16, #tpu.memory_space<vmem>>, vector<1x1x4x8xbf16>
    %54 = vector.shape_cast %53 : vector<1x1x4x8xbf16> to vector<4x8xbf16>
    %cst_81 = arith.constant dense<0.000000e+00> : vector<256x8xf32>
    %55 = tpu.matmul %52, %54, %cst_81 {dimension_numbers = #tpu.dot_dimension_numbers<[1], [0], [0], [1], [0, 0, 1, 1], [], []>} : vector<256x4xbf16>, vector<4x8xbf16>, vector<256x8xf32> -> vector<256x8xf32>
    %c0_82 = arith.constant 0 : index
    %c0_83 = arith.constant 0 : index
    %56 = vector.load %arg6[%c0_82, %c0_83] : memref<256x8xf32, #tpu.memory_space<vmem>>, vector<256x8xf32>
    %57 = arith.addf %56, %55 : vector<256x8xf32>
    %c0_84 = arith.constant 0 : index
    %c0_85 = arith.constant 0 : index
    %58 = vector.load %arg6[%c0_84, %c0_85] : memref<256x8xf32, #tpu.memory_space<vmem>>, vector<256x8xf32>
    tpu.vector_store %arg6[%c0_84, %c0_85], %57 {strides = array<i32>} : memref<256x8xf32, #tpu.memory_space<vmem>>, vector<256x8xf32>,
    %c2_86 = arith.constant 2 : index
    %c8_87 = arith.constant 8 : index
    %c0_88 = arith.constant 0 : index
    %59 = vector.load %arg5[%c2_86, %c8_87, %c0_88] : memref<18x25x4xbf16, #tpu.memory_space<vmem>>, vector<16x16x4xbf16>
    %60 = vector.shape_cast %59 : vector<16x16x4xbf16> to vector<256x4xbf16>
    %c2_89 = arith.constant 2 : index
    %c1_90 = arith.constant 1 : index
    %c0_91 = arith.constant 0 : index
    %c0_92 = arith.constant 0 : index
    %61 = vector.load %arg2[%c2_89, %c1_90, %c0_91, %c0_92] : memref<3x3x4x8xbf16, #tpu.memory_space<vmem>>, vector<1x1x4x8xbf16>
    %62 = vector.shape_cast %61 : vector<1x1x4x8xbf16> to vector<4x8xbf16>
    %cst_93 = arith.constant dense<0.000000e+00> : vector<256x8xf32>
    %63 = tpu.matmul %60, %62, %cst_93 {dimension_numbers = #tpu.dot_dimension_numbers<[1], [0], [0], [1], [0, 0, 1, 1], [], []>} : vector<256x4xbf16>, vector<4x8xbf16>, vector<256x8xf32> -> vector<256x8xf32>
    %c0_94 = arith.constant 0 : index
    %c0_95 = arith.constant 0 : index
    %64 = vector.load %arg6[%c0_94, %c0_95] : memref<256x8xf32, #tpu.memory_space<vmem>>, vector<256x8xf32>
    %65 = arith.addf %64, %63 : vector<256x8xf32>
    %c0_96 = arith.constant 0 : index
    %c0_97 = arith.constant 0 : index
    %66 = vector.load %arg6[%c0_96, %c0_97] : memref<256x8xf32, #tpu.memory_space<vmem>>, vector<256x8xf32>
    tpu.vector_store %arg6[%c0_96, %c0_97], %65 {strides = array<i32>} : memref<256x8xf32, #tpu.memory_space<vmem>>, vector<256x8xf32>,
    %c2_98 = arith.constant 2 : index
    %c9_99 = arith.constant 9 : index
    %c0_100 = arith.constant 0 : index
    %67 = vector.load %arg5[%c2_98, %c9_99, %c0_100] : memref<18x25x4xbf16, #tpu.memory_space<vmem>>, vector<16x16x4xbf16>
    %68 = vector.shape_cast %67 : vector<16x16x4xbf16> to vector<256x4xbf16>
    %c2_101 = arith.constant 2 : index
    %c2_102 = arith.constant 2 : index
    %c0_103 = arith.constant 0 : index
    %c0_104 = arith.constant 0 : index
    %69 = vector.load %arg2[%c2_101, %c2_102, %c0_103, %c0_104] : memref<3x3x4x8xbf16, #tpu.memory_space<vmem>>, vector<1x1x4x8xbf16>
    %70 = vector.shape_cast %69 : vector<1x1x4x8xbf16> to vector<4x8xbf16>
    %cst_105 = arith.constant dense<0.000000e+00> : vector<256x8xf32>
    %71 = tpu.matmul %68, %70, %cst_105 {dimension_numbers = #tpu.dot_dimension_numbers<[1], [0], [0], [1], [0, 0, 1, 1], [], []>} : vector<256x4xbf16>, vector<4x8xbf16>, vector<256x8xf32> -> vector<256x8xf32>
    %c0_106 = arith.constant 0 : index
    %c0_107 = arith.constant 0 : index
    %72 = vector.load %arg6[%c0_106, %c0_107] : memref<256x8xf32, #tpu.memory_space<vmem>>, vector<256x8xf32>
    %73 = arith.addf %72, %71 : vector<256x8xf32>
    %c0_108 = arith.constant 0 : index
    %c0_109 = arith.constant 0 : index
    %74 = vector.load %arg6[%c0_108, %c0_109] : memref<256x8xf32, #tpu.memory_space<vmem>>, vector<256x8xf32>
    tpu.vector_store %arg6[%c0_108, %c0_109], %73 {strides = array<i32>} : memref<256x8xf32, #tpu.memory_space<vmem>>, vector<256x8xf32>,
    %c0_110 = arith.constant 0 : index
    %c0_111 = arith.constant 0 : index
    %75 = vector.load %arg6[%c0_110, %c0_111] : memref<256x8xf32, #tpu.memory_space<vmem>>, vector<256x8xf32>
    %c0_112 = arith.constant 0 : index
    %c0_113 = arith.constant 0 : index
    %76 = vector.load %arg3[%c0_112, %c0_113] : memref<1x8xf32, #tpu.memory_space<vmem>>, vector<1x8xf32>
    %77 = vector.broadcast %76 : vector<1x8xf32> to vector<256x8xf32>
    %78 = arith.addf %75, %77 : vector<256x8xf32>
    %79 = vector.shape_cast %78 : vector<256x8xf32> to vector<1x16x16x8xf32>
    %c0_114 = arith.constant 0 : index
    %c0_115 = arith.constant 0 : index
    %c0_116 = arith.constant 0 : index
    %c0_117 = arith.constant 0 : index
    %80 = vector.load %arg4[%c0_114, %c0_115, %c0_116, %c0_117] : memref<1x16x16x8xf32, #tpu.memory_space<vmem>>, vector<1x16x16x8xf32>
    tpu.vector_store %arg4[%c0_114, %c0_115, %c0_116, %c0_117], %79 {strides = array<i32>} : memref<1x16x16x8xf32, #tpu.memory_space<vmem>>, vector<1x16x16x8xf32>,
    return
  }
  func.func @transform_0(%arg0: i32) -> (i32, i32, i32, i32) {
    %c0_i32 = arith.constant 0 : i32
    %c0_i32_0 = arith.constant 0 : i32
    %c0_i32_1 = arith.constant 0 : i32
    %c0_i32_2 = arith.constant 0 : i32
    return %arg0, %c0_i32, %c0_i32_0, %c0_i32_1 : i32, i32, i32, i32
  }
  func.func @transform_1(%arg0: i32) -> (i32, i32, i32, i32) {
    %c0_i32 = arith.constant 0 : i32
    %c0_i32_0 = arith.constant 0 : i32
    %c0_i32_1 = arith.constant 0 : i32
    %c0_i32_2 = arith.constant 0 : i32
    %c0_i32_3 = arith.constant 0 : i32
    return %c0_i32, %c0_i32_0, %c0_i32_1, %c0_i32_2 : i32, i32, i32, i32
  }
  func.func @transform_2(%arg0: i32) -> (i32, i32) {
    %c0_i32 = arith.constant 0 : i32
    %c0_i32_0 = arith.constant 0 : i32
    %c0_i32_1 = arith.constant 0 : i32
    return %c0_i32, %c0_i32_0 : i32, i32
  }
  func.func @transform_3(%arg0: i32) -> (i32, i32, i32, i32) {
    %c0_i32 = arith.constant 0 : i32
    %c0_i32_0 = arith.constant 0 : i32
    %c0_i32_1 = arith.constant 0 : i32
    %c0_i32_2 = arith.constant 0 : i32
    return %arg0, %c0_i32, %c0_i32_0, %c0_i32_1 : i32, i32, i32, i32
  }
}

</mosaic_0001>

<bundles_post_ra>
// kernel: tpu_custom_call.1
= control target key start
LH: loop header
LB: loop body
LE: loop exit
PB: predicated region body
PF: predicated region fallthrough
CT: control target
= control target key end

     0   :  { %s6206_s12 = smov 0   ;;  %s8093_s0 = inlined_call_operand.vmem [shape: bf16[2,16,16,4], index: 0, kind: input, shape index: {}]   ;;  %s8094_s1 = inlined_call_operand.vmem [shape: bf16[3,3,4,8], index: 1, kind: input, shape index: {}]   ;;  %s8095_s2 = inlined_call_operand.vmem [shape: f32[1,8], index: 2, kind: input, shape index: {}]   ;;  %s8096_s3 = inlined_call_operand.vmem [shape: f32[2,16,16,8], index: 3, kind: output, shape index: {}]  }
   0x1 LB: > { %s5710_s13 = sadd.s32 4294967295, %s6183_s12   ;;  %p5714_p0 = scmp.ge.s32.totalorder %s6183_s12, 1  ;;  %s6183_s12 = sphi %s6206_s12, %s13_s12  }
   0x2   : > { %p137_p1 = scmp.lt.s32.totalorder %s6183_s12, 3 }
   0x4   : > { %p138_p2 = pnand %p5714_p0, %p137_p1 }
   0x5   : > { %p161_p3 = scmp.lt.s32.totalorder (!%p138_p2), %s5710_s13, 1 }
   0x6   : > { %141 = sbr.rel (%p138_p2) target bundleno = 821 (0x335), region = 32 }
   0xb   : > { %v751_v0 = vld [vmem:[%s8094_s1] sm:$0x3]  ;;  %vm849_vm0 = vcmask 1041408   ;;  %vm204_vm1 = vcmask 27648   ;;  %v6185_v2 = vmov 0   ;;  %s8104_s13 = smov (!%p161_p3, %s5710_s13), 1 }
   0xc   : > { %v851_v1 = vsel %vm849_vm0, %v751_v0, 0  ;;  %232 = vst.msk [vmem:[#allocation2 + $0x40] sm:$0xf] %vm204_vm1, %v6185_v2  ;;  %s6113_s16 = sshll.u32 %s8104_s13, 7  ;;  %vm209_vm2 = vsmask.f32 256 }
   0xd   : > { %6163 = vmatpush.bf16.msra.mxu1 %v851_v1  ;;  %6164 = vmatpush.bf16.msra.mxu2 %v851_v1  ;;  %233 = vst.msk [vmem:[#allocation2 + $0x44] sm:$0xf] %vm204_vm1, %v6185_v2  ;;  %s6232_s19 = scalar_lea.vmem %s8093_s0, %s6113_s16  ;;  %vm397_vm3 = vsmask.f32 4368  ;;  %vm800_vm5 = vcmask 31744   ;;  %vm208_vm6 = vcmask 24576  }
   0xe   : > { %234 = vst.msk [vmem:[#allocation2 + $0x48] sm:$0xf] %vm204_vm1, %v6185_v2  ;;  %6165 = vmatpush.bf16.msra.mxu3 %v851_v1  ;;  %860 = vmatpush.bf16.msra.mxu0 %v851_v1  ;;  %v178_v3 = vld [vmem:[%s6232_s19 + $0x18] sm:$0xf]  ;;  %v179_v4 = vld [vmem:[%s6232_s19 + $0x1c] sm:$0xf]  ;;  %vm6261_vm4 = vmor %vm209_vm2, %vm397_vm3 }
   0xf   : > { %205 = vst.msk [vmem:[#allocation2] sm:$0xf] %vm204_vm1, %v6185_v2  ;;  %v5751_v25 = vld [vmem:[%s8094_s1 + $0x2] sm:$0x3]  ;;  %v5832_v26 = vld [vmem:[%s8094_s1 + $0x4] sm:$0x3]  ;;  %vm6501_vm7 = vmand %vm208_vm6, %vm209_vm2 }
  0x10   : > { %206 = vst.msk [vmem:[#allocation2 + $0x4] sm:$0xf] %vm204_vm1, %v6185_v2  ;;  %v1138_v27 = vsel %vm849_vm0, %v5751_v25, 0  ;;  %v1859_v28 = vsel %vm849_vm0, %v5832_v26, 0  ;;  %v5865_v29 = vld [vmem:[%s8094_s1 + $0x6] sm:$0x3] }
  0x11   : > { %207 = vst.msk [vmem:[#allocation2 + $0x8] sm:$0xf] %vm204_vm1, %v6185_v2  ;;  %1147 = vmatpush.bf16.msrb.mxu1 %v1138_v27  ;;  %1868 = vmatpush.bf16.msrb.mxu2 %v1859_v28  ;;  %v2545_v30 = vsel %vm849_vm0, %v5865_v29, 0  ;;  %v186_v32 = vld [vmem:[%s6232_s19 + $0x38] sm:$0xf]  ;;  %vm942_vm11 = vcmask 64512  }
  0x12   : > { %323 = vst.msk [vmem:[#allocation2 + $0x44] sm:$0xf] %vm204_vm1, %v178_v3  ;;  %2554 = vmatpush.bf16.msrb.mxu3 %v2545_v30  ;;  %v187_v33 = vld [vmem:[%s6232_s19 + $0x3c] sm:$0xf]  ;;  %v194_v36 = vld [vmem:[%s6232_s19 + $0x58] sm:$0xf] }
  0x13   : > { %324 = vst.msk [vmem:[#allocation2 + $0x48] sm:$0xf] %vm204_vm1, %v179_v4  ;;  %v361_v5 = vld [vmem:[#allocation2 + $0x40] sm:$0x8]  ;;  %v195_v39 = vld [vmem:[%s6232_s19 + $0x5c] sm:$0xf] }
  0x14   : > { %214 = vst.msk [vmem:[#allocation2 + $0x10] sm:$0xf] %vm204_vm1, %v6185_v2  ;;  %v488_v6 = vshrl.u32 %v361_v5, 16  ;;  %v180_v43 = vld [vmem:[%s6232_s19 + $0x20] sm:$0xf]  ;;  %s6114_s9 = sshll.u32 %s8104_s13, 8 }
  0x15   : > { %215 = vst.msk [vmem:[#allocation2 + $0x14] sm:$0xf] %vm204_vm1, %v6185_v2  ;;  %v181_v46 = vld [vmem:[%s6232_s19 + $0x24] sm:$0xf]  ;;  %v188_v50 = vld [vmem:[%s6232_s19 + $0x40] sm:$0xf]  ;;  %s7673_s15 = scalar_lea.vmem %s8096_s3, %s6114_s9 }
  0x16   : > { %216 = vst.msk [vmem:[#allocation2 + $0x18] sm:$0xf] %vm204_vm1, %v6185_v2  ;;  %v5723_v13 = vrot.slane %v488_v6, 11  ;;  %v349_v49 = vld [vmem:[#allocation2] sm:$0x8] }
  0x17   : > { %220 = vst.msk [vmem:[#allocation2 + $0x20] sm:$0xf] %vm204_vm1, %v6185_v2  ;;  %v350_v40 = vld [vmem:[#allocation2 + $0x4] sm:$0xf]  ;;  %v400_v51 = vshrl.u32 %v349_v49, 16 }
  0x18   : > { %221 = vst.msk [vmem:[#allocation2 + $0x24] sm:$0xf] %vm204_vm1, %v6185_v2  ;;  %v351_v41 = vld [vmem:[#allocation2 + $0x8] sm:$0xf]  ;;  %v405_v44 = vshrl.u32 %v350_v40, 16  ;;  %v408_v53 = vshll.u32 %v350_v40, 16 }
  0x19   : > { %v362_v7 = vld [vmem:[#allocation2 + $0x44] sm:$0xf]  ;;  %222 = vst.msk [vmem:[#allocation2 + $0x28] sm:$0xf] %vm204_vm1, %v6185_v2  ;;  %v414_v45 = vshrl.u32 %v351_v41, 16  ;;  %v417_v57 = vshll.u32 %v351_v41, 16 }
  0x1a   : > { %v363_v8 = vld [vmem:[#allocation2 + $0x48] sm:$0xf]  ;;  %v493_v9 = vshrl.u32 %v362_v7, 16  ;;  %v496_v10 = vshll.u32 %v362_v7, 16  ;;  %226 = vst.msk [vmem:[#allocation2 + $0x30] sm:$0xf] %vm204_vm1, %v6185_v2 }
  0x1b   : > { %v502_v11 = vshrl.u32 %v363_v8, 16  ;;  %v505_v12 = vshll.u32 %v363_v8, 16  ;;  %227 = vst.msk [vmem:[#allocation2 + $0x34] sm:$0xf] %vm204_vm1, %v6185_v2  ;;  %v407_v52 = vrot.slane %v405_v44, 7  ;;  %v416_v54 = vrot.slane %v414_v45, 7 }
  0x1c   : > { %v495_v14 = vrot.slane %v493_v9, 7  ;;  %228 = vst.msk [vmem:[#allocation2 + $0x38] sm:$0xf] %vm204_vm1, %v6185_v2  ;;  %v189_v56 = vld [vmem:[%s6232_s19 + $0x44] sm:$0xf]  ;;  %v5719_v60 = vrot.slane %v400_v51, 11 }
  0x1d   : > { %v504_v16 = vrot.slane %v502_v11, 7  ;;  %238 = vst.msk [vmem:[#allocation2 + $0x50] sm:$0xf] %vm204_vm1, %v6185_v2  ;;  %v410_v61 = vor.u32 %v408_v53, %v407_v52  ;;  %v412_v62 = vrot.slane %v407_v52, 4  ;;  %v419_v63 = vor.u32 %v417_v57, %v416_v54  ;;  %v196_v0 = vld [vmem:[%s6232_s19 + $0x60] sm:$0xf] }
  0x1e   : > { %v498_v17 = vor.u32 %v496_v10, %v495_v14  ;;  %v500_v18 = vrot.slane %v495_v14, 4  ;;  %239 = vst.msk [vmem:[#allocation2 + $0x54] sm:$0xf] %vm204_vm1, %v6185_v2  ;;  %v197_v1 = vld [vmem:[%s6232_s19 + $0x64] sm:$0xf] }
  0x1f   : > { %v507_v19 = vor.u32 %v505_v12, %v504_v16  ;;  %240 = vst.msk [vmem:[#allocation2 + $0x58] sm:$0xf] %vm204_vm1, %v6185_v2  ;;  %v411_v4 = vsel %vm6261_vm4, %v5719_v60, %v410_v61  ;;  %v420_v6 = vsel %vm6261_vm4, %v412_v62, %v419_v63  ;;  %v5882_v8 = vld [vmem:[%s8094_s1 + $0x8] sm:$0x3]  ;;  %v183_v28 = vld [vmem:[%s6232_s19 + $0x2c] sm:$0xf] }
  0x20   : > { %v499_v20 = vsel %vm6261_vm4, %v5723_v13, %v498_v17  ;;  %244 = vst.msk [vmem:[#allocation2 + $0x60] sm:$0xf] %vm204_vm1, %v6185_v2  ;;  %v752_v7 = vunpack.c.l.b16 %v411_v4  ;;  %v753_v11 = vunpack.c.l.b16 %v420_v6  ;;  %v2895_v12 = vsel %vm849_vm0, %v5882_v8, 0  ;;  %v191_v44 = vld [vmem:[%s6232_s19 + $0x4c] sm:$0xf] }
  0x21   : > { %v508_v21 = vsel %vm6261_vm4, %v500_v18, %v507_v19  ;;  %v760_v22 = vunpack.c.l.b16 %v499_v20  ;;  %245 = vst.msk [vmem:[#allocation2 + $0x64] sm:$0xf] %vm204_vm1, %v6185_v2  ;;  %2904 = vmatpush.bf16.msrb.mxu0 %v2895_v12  ;;  %v172_v6 = vld [vmem:[%s6232_s19] sm:$0xf]  ;;  %vm1373_vm8 = vsmask.f32 3328 }
  0x22   : > { %v761_v23 = vunpack.c.l.b16 %v508_v21  ;;  %246 = vst.msk [vmem:[#allocation2 + $0x68] sm:$0xf] %vm204_vm1, %v6185_v2  ;;  %v784_v21 = vpack.c.b16 %v753_v11, %v752_v7  ;;  %v173_v7 = vld [vmem:[%s6232_s19 + $0x4] sm:$0xf]  ;;  %vm1374_vm9 = vsmask.f32 7440 }
  0x23   : > { %250 = vst.msk [vmem:[#allocation2 + $0x70] sm:$0xf] %vm204_vm1, %v6185_v2  ;;  %vm6536_vm10 = vmor %vm1373_vm8, %vm1374_vm9 }
  0x24   : > { %v788_v24 = vpack.c.b16 %v761_v23, %v760_v22  ;;  %251 = vst.msk [vmem:[#allocation2 + $0x74] sm:$0xf] %vm204_vm1, %v6185_v2  ;;  %v364_v37 = vld [vmem:[#allocation2 + $0x50] sm:$0x8]  ;;  %v182_v22 = vld [vmem:[%s6232_s19 + $0x28] sm:$0xf]  ;;  %5735 = vmatmul.msk.bf16.vlgmr.msra.gmra.mxu0 %vm800_vm5, %v784_v21 }
  0x25   : > { %252 = vst.msk [vmem:[#allocation2 + $0x78] sm:$0xf] %vm204_vm1, %v6185_v2  ;;  %v510_v47 = vshrl.u32 %v364_v37, 16 }
  0x26   : > { %5739 = vmatmul.msk.bf16.vlgmr.msra.gmra.mxu1 %vm800_vm5, %v788_v24  ;;  %256 = vst.msk [vmem:[#allocation2 + $0x80] sm:$0xf] %vm204_vm1, %v6185_v2 }
  0x27   : > { %257 = vst.msk [vmem:[#allocation2 + $0x84] sm:$0xf] %vm204_vm1, %v6185_v2  ;;  %v367_v9 = vld [vmem:[#allocation2 + $0x60] sm:$0x8] }
  0x28   : > { %258 = vst.msk [vmem:[#allocation2 + $0x88] sm:$0xf] %vm204_vm1, %v6185_v2  ;;  %v532_v13 = vshrl.u32 %v367_v9, 16 }
  0x29   : > { %262 = vst.msk [vmem:[#allocation2 + $0x90] sm:$0xf] %vm204_vm1, %v6185_v2 }
  0x2a   : > { %263 = vst.msk [vmem:[#allocation2 + $0x94] sm:$0xf] %vm204_vm1, %v6185_v2 }
  0x2b   : > { %264 = vst.msk [vmem:[#allocation2 + $0x98] sm:$0xf] %vm204_vm1, %v6185_v2 }
  0x2c   : > { %268 = vst.msk [vmem:[#allocation2 + $0xa0] sm:$0xf] %vm204_vm1, %v6185_v2 }
  0x2d   : > { %269 = vst.msk [vmem:[#allocation2 + $0xa4] sm:$0xf] %vm204_vm1, %v6185_v2  ;;  %v373_v31 = vld [vmem:[#allocation2 + $0x80] sm:$0x8] }
  0x2e   : > { %270 = vst.msk [vmem:[#allocation2 + $0xa8] sm:$0xf] %vm204_vm1, %v6185_v2  ;;  %v576_v34 = vshrl.u32 %v373_v31, 16 }
  0x2f   : > { %274 = vst.msk [vmem:[#allocation2 + $0xb0] sm:$0xf] %vm204_vm1, %v6185_v2 }
  0x30   : > { %275 = vst.msk [vmem:[#allocation2 + $0xb4] sm:$0xf] %vm204_vm1, %v6185_v2  ;;  %v376_v38 = vld [vmem:[#allocation2 + $0x90] sm:$0x8]  ;;  %v6369_v55 = vrot.slane %v576_v34, 11 }
  0x31   : > { %276 = vst.msk [vmem:[#allocation2 + $0xb8] sm:$0xf] %vm204_vm1, %v6185_v2  ;;  %v598_v48 = vshrl.u32 %v376_v38, 16  ;;  %v190_v34 = vld [vmem:[%s6232_s19 + $0x48] sm:$0xf] }
  0x32   : > { %280 = vst.msk [vmem:[#allocation2 + $0xc0] sm:$0xf] %vm204_vm1, %v6185_v2 }
  0x33   : > { %281 = vst.msk [vmem:[#allocation2 + $0xc4] sm:$0xf] %vm204_vm1, %v6185_v2  ;;  %v6382_v3 = vrot.slane %v598_v48, 11 }
  0x34   : > { %282 = vst.msk [vmem:[#allocation2 + $0xc8] sm:$0xf] %vm204_vm1, %v6185_v2 }
  0x35   : > { %286 = vst.msk [vmem:[#allocation2 + $0xd0] sm:$0xf] %vm204_vm1, %v6185_v2 }
  0x36   : > { %287 = vst.msk [vmem:[#allocation2 + $0xd4] sm:$0xf] %vm204_vm1, %v6185_v2 }
  0x37   : > { %288 = vst.msk [vmem:[#allocation2 + $0xd8] sm:$0xf] %vm204_vm1, %v6185_v2 }
  0x38   : > { %292 = vst.msk [vmem:[#allocation2 + $0xe0] sm:$0xf] %vm204_vm1, %v6185_v2 }
  0x39   : > { %293 = vst.msk [vmem:[#allocation2 + $0xe4] sm:$0xf] %vm204_vm1, %v6185_v2  ;;  %v385_v35 = vld [vmem:[#allocation2 + $0xc0] sm:$0x8] }
  0x3a   : > { %294 = vst.msk [vmem:[#allocation2 + $0xe8] sm:$0xf] %vm204_vm1, %v6185_v2  ;;  %v664_v42 = vshrl.u32 %v385_v35, 16 }
  0x3b   : > { %298 = vst.msk [vmem:[#allocation2 + $0xf0] sm:$0xf] %vm204_vm1, %v6185_v2 }
  0x3c   : > { %299 = vst.msk [vmem:[#allocation2 + $0xf4] sm:$0xf] %vm204_vm1, %v6185_v2  ;;  %v388_v58 = vld [vmem:[#allocation2 + $0xd0] sm:$0x8]  ;;  %v6374_v59 = vrot.slane %v664_v42, 11 }
  0x3d   : > { %300 = vst.msk [vmem:[#allocation2 + $0xf8] sm:$0xf] %vm204_vm1, %v6185_v2  ;;  %v686_v5 = vshrl.u32 %v388_v58, 16 }
  0x3e   : > { %304 = vst.msk [vmem:[#allocation2 + $0x100] sm:$0xf] %vm204_vm1, %v6185_v2 }
  0x3f   : > { %305 = vst.msk [vmem:[#allocation2 + $0x104] sm:$0xf] %vm204_vm1, %v6185_v2  ;;  %v6397_v27 = vrot.slane %v686_v5, 11 }
  0x40   : > { %306 = vst.msk [vmem:[#allocation2 + $0x108] sm:$0xf] %vm204_vm1, %v6185_v2 }
  0x41   : > { %310 = vst.msk [vmem:[#allocation2 + $0x110] sm:$0xf] %vm204_vm1, %v6185_v2 }
  0x42   : > { %311 = vst.msk [vmem:[#allocation2 + $0x114] sm:$0xf] %vm204_vm1, %v6185_v2 }
  0x43   : > { %312 = vst.msk [vmem:[#allocation2 + $0x118] sm:$0xf] %vm204_vm1, %v6185_v2  ;;  %v6380_v2 = vrot.slane %v510_v47, 11 }
  0x44   : > { %331 = vst.msk [vmem:[#allocation2 + $0x84] sm:$0xf] %vm204_vm1, %v186_v32 }
  0x45   : > { %332 = vst.msk [vmem:[#allocation2 + $0x88] sm:$0xf] %vm204_vm1, %v187_v33  ;;  %v6401_v33 = vrot.slane %v532_v13, 11 }
  0x46   : > { %339 = vst.msk [vmem:[#allocation2 + $0xc4] sm:$0xf] %vm204_vm1, %v194_v36 }
  0x47   : > { %340 = vst.msk [vmem:[#allocation2 + $0xc8] sm:$0xf] %vm204_vm1, %v195_v39 }
  0x48   : > { %325 = vst.msk [vmem:[#allocation2 + $0x54] sm:$0xf] %vm204_vm1, %v180_v43 }
  0x49   : > { %326 = vst.msk [vmem:[#allocation2 + $0x58] sm:$0xf] %vm204_vm1, %v181_v46 }
  0x4a   : > { %333 = vst.msk [vmem:[#allocation2 + $0x94] sm:$0xf] %vm204_vm1, %v188_v50 }
  0x4b   : > { %v374_v10 = vld [vmem:[#allocation2 + $0x84] sm:$0xf]  ;;  %334 = vst.msk [vmem:[#allocation2 + $0x98] sm:$0xf] %vm204_vm1, %v189_v56 }
  0x4c   : > { %v375_v14 = vld [vmem:[#allocation2 + $0x88] sm:$0xf]  ;;  %v581_v16 = vshrl.u32 %v374_v10, 16  ;;  %v584_v17 = vshll.u32 %v374_v10, 16  ;;  %341 = vst.msk [vmem:[#allocation2 + $0xd4] sm:$0xf] %vm204_vm1, %v196_v0 }
  0x4d   : > { %v590_v18 = vshrl.u32 %v375_v14, 16  ;;  %v593_v19 = vshll.u32 %v375_v14, 16  ;;  %v386_v20 = vld [vmem:[#allocation2 + $0xc4] sm:$0xf]  ;;  %342 = vst.msk [vmem:[#allocation2 + $0xd8] sm:$0xf] %vm204_vm1, %v197_v1 }
  0x4e   : > { %v583_v23 = vrot.slane %v581_v16, 7  ;;  %v387_v24 = vld [vmem:[#allocation2 + $0xc8] sm:$0xf]  ;;  %v669_v25 = vshrl.u32 %v386_v20, 16  ;;  %v672_v26 = vshll.u32 %v386_v20, 16 }
  0x4f   : > { %v592_v29 = vrot.slane %v590_v18, 7  ;;  %v678_v30 = vshrl.u32 %v387_v24, 16  ;;  %v681_v31 = vshll.u32 %v387_v24, 16  ;;  %v365_v32 = vld [vmem:[#allocation2 + $0x54] sm:$0xf] }
  0x50   : > { %v586_v35 = vor.u32 %v584_v17, %v583_v23  ;;  %v588_v36 = vrot.slane %v583_v23, 4  ;;  %v671_v37 = vrot.slane %v669_v25, 7  ;;  %v366_v38 = vld [vmem:[#allocation2 + $0x58] sm:$0xf]  ;;  %v515_v39 = vshrl.u32 %v365_v32, 16 }
  0x51   : > { %v595_v40 = vor.u32 %v593_v19, %v592_v29  ;;  %v680_v41 = vrot.slane %v678_v30, 7  ;;  %v518_v42 = vshll.u32 %v365_v32, 16  ;;  %v524_v43 = vshrl.u32 %v366_v38, 16  ;;  %v377_v49 = vld [vmem:[#allocation2 + $0x94] sm:$0xf] }
  0x52   : > { %v587_v45 = vsel %vm6261_vm4, %v6369_v55, %v586_v35  ;;  %v674_v46 = vor.u32 %v672_v26, %v671_v37  ;;  %v676_v47 = vrot.slane %v671_v37, 4  ;;  %v517_v48 = vrot.slane %v515_v39, 7  ;;  %327 = vst.msk [vmem:[#allocation2 + $0x64] sm:$0xf] %vm204_vm1, %v182_v22  ;;  %v378_v58 = vld [vmem:[#allocation2 + $0x98] sm:$0xf] }
  0x53   : > { %v596_v50 = vsel %vm6261_vm4, %v588_v36, %v595_v40  ;;  %v768_v51 = vunpack.c.l.b16 %v587_v45  ;;  %v683_v52 = vor.u32 %v681_v31, %v680_v41  ;;  %v526_v53 = vrot.slane %v524_v43, 7  ;;  %328 = vst.msk [vmem:[#allocation2 + $0x68] sm:$0xf] %vm204_vm1, %v183_v28  ;;  %v389_v0 = vld [vmem:[#allocation2 + $0xd4] sm:$0xf] }
  0x54   : > { %v769_v54 = vunpack.c.l.b16 %v596_v50  ;;  %v675_v55 = vsel %vm6261_vm4, %v6374_v59, %v674_v46  ;;  %v520_v56 = vor.u32 %v518_v42, %v517_v48  ;;  %v522_v57 = vrot.slane %v517_v48, 4  ;;  %335 = vst.msk [vmem:[#allocation2 + $0xa4] sm:$0xf] %vm204_vm1, %v190_v34  ;;  %v390_v12 = vld [vmem:[#allocation2 + $0xd8] sm:$0xf] }
  0x55   : > { %v684_v60 = vsel %vm6261_vm4, %v676_v47, %v683_v52  ;;  %v776_v61 = vunpack.c.l.b16 %v675_v55  ;;  %v527_v62 = vshll.u32 %v366_v38, 16  ;;  %v603_v63 = vshrl.u32 %v377_v49, 16  ;;  %336 = vst.msk [vmem:[#allocation2 + $0xa8] sm:$0xf] %vm204_vm1, %v191_v44  ;;  %v198_v22 = vld [vmem:[%s6232_s19 + $0x68] sm:$0xf] }
  0x56   : > { %v792_v1 = vpack.c.b16 %v769_v54, %v768_v51  ;;  %v777_v4 = vunpack.c.l.b16 %v684_v60  ;;  %v521_v59 = vsel %vm6261_vm4, %v6380_v2, %v520_v56  ;;  %v606_v5 = vshll.u32 %v377_v49, 16  ;;  %317 = vst.msk [vmem:[#allocation2 + $0x14] sm:$0xf] %vm204_vm1, %v172_v6  ;;  %v379_v34 = vld [vmem:[#allocation2 + $0xa0] sm:$0x8] }
  0x57   : > { %v529_v8 = vor.u32 %v527_v62, %v526_v53  ;;  %v762_v9 = vunpack.c.l.b16 %v521_v59  ;;  %v605_v10 = vrot.slane %v603_v63, 7  ;;  %v612_v11 = vshrl.u32 %v378_v58, 16  ;;  %318 = vst.msk [vmem:[#allocation2 + $0x18] sm:$0xf] %vm204_vm1, %v173_v7  ;;  %v199_v35 = vld [vmem:[%s6232_s19 + $0x6c] sm:$0xf] }
  0x58   : > { %5743 = vmatmul.msk.bf16.vlgmr.msra.gmra.mxu2 %vm800_vm5, %v792_v1  ;;  %v796_v13 = vpack.c.b16 %v777_v4, %v776_v61  ;;  %v615_v14 = vshll.u32 %v378_v58, 16  ;;  %v691_v16 = vshrl.u32 %v389_v0, 16  ;;  %v694_v17 = vshll.u32 %v389_v0, 16  ;;  %343 = vst.msk [vmem:[#allocation2 + $0xe4] sm:$0xf] %vm204_vm1, %v198_v22 }
  0x59   : > { %v530_v2 = vsel %vm6261_vm4, %v522_v57, %v529_v8  ;;  %v608_v18 = vor.u32 %v606_v5, %v605_v10  ;;  %v610_v19 = vrot.slane %v605_v10, 4  ;;  %v614_v20 = vrot.slane %v612_v11, 7  ;;  %v368_v21 = vld [vmem:[#allocation2 + $0x64] sm:$0xf]  ;;  %344 = vst.msk [vmem:[#allocation2 + $0xe8] sm:$0xf] %vm204_vm1, %v199_v35 }
  0x5a   : > { %5747 = vmatmul.msk.bf16.vlgmr.msra.gmra.mxu3 %vm800_vm5, %v796_v13  ;;  %v763_v23 = vunpack.c.l.b16 %v530_v2  ;;  %v693_v24 = vrot.slane %v691_v16, 7  ;;  %v700_v25 = vshrl.u32 %v390_v12, 16  ;;  %v703_v26 = vshll.u32 %v390_v12, 16  ;;  %v369_v28 = vld [vmem:[#allocation2 + $0x68] sm:$0xf] }
  0x5b   : > { %v609_v29 = vsel %vm6261_vm4, %v6382_v3, %v608_v18  ;;  %v617_v30 = vor.u32 %v615_v14, %v614_v20  ;;  %v537_v31 = vshrl.u32 %v368_v21, 16  ;;  %v540_v32 = vshll.u32 %v368_v21, 16  ;;  %v380_v40 = vld [vmem:[#allocation2 + $0xa4] sm:$0xf]  ;;  %v352_v49 = vld [vmem:[#allocation2 + $0x10] sm:$0x8] }
  0x5c   : > { %v789_v36 = vpack.c.b16 %v763_v23, %v762_v9  ;;  %v770_v37 = vunpack.c.l.b16 %v609_v29  ;;  %v696_v38 = vor.u32 %v694_v17, %v693_v24  ;;  %v698_v39 = vrot.slane %v693_v24, 4  ;;  %v381_v47 = vld [vmem:[#allocation2 + $0xa8] sm:$0xf]  ;;  %v184_v55 = vld [vmem:[%s6232_s19 + $0x30] sm:$0xf] }
  0x5d   : > { %v618_v41 = vsel %vm6261_vm4, %v610_v19, %v617_v30  ;;  %v702_v42 = vrot.slane %v700_v25, 7  ;;  %v539_v43 = vrot.slane %v537_v31, 7  ;;  %v546_v44 = vshrl.u32 %v369_v28, 16  ;;  %v353_v54 = vld [vmem:[#allocation2 + $0x14] sm:$0xf] }
  0x5e   : > { %5740 = vmatmul.msk.bf16.gmra.mxu1 %vm800_vm5, %v789_v36  ;;  %v771_v3 = vunpack.c.l.b16 %v618_v41  ;;  %v697_v45 = vsel %vm6261_vm4, %v6397_v27, %v696_v38  ;;  %v549_v46 = vshll.u32 %v369_v28, 16  ;;  %v620_v48 = vshrl.u32 %v379_v34, 16  ;;  %v185_v61 = vld [vmem:[%s6232_s19 + $0x34] sm:$0xf]  ;;  %329 = vst.msk [vmem:[#allocation2 + $0x74] sm:$0xf] %vm204_vm1, %v184_v55 }
  0x5f   : > { %v705_v50 = vor.u32 %v703_v26, %v702_v42  ;;  %v778_v51 = vunpack.c.l.b16 %v697_v45  ;;  %v542_v52 = vor.u32 %v540_v32, %v539_v43  ;;  %v544_v53 = vrot.slane %v539_v43, 4  ;;  %330 = vst.msk [vmem:[#allocation2 + $0x78] sm:$0xf] %vm204_vm1, %v185_v61  ;;  %v192_v6 = vld [vmem:[%s6232_s19 + $0x50] sm:$0xf] }
  0x60   : > { %v793_v56 = vpack.c.b16 %v771_v3, %v770_v37  ;;  %v548_v57 = vrot.slane %v546_v44, 7  ;;  %v5729_v58 = vrot.slane %v620_v48, 11  ;;  %v625_v60 = vshrl.u32 %v380_v40, 16  ;;  %v354_v9 = vld [vmem:[#allocation2 + $0x18] sm:$0xf] }
  0x61   : > { %v706_v62 = vsel %vm6261_vm4, %v698_v39, %v705_v50  ;;  %v543_v27 = vsel %vm6261_vm4, %v6401_v33, %v542_v52  ;;  %v628_v63 = vshll.u32 %v380_v40, 16  ;;  %v634_v0 = vshrl.u32 %v381_v47, 16  ;;  %v391_v12 = vld [vmem:[#allocation2 + $0xe0] sm:$0x8]  ;;  %v392_v17 = vld [vmem:[#allocation2 + $0xe4] sm:$0xf] }
  0x62   : > { %v779_v1 = vunpack.c.l.b16 %v706_v62  ;;  %v551_v4 = vor.u32 %v549_v46, %v548_v57  ;;  %v764_v59 = vunpack.c.l.b16 %v543_v27  ;;  %v627_v5 = vrot.slane %v625_v60, 7  ;;  %v193_v2 = vld [vmem:[%s6232_s19 + $0x54] sm:$0xf]  ;;  %v393_v22 = vld [vmem:[#allocation2 + $0xe8] sm:$0xf] }
  0x63   : > { %v636_v7 = vrot.slane %v634_v0, 7  ;;  %v637_v8 = vshll.u32 %v381_v47, 16  ;;  %v422_v10 = vshrl.u32 %v352_v49, 16  ;;  %v427_v11 = vshrl.u32 %v353_v54, 16  ;;  %337 = vst.msk [vmem:[#allocation2 + $0xb4] sm:$0xf] %vm204_vm1, %v192_v6 }
  0x64   : > { %v797_v13 = vpack.c.b16 %v779_v1, %v778_v51  ;;  %v552_v33 = vsel %vm6261_vm4, %v544_v53, %v551_v4  ;;  %v630_v14 = vor.u32 %v628_v63, %v627_v5  ;;  %v632_v16 = vrot.slane %v627_v5, 4  ;;  %v370_v28 = vld [vmem:[#allocation2 + $0x70] sm:$0x8]  ;;  %338 = vst.msk [vmem:[#allocation2 + $0xb8] sm:$0xf] %vm204_vm1, %v193_v2 }
  0x65   : > { %v765_v18 = vunpack.c.l.b16 %v552_v33  ;;  %v639_v19 = vor.u32 %v637_v8, %v636_v7  ;;  %v5720_v20 = vrot.slane %v422_v10, 11  ;;  %v429_v21 = vrot.slane %v427_v11, 7  ;;  %v174_v32 = vld [vmem:[%s6232_s19 + $0x8] sm:$0xf]  ;;  %v175_v34 = vld [vmem:[%s6232_s19 + $0xc] sm:$0xf] }
  0x66   : > { %v631_v23 = vsel %vm6261_vm4, %v5729_v58, %v630_v14  ;;  %v430_v24 = vshll.u32 %v353_v54, 16  ;;  %v436_v25 = vshrl.u32 %v354_v9, 16  ;;  %v439_v26 = vshll.u32 %v354_v9, 16  ;;  %v371_v39 = vld [vmem:[#allocation2 + $0x74] sm:$0xf] }
  0x67   : > { %v790_v29 = vpack.c.b16 %v765_v18, %v764_v59  ;;  %v640_v30 = vsel %vm6261_vm4, %v632_v16, %v639_v19  ;;  %v434_v31 = vrot.slane %v429_v21, 4  ;;  %v772_v35 = vunpack.c.l.b16 %v631_v23  ;;  %319 = vst.msk [vmem:[#allocation2 + $0x24] sm:$0xf] %vm204_vm1, %v174_v32  ;;  %v372_v44 = vld [vmem:[#allocation2 + $0x78] sm:$0xf] }
  0x68   : > { %5744 = vmatmul.msk.bf16.gmra.mxu2 %vm800_vm5, %v793_v56  ;;  %v432_v36 = vor.u32 %v430_v24, %v429_v21  ;;  %v438_v37 = vrot.slane %v436_v25, 7  ;;  %v708_v38 = vshrl.u32 %v391_v12, 16  ;;  %v713_v40 = vshrl.u32 %v392_v17, 16  ;;  %320 = vst.msk [vmem:[#allocation2 + $0x28] sm:$0xf] %vm204_vm1, %v175_v34 }
  0x69   : > { %v716_v41 = vshll.u32 %v392_v17, 16  ;;  %v722_v42 = vshrl.u32 %v393_v22, 16  ;;  %v725_v43 = vshll.u32 %v393_v22, 16  ;;  %v773_v3 = vunpack.c.l.b16 %v640_v30  ;;  %v200_v52 = vld [vmem:[%s6232_s19 + $0x70] sm:$0xf] }
  0x6a   : > { %5748 = vmatmul.msk.bf16.gmra.mxu3 %vm800_vm5, %v797_v13  ;;  %v433_v45 = vsel %vm6261_vm4, %v5720_v20, %v432_v36  ;;  %v441_v46 = vor.u32 %v439_v26, %v438_v37  ;;  %v5733_v47 = vrot.slane %v708_v38, 11  ;;  %v715_v49 = vrot.slane %v713_v40, 7  ;;  %v382_v57 = vld [vmem:[#allocation2 + $0xb0] sm:$0x8]  ;;  %v383_v27 = vld [vmem:[#allocation2 + $0xb4] sm:$0xf] }
  0x6b   : > { %v754_v48 = vunpack.c.l.b16 %v433_v45  ;;  %v724_v50 = vrot.slane %v722_v42, 7  ;;  %v554_v51 = vshrl.u32 %v370_v28, 16  ;;  %v559_v54 = vshrl.u32 %v371_v39, 16  ;;  %v201_v63 = vld [vmem:[%s6232_s19 + $0x74] sm:$0xf] }
  0x6c   : > { %v442_v53 = vsel %vm6261_vm4, %v434_v31, %v441_v46  ;;  %v562_v55 = vshll.u32 %v371_v39, 16  ;;  %v568_v56 = vshrl.u32 %v372_v44, 16  ;;  %v718_v60 = vor.u32 %v716_v41, %v715_v49  ;;  %345 = vst.msk [vmem:[#allocation2 + $0xf4] sm:$0xf] %vm204_vm1, %v200_v52  ;;  %v384_v8 = vld [vmem:[#allocation2 + $0xb8] sm:$0xf] }
  0x6d   : > { %v755_v58 = vunpack.c.l.b16 %v442_v53  ;;  %v720_v61 = vrot.slane %v715_v49, 4  ;;  %v727_v62 = vor.u32 %v725_v43, %v724_v50  ;;  %v5726_v0 = vrot.slane %v554_v51, 11  ;;  %346 = vst.msk [vmem:[#allocation2 + $0xf8] sm:$0xf] %vm204_vm1, %v201_v63  ;;  %v355_v33 = vld [vmem:[#allocation2 + $0x20] sm:$0x8] }
  0x6e   : > { %5741 = vmatmul.msk.bf16.gmra.mxu1 %vm800_vm5, %v790_v29  ;;  %v561_v1 = vrot.slane %v559_v54, 7  ;;  %v570_v4 = vrot.slane %v568_v56, 7  ;;  %v571_v59 = vshll.u32 %v372_v44, 16  ;;  %v719_v6 = vsel %vm6261_vm4, %v5733_v47, %v718_v60  ;;  %v356_v18 = vld [vmem:[#allocation2 + $0x24] sm:$0xf] }
  0x6f   : > { %v785_v5 = vpack.c.b16 %v755_v58, %v754_v48  ;;  %v728_v7 = vsel %vm6261_vm4, %v720_v61, %v727_v62  ;;  %v642_v9 = vshrl.u32 %v382_v57, 16  ;;  %v794_v10 = vpack.c.b16 %v773_v3, %v772_v35  ;;  %v357_v23 = vld [vmem:[#allocation2 + $0x28] sm:$0xf]  ;;  %v394_v24 = vld [vmem:[#allocation2 + $0xf0] sm:$0x8] }
  0x70   : > { %v780_v11 = vunpack.c.l.b16 %v719_v6  ;;  %v564_v12 = vor.u32 %v562_v55, %v561_v1  ;;  %v566_v13 = vrot.slane %v561_v1, 4  ;;  %v781_v14 = vunpack.c.l.b16 %v728_v7  ;;  %v176_v30 = vld [vmem:[%s6232_s19 + $0x10] sm:$0xf]  ;;  %v177_v31 = vld [vmem:[%s6232_s19 + $0x14] sm:$0xf] }
  0x71   : > { %5736 = vmatmul.msk.bf16.gmra.mxu0 %vm800_vm5, %v785_v5  ;;  %v573_v16 = vor.u32 %v571_v59, %v570_v4  ;;  %v647_v17 = vshrl.u32 %v383_v27, 16  ;;  %v650_v2 = vshll.u32 %v383_v27, 16  ;;  %v5730_v20 = vrot.slane %v642_v9, 11  ;;  %321 = vst.msk [vmem:[#allocation2 + $0x34] sm:$0xf] %vm204_vm1, %v176_v30 }
  0x72   : > { %v565_v19 = vsel %vm6261_vm4, %v5726_v0, %v564_v12  ;;  %v656_v21 = vshrl.u32 %v384_v8, 16  ;;  %v659_v22 = vshll.u32 %v384_v8, 16  ;;  %v444_v29 = vshrl.u32 %v355_v33, 16  ;;  %322 = vst.msk [vmem:[#allocation2 + $0x38] sm:$0xf] %vm204_vm1, %v177_v31 }
  0x73   : > { %v574_v25 = vsel %vm6261_vm4, %v566_v13, %v573_v16  ;;  %v766_v26 = vunpack.c.l.b16 %v565_v19  ;;  %v649_v28 = vrot.slane %v647_v17, 7  ;;  %v449_v35 = vshrl.u32 %v356_v18, 16  ;;  %v395_v41 = vld [vmem:[#allocation2 + $0xf4] sm:$0xf]  ;;  %v1325_v62 = vld [vmem:[#allocation2 + $0x4] sm:$0xf] }
  0x74   : > { %v767_v32 = vunpack.c.l.b16 %v574_v25  ;;  %v658_v34 = vrot.slane %v656_v21, 7  ;;  %v452_v36 = vshll.u32 %v356_v18, 16  ;;  %v798_v37 = vpack.c.b16 %v781_v14, %v780_v11  ;;  %v396_v46 = vld [vmem:[#allocation2 + $0xf8] sm:$0xf]  ;;  %v211_v1 = vld [vmem:[#allocation2 + $0xc] sm:$0x1] }
  0x75   : > { %v652_v38 = vor.u32 %v650_v2, %v649_v28  ;;  %v654_v39 = vrot.slane %v649_v28, 4  ;;  %v458_v40 = vshrl.u32 %v357_v23, 16  ;;  %v5721_v43 = vrot.slane %v444_v29, 11  ;;  %v1326_v6 = vld [vmem:[#allocation2 + $0x8] sm:$0xf] }
  0x76   : > { %v661_v42 = vor.u32 %v659_v22, %v658_v34  ;;  %v451_v44 = vrot.slane %v449_v35, 7  ;;  %v461_v3 = vshll.u32 %v357_v23, 16  ;;  %v730_v47 = vshrl.u32 %v394_v24, 16  ;;  %v358_v7 = vld [vmem:[#allocation2 + $0x30] sm:$0x8] }
  0x77   : > { %v460_v45 = vrot.slane %v458_v40, 7  ;;  %v735_v48 = vshrl.u32 %v395_v41, 16  ;;  %v791_v49 = vpack.c.b16 %v767_v32, %v766_v26  ;;  %v653_v50 = vsel %vm6261_vm4, %v5730_v20, %v652_v38  ;;  %v5963_v13 = vld [vmem:[%s8094_s1 + $0xa] sm:$0x3]  ;;  %v5996_v33 = vld [vmem:[%s8094_s1 + $0xc] sm:$0x3] }
  0x78   : > { %5745 = vmatmul.msk.bf16.gmra.mxu2 %vm800_vm5, %v794_v10  ;;  %v454_v51 = vor.u32 %v452_v36, %v451_v44  ;;  %v456_v52 = vrot.slane %v451_v44, 4  ;;  %v662_v53 = vsel %vm6261_vm4, %v654_v39, %v661_v42  ;;  %v5734_v55 = vrot.slane %v730_v47, 11  ;;  %v359_v18 = vld [vmem:[#allocation2 + $0x34] sm:$0xf]  ;;  %v2048_v39 = vld [vmem:[#allocation2 + $0x18] sm:$0xf] }
  0x79   : > { %v463_v54 = vor.u32 %v461_v3, %v460_v45  ;;  %v737_v56 = vrot.slane %v735_v48, 7  ;;  %v738_v58 = vshll.u32 %v395_v41, 16  ;;  %v744_v60 = vshrl.u32 %v396_v46, 16  ;;  %v360_v19 = vld [vmem:[#allocation2 + $0x38] sm:$0xf] }
  0x7a   : > { %5749 = vmatmul.msk.bf16.gmra.mxu3 %vm800_vm5, %v798_v37  ;;  %v455_v57 = vsel %vm6261_vm4, %v5721_v43, %v454_v51  ;;  %v747_v61 = vshll.u32 %v396_v46, 16  ;;  %v774_v8 = vunpack.c.l.b16 %v653_v50  ;;  %v775_v9 = vunpack.c.l.b16 %v662_v53  ;;  %v2047_v34 = vld [vmem:[#allocation2 + $0x14] sm:$0xf]  ;;  %v2046_v42 = vld [vmem:[#allocation2 + $0x10] sm:$0x8] }
  0x7b   : > { %v464_v27 = vsel %vm6261_vm4, %v456_v52, %v463_v54  ;;  %v756_v63 = vunpack.c.l.b16 %v455_v57  ;;  %v742_v0 = vrot.slane %v737_v56, 4  ;;  %v740_v59 = vor.u32 %v738_v58, %v737_v56 }
  0x7c   : > { %v757_v4 = vunpack.c.l.b16 %v464_v27  ;;  %v746_v5 = vrot.slane %v744_v60, 7  ;;  %v1377_v11 = vshrl.u32 %v1325_v62, 16  ;;  %v1380_v12 = vshll.u32 %v1325_v62, 16  ;;  %v217_v60 = vld [vmem:[#allocation2 + $0x1c] sm:$0x1] }
  0x7d   : > { %v741_v16 = vsel %vm6261_vm4, %v5734_v55, %v740_v59  ;;  %v212_v2 = vsel %vm6501_vm7, 0, %v211_v1  ;;  %v1386_v23 = vshll.u32 %v1326_v6, 16  ;;  %v1390_v25 = vshrl.u32 %v1326_v6, 16  ;;  %v6115_v6 = vld [vmem:[#allocation2 + $0x4] sm:$0xff] }
  0x7e   : > { %5742 = vmatmul.msk.bf16.gmra.mxu1 %vm800_vm5, %v791_v49  ;;  %v786_v14 = vpack.c.b16 %v757_v4, %v756_v63  ;;  %v749_v17 = vor.u32 %v747_v61, %v746_v5  ;;  %v782_v20 = vunpack.c.l.b16 %v741_v16  ;;  %213 = vst [vmem:[#allocation2 + $0xc] sm:$0x1] %v212_v2  ;;  %v1379_v21 = vrot.slane %v1377_v11, 4  ;;  %v6013_v49 = vld [vmem:[%s8094_s1 + $0xe] sm:$0x3] }
  0x7f   : > { %v1382_v22 = vrot.slane %v1380_v12, 5  ;;  %v3613_v26 = vsel %vm849_vm0, %v5963_v13, 0  ;;  %v4300_v28 = vsel %vm849_vm0, %v5996_v33, 0  ;;  %v6521_v31 = vrot.slane %v1386_v23, 5  ;;  %v1328_v5 = vld [vmem:[#allocation2 + $0x14] sm:$0xf] }
  0x80   : > { %v750_v24 = vsel %vm6261_vm4, %v742_v0, %v749_v17  ;;  %3622 = vmatpush.bf16.msra.mxu1 %v3613_v26  ;;  %v466_v32 = vshrl.u32 %v358_v7, 16  ;;  %v1392_v35 = vrot.slane %v1390_v25, 4  ;;  %4309 = vmatpush.bf16.msra.mxu2 %v4300_v28  ;;  %v471_v36 = vshrl.u32 %v359_v18, 16  ;;  %v1329_v11 = vld [vmem:[#allocation2 + $0x18] sm:$0xf] }
  0x81   : > { %5737 = vmatmul.msk.bf16.gmra.mxu0 %vm800_vm5, %v786_v14  ;;  %v783_v29 = vunpack.c.l.b16 %v750_v24  ;;  %v1383_v30 = vor.u32 %v1382_v22, %v1379_v21  ;;  %v474_v37 = vshll.u32 %v359_v18, 16  ;;  %v480_v38 = vshrl.u32 %v360_v19, 16  ;;  %v6094_v22 = vld [vmem:[%s8094_s1 + $0x10] sm:$0x3]  ;;  %v223_v23 = vld [vmem:[#allocation2 + $0x2c] sm:$0x1] }
  0x82   : > { %v795_v40 = vpack.c.b16 %v775_v9, %v774_v8  ;;  %v483_v41 = vshll.u32 %v360_v19, 16  ;;  %v5722_v43 = vrot.slane %v466_v32, 11  ;;  %v473_v44 = vrot.slane %v471_v36, 7  ;;  %v2051_v32 = vld [vmem:[#allocation2 + $0x28] sm:$0xf] }
  0x83   : > { %v482_v3 = vrot.slane %v480_v38, 7  ;;  %v799_v45 = vpack.c.b16 %v783_v29, %v782_v20  ;;  %v1393_v46 = vor.u32 %v1392_v35, %v6521_v31  ;;  %v2100_v47 = vshrl.u32 %v2047_v34, 16 }
  0x84   : > { %v2109_v48 = vshrl.u32 %v2048_v39, 16  ;;  %v1384_v51 = vrot.slane %v1383_v30, 4  ;;  %v476_v52 = vor.u32 %v474_v37, %v473_v44  ;;  %v478_v53 = vrot.slane %v473_v44, 4 }
  0x85   : > { %v1327_v50 = vld [vmem:[#allocation2 + $0xc] sm:$0x1]  ;;  %v2095_v54 = vshrl.u32 %v2046_v42, 16  ;;  %v485_v56 = vor.u32 %v483_v41, %v482_v3  ;;  %v2102_v57 = vrot.slane %v2100_v47, 7  ;;  %v2103_v58 = vshll.u32 %v2047_v34, 16 }
  0x86   : > { %v1396_v55 = vshll.u32 %v1327_v50, 16  ;;  %v477_v61 = vsel %vm6261_vm4, %v5722_v43, %v476_v52  ;;  %v2111_v62 = vrot.slane %v2109_v48, 7  ;;  %v2112_v27 = vshll.u32 %v2048_v39, 16  ;;  %v2049_v41 = vld [vmem:[#allocation2 + $0x20] sm:$0x8] }
  0x87   : > { %v4650_v63 = vsel %vm849_vm0, %v6013_v49, 0  ;;  %v1394_v0 = vrot.slane %v1393_v46, 4  ;;  %v486_v4 = vsel %vm6261_vm4, %v478_v53, %v485_v56  ;;  %v758_v59 = vunpack.c.l.b16 %v477_v61  ;;  %v1331_v53 = vld [vmem:[#allocation2 + $0x24] sm:$0xf] }
  0x88   : > { %5746 = vmatmul.msk.bf16.gmra.mxu2 %vm800_vm5, %v795_v40  ;;  %v1398_v1 = vrot.slane %v1396_v55, 5  ;;  %4659 = vmatpush.bf16.msra.mxu3 %v4650_v63  ;;  %v759_v8 = vunpack.c.l.b16 %v486_v4  ;;  %v218_v9 = vsel %vm6501_vm7, 0, %v217_v60  ;;  %v5849_v12 = vrot.slane %v2095_v54, 11 }
  0x89   : > { %v2105_v13 = vor.u32 %v2103_v58, %v2102_v57  ;;  %v2107_v33 = vrot.slane %v2102_v57, 4  ;;  %v2114_v14 = vor.u32 %v2112_v27, %v2111_v62  ;;  %219 = vst [vmem:[#allocation2 + $0x1c] sm:$0x1] %v218_v9  ;;  %v1401_v16 = vshrl.u32 %v1328_v5, 16  ;;  %v1332_v57 = vld [vmem:[#allocation2 + $0x28] sm:$0xf] }
  0x8a   : > { %5750 = vmatmul.msk.bf16.gmra.mxu3 %vm800_vm5, %v799_v45  ;;  %v1404_v17 = vshll.u32 %v1328_v5, 16  ;;  %v1389_v2 = vsel %vm6536_vm10, %v1384_v51, %v6521_v31  ;;  %v1399_v18 = vsel %vm6536_vm10, %v1394_v0, %v1398_v1  ;;  %v787_v19 = vpack.c.b16 %v759_v8, %v758_v59  ;;  %v2050_v31 = vld [vmem:[#allocation2 + $0x24] sm:$0xf]  ;;  %v6116_v58 = vld [vmem:[#allocation2 + $0x14] sm:$0xff]  ;;  %v229_v62 = vld [vmem:[#allocation2 + $0x3c] sm:$0x1] }
  0x8b   : > { %v1410_v20 = vshll.u32 %v1329_v11, 16  ;;  %v1414_v21 = vshrl.u32 %v1329_v11, 16  ;;  %v2106_v24 = vsel %vm6261_vm4, %v5849_v12, %v2105_v13  ;;  %v2115_v25 = vsel %vm6261_vm4, %v2107_v33, %v2114_v14  ;;  %v6131_v8 = vld [vmem:[#allocation2 + $0x14] sm:$0xff] }
  0x8c   : > { %v1762_v26 = vunpack.c.l.b16 %v1389_v2  ;;  %v1763_v28 = vunpack.c.l.b16 %v1399_v18  ;;  %v1403_v29 = vrot.slane %v1401_v16, 4  ;;  %v1406_v30 = vrot.slane %v1404_v17, 5  ;;  %v2053_v14 = vld [vmem:[#allocation2 + $0x34] sm:$0xf] }
  0x8d   : > { %v1412_v34 = vrot.slane %v1410_v20, 5  ;;  %v1416_v35 = vrot.slane %v1414_v21, 4  ;;  %v5368_v36 = vsel %vm849_vm0, %v6094_v22, 0  ;;  %v224_v37 = vsel %vm6501_vm7, 0, %v223_v23 }
  0x8e   : > { %5816 = vmatmul.msk.bf16.vlgmr.msrb.gmra.mxu1 %vm800_vm5, %v6115_v6  ;;  %v2448_v38 = vunpack.c.l.b16 %v2106_v24  ;;  %v2449_v39 = vunpack.c.l.b16 %v2115_v25  ;;  %5377 = vmatpush.bf16.msra.mxu0 %v5368_v36  ;;  %225 = vst [vmem:[#allocation2 + $0x2c] sm:$0x1] %v224_v37  ;;  %v2122_v42 = vshrl.u32 %v2050_v31, 16  ;;  %v2131_v43 = vshrl.u32 %v2051_v32, 16  ;;  %v2052_v25 = vld [vmem:[#allocation2 + $0x30] sm:$0x8] }
  0x8f   : > { %v1794_v44 = vpack.c.b16 %v1763_v28, %v1762_v26  ;;  %v1407_v3 = vor.u32 %v1406_v30, %v1403_v29  ;;  %v1417_v45 = vor.u32 %v1416_v35, %v1412_v34  ;;  %v2117_v48 = vshrl.u32 %v2049_v41, 16  ;;  %v235_v36 = vld [vmem:[#allocation2 + $0x4c] sm:$0x1] }
  0x90   : > { %v1330_v40 = vld [vmem:[#allocation2 + $0x1c] sm:$0x1]  ;;  %v2480_v47 = vpack.c.b16 %v2449_v39, %v2448_v38  ;;  %v2124_v49 = vrot.slane %v2122_v42, 7  ;;  %v2125_v50 = vshll.u32 %v2050_v31, 16  ;;  %v2133_v51 = vrot.slane %v2131_v43, 7 }
  0x91   : > { %5738 = vmatmul.msk.bf16.gmra.mxu0 %vm800_vm5, %v787_v19  ;;  %v1420_v46 = vshll.u32 %v1330_v40, 16  ;;  %v2134_v52 = vshll.u32 %v2051_v32, 16  ;;  %v1408_v54 = vrot.slane %v1407_v3, 4  ;;  %v1418_v55 = vrot.slane %v1417_v45, 4  ;;  %v2054_v19 = vld [vmem:[#allocation2 + $0x38] sm:$0xf] }
  0x92   : > { %v1425_v60 = vshrl.u32 %v1331_v53, 16  ;;  %v1428_v61 = vshll.u32 %v1331_v53, 16  ;;  %v5850_v27 = vrot.slane %v2117_v48, 11  ;;  %v2127_v63 = vor.u32 %v2125_v50, %v2124_v49  ;;  %v1334_v43 = vld [vmem:[#allocation2 + $0x34] sm:$0xf]  ;;  %v6117_v3 = vld [vmem:[#allocation2 + $0x24] sm:$0xff] }
  0x93   : > { %v1422_v56 = vrot.slane %v1420_v46, 5  ;;  %v2129_v0 = vrot.slane %v2124_v49, 4  ;;  %v2136_v1 = vor.u32 %v2134_v52, %v2133_v51  ;;  %v1434_v4 = vshll.u32 %v1332_v57, 16 }
  0x94   : > { %v1438_v59 = vshrl.u32 %v1332_v57, 16  ;;  %v1413_v5 = vsel %vm6536_vm10, %v1408_v54, %v1412_v34  ;;  %v230_v9 = vsel %vm6501_vm7, 0, %v229_v62  ;;  %v1427_v11 = vrot.slane %v1425_v60, 4  ;;  %v2056_v57 = vld [vmem:[#allocation2 + $0x44] sm:$0xf] }
  0x95   : > { %v1423_v6 = vsel %vm6536_vm10, %v1418_v55, %v1422_v56  ;;  %v1430_v12 = vrot.slane %v1428_v61, 5  ;;  %231 = vst [vmem:[#allocation2 + $0x3c] sm:$0x1] %v230_v9  ;;  %v2128_v13 = vsel %vm6261_vm4, %v5850_v27, %v2127_v63  ;;  %v2137_v33 = vsel %vm6261_vm4, %v2129_v0, %v2136_v1  ;;  %v1333_v20 = vld [vmem:[#allocation2 + $0x2c] sm:$0x1]  ;;  %v6132_v56 = vld [vmem:[#allocation2 + $0x24] sm:$0xff] }
  0x96   : > { %v1764_v16 = vunpack.c.l.b16 %v1413_v5  ;;  %v1765_v17 = vunpack.c.l.b16 %v1423_v6  ;;  %v1436_v2 = vrot.slane %v1434_v4, 5  ;;  %v1440_v18 = vrot.slane %v1438_v59, 4 }
  0x97   : > { %v2450_v21 = vunpack.c.l.b16 %v2128_v13  ;;  %v2451_v22 = vunpack.c.l.b16 %v2137_v33  ;;  %v1431_v23 = vor.u32 %v1430_v12, %v1427_v11  ;;  %v2144_v24 = vshrl.u32 %v2053_v14, 16  ;;  %v2055_v11 = vld [vmem:[#allocation2 + $0x40] sm:$0x8] }
  0x98   : > { %5833 = vmatmul.msk.bf16.vlgmr.msrb.gmra.mxu2 %vm800_vm5, %v1794_v44  ;;  %v2153_v26 = vshrl.u32 %v2054_v19, 16  ;;  %v1795_v28 = vpack.c.b16 %v1765_v17, %v1764_v16  ;;  %v1441_v29 = vor.u32 %v1440_v18, %v1436_v2  ;;  %v1444_v30 = vshll.u32 %v1333_v20, 16  ;;  %v1335_v44 = vld [vmem:[#allocation2 + $0x38] sm:$0xf] }
  0x99   : > { %v2481_v31 = vpack.c.b16 %v2451_v22, %v2450_v21  ;;  %v1432_v32 = vrot.slane %v1431_v23, 4  ;;  %v2139_v34 = vshrl.u32 %v2052_v25, 16  ;;  %v2146_v35 = vrot.slane %v2144_v24, 7  ;;  %v1337_v22 = vld [vmem:[#allocation2 + $0x44] sm:$0xf] }
  0x9a   : > { %5866 = vmatmul.msk.bf16.vlgmr.msrb.gmra.mxu3 %vm800_vm5, %v2480_v47  ;;  %v2147_v37 = vshll.u32 %v2053_v14, 16  ;;  %v2155_v38 = vrot.slane %v2153_v26, 7  ;;  %v2156_v39 = vshll.u32 %v2054_v19, 16  ;;  %v236_v40 = vsel %vm6501_vm7, 0, %v235_v36  ;;  %v241_v19 = vld [vmem:[#allocation2 + $0x5c] sm:$0x1] }
  0x9b   : > { %v1442_v41 = vrot.slane %v1441_v29, 4  ;;  %v1446_v42 = vrot.slane %v1444_v30, 5  ;;  %237 = vst [vmem:[#allocation2 + $0x4c] sm:$0x1] %v236_v40  ;;  %v1437_v45 = vsel %vm6536_vm10, %v1432_v32, %v1436_v2  ;;  %v5851_v46 = vrot.slane %v2139_v34, 11  ;;  %v6118_v34 = vld [vmem:[#allocation2 + $0x34] sm:$0xff] }
  0x9c   : > { %v2149_v48 = vor.u32 %v2147_v37, %v2146_v35  ;;  %v2151_v49 = vrot.slane %v2146_v35, 4  ;;  %v2158_v50 = vor.u32 %v2156_v39, %v2155_v38  ;;  %v1449_v51 = vshrl.u32 %v1334_v43, 16  ;;  %v1336_v59 = vld [vmem:[#allocation2 + $0x3c] sm:$0x1]  ;;  %v1338_v23 = vld [vmem:[#allocation2 + $0x48] sm:$0xf] }
  0x9d   : > { %v1447_v52 = vsel %vm6536_vm10, %v1442_v41, %v1446_v42  ;;  %v1452_v53 = vshll.u32 %v1334_v43, 16  ;;  %v1458_v54 = vshll.u32 %v1335_v44, 16  ;;  %v1462_v55 = vshrl.u32 %v1335_v44, 16  ;;  %v6133_v42 = vld [vmem:[#allocation2 + $0x34] sm:$0xff] }
  0x9e   : > { %5817 = vmatmul.msk.bf16.gmra.mxu1 %vm800_vm5, %v6116_v58  ;;  %v2057_v58 = vld [vmem:[#allocation2 + $0x48] sm:$0xf]  ;;  %v1766_v60 = vunpack.c.l.b16 %v1437_v45  ;;  %v1767_v61 = vunpack.c.l.b16 %v1447_v52  ;;  %v2150_v62 = vsel %vm6261_vm4, %v5851_v46, %v2149_v48  ;;  %v2159_v27 = vsel %vm6261_vm4, %v2151_v49, %v2158_v50  ;;  %v2059_v49 = vld [vmem:[#allocation2 + $0x54] sm:$0xf]  ;;  %v2060_v52 = vld [vmem:[#allocation2 + $0x58] sm:$0xf] }
  0x9f   : > { %v1451_v63 = vrot.slane %v1449_v51, 4  ;;  %v1454_v0 = vrot.slane %v1452_v53, 5  ;;  %v1460_v1 = vrot.slane %v1458_v54, 5  ;;  %v1464_v4 = vrot.slane %v1462_v55, 4 }
  0xa0   : > { %v2166_v5 = vshrl.u32 %v2056_v57, 16  ;;  %v2175_v6 = vshrl.u32 %v2057_v58, 16  ;;  %v2453_v9 = vunpack.c.l.b16 %v2159_v27  ;;  %v1796_v12 = vpack.c.b16 %v1767_v61, %v1766_v60  ;;  %v2058_v60 = vld [vmem:[#allocation2 + $0x50] sm:$0x8] }
  0xa1   : > { %5947 = vmatmul.msk.bf16.vlgmr.msrb.gmra.mxu0 %vm800_vm5, %v6131_v8  ;;  %v2452_v8 = vunpack.c.l.b16 %v2150_v62  ;;  %v1455_v13 = vor.u32 %v1454_v0, %v1451_v63  ;;  %v1465_v33 = vor.u32 %v1464_v4, %v1460_v1  ;;  %v1468_v14 = vshll.u32 %v1336_v59, 16 }
  0xa2   : > { %v2161_v16 = vshrl.u32 %v2055_v11, 16  ;;  %v2168_v17 = vrot.slane %v2166_v5, 7  ;;  %v2169_v2 = vshll.u32 %v2056_v57, 16  ;;  %v2177_v18 = vrot.slane %v2175_v6, 7  ;;  %v1339_v48 = vld [vmem:[#allocation2 + $0x4c] sm:$0x1] }
  0xa3   : > { %v882_v47 = vpop.f32.mrf.mxu1  ;;  %v2482_v20 = vpack.c.b16 %v2453_v9, %v2452_v8  ;;  %v2178_v21 = vshll.u32 %v2057_v58, 16  ;;  %v242_v24 = vsel %vm6501_vm7, 0, %v241_v19  ;;  %v1456_v25 = vrot.slane %v1455_v13, 4  ;;  %v1341_v13 = vld [vmem:[#allocation2 + $0x58] sm:$0xf] }
  0xa4   : > { %951 = vst.msk [vmem:[#allocation3 + $0x40] sm:$0xff] %vm942_vm11, %v882_v47  ;;  %v1466_v26 = vrot.slane %v1465_v33, 4  ;;  %v1473_v29 = vshrl.u32 %v1337_v22, 16  ;;  %v1476_v30 = vshll.u32 %v1337_v22, 16  ;;  %v1486_v32 = vshrl.u32 %v1338_v23, 16  ;;  %v6119_v33 = vld [vmem:[#allocation2 + $0x44] sm:$0xff] }
  0xa5   : > { %243 = vst [vmem:[#allocation2 + $0x5c] sm:$0x1] %v242_v24  ;;  %v5852_v35 = vrot.slane %v2161_v16, 11  ;;  %v2171_v36 = vor.u32 %v2169_v2, %v2168_v17  ;;  %v2173_v37 = vrot.slane %v2168_v17, 4  ;;  %v2180_v38 = vor.u32 %v2178_v21, %v2177_v18  ;;  %v862_v24 = vpop.f32.mrf.mxu0 }
  0xa6   : > { %v1461_v39 = vsel %vm6536_vm10, %v1456_v25, %v1460_v1  ;;  %v1475_v43 = vrot.slane %v1473_v29, 4  ;;  %v1478_v44 = vrot.slane %v1476_v30, 5  ;;  %v1488_v45 = vrot.slane %v1486_v32, 4  ;;  %v247_v1 = vld [vmem:[#allocation2 + $0x6c] sm:$0x1]  ;;  %v6134_v25 = vld [vmem:[#allocation2 + $0x44] sm:$0xff] }
  0xa7   : > { %v2172_v46 = vsel %vm6261_vm4, %v5852_v35, %v2171_v36  ;;  %v2181_v47 = vsel %vm6261_vm4, %v2173_v37, %v2180_v38  ;;  %v1768_v50 = vunpack.c.l.b16 %v1461_v39  ;;  %v1492_v57 = vshll.u32 %v1339_v48, 16  ;;  %943 = vst.msk [vmem:[#allocation3] sm:$0xff] %vm942_vm11, %v862_v24  ;;  %v2063_v30 = vld [vmem:[#allocation2 + $0x68] sm:$0xf] }
  0xa8   : > { %5834 = vmatmul.msk.bf16.gmra.mxu2 %vm800_vm5, %v1795_v28  ;;  %v1470_v28 = vrot.slane %v1468_v14, 5  ;;  %v2454_v53 = vunpack.c.l.b16 %v2172_v46  ;;  %v2455_v54 = vunpack.c.l.b16 %v2181_v47  ;;  %v1479_v55 = vor.u32 %v1478_v44, %v1475_v43 }
  0xa9   : > { %v2188_v58 = vshrl.u32 %v2059_v49, 16  ;;  %v2197_v61 = vshrl.u32 %v2060_v52, 16  ;;  %v1494_v4 = vrot.slane %v1492_v57, 5  ;;  %v2183_v59 = vshrl.u32 %v2058_v60, 16 }
  0xaa   : > { %5867 = vmatmul.msk.bf16.gmra.mxu3 %vm800_vm5, %v2481_v31  ;;  %v1482_v31 = vshll.u32 %v1338_v23, 16  ;;  %v1471_v40 = vsel %vm6536_vm10, %v1466_v26, %v1470_v28  ;;  %v2483_v27 = vpack.c.b16 %v2455_v54, %v2454_v53  ;;  %v1480_v63 = vrot.slane %v1479_v55, 4  ;;  %v2062_v26 = vld [vmem:[#allocation2 + $0x64] sm:$0xf] }
  0xab   : > { %v884_v41 = vpop.f32.mrf.mxu1  ;;  %v1769_v51 = vunpack.c.l.b16 %v1471_v40  ;;  %v2190_v5 = vrot.slane %v2188_v58, 7  ;;  %v248_v6 = vsel %vm6501_vm7, 0, %v247_v1  ;;  %v2191_v8 = vshll.u32 %v2059_v49, 16  ;;  %v2061_v40 = vld [vmem:[#allocation2 + $0x60] sm:$0x8] }
  0xac   : > { %952 = vst.msk [vmem:[#allocation3 + $0x48] sm:$0xff] %vm942_vm11, %v884_v41  ;;  %v2199_v9 = vrot.slane %v2197_v61, 7  ;;  %v2200_v11 = vshll.u32 %v2060_v52, 16  ;;  %v5853_v17 = vrot.slane %v2183_v59, 11  ;;  %v1506_v22 = vshll.u32 %v1341_v13, 16  ;;  %v6120_v59 = vld [vmem:[#allocation2 + $0x54] sm:$0xff] }
  0xad   : > { %v1797_v62 = vpack.c.b16 %v1769_v51, %v1768_v50  ;;  %249 = vst [vmem:[#allocation2 + $0x6c] sm:$0x1] %v248_v6  ;;  %v2195_v2 = vrot.slane %v2190_v5, 4  ;;  %v2193_v18 = vor.u32 %v2191_v8, %v2190_v5  ;;  %v1510_v23 = vshrl.u32 %v1341_v13, 16  ;;  %v1342_v36 = vld [vmem:[#allocation2 + $0x5c] sm:$0x1]  ;;  %v864_v50 = vpop.f32.mrf.mxu0 }
  0xae   : > { %5818 = vmatmul.msk.bf16.gmra.mxu1 %vm800_vm5, %v6117_v3  ;;  %v1484_v3 = vrot.slane %v1482_v31, 5  ;;  %v2202_v19 = vor.u32 %v2200_v11, %v2199_v9  ;;  %v1508_v37 = vrot.slane %v1506_v22, 5  ;;  %v2210_v39 = vshrl.u32 %v2062_v26, 16  ;;  %944 = vst.msk [vmem:[#allocation3 + $0x8] sm:$0xff] %vm942_vm11, %v864_v50  ;;  %v253_v52 = vld [vmem:[#allocation2 + $0x7c] sm:$0x1] }
  0xaf   : > { %v2194_v31 = vsel %vm6261_vm4, %v5853_v17, %v2193_v18  ;;  %v1512_v38 = vrot.slane %v1510_v23, 4  ;;  %v2219_v41 = vshrl.u32 %v2063_v30, 16  ;;  %v2205_v47 = vshrl.u32 %v2061_v40, 16  ;;  %v1343_v55 = vld [vmem:[#allocation2 + $0x64] sm:$0xf] }
  0xb0   : > { %v1485_v14 = vsel %vm6536_vm10, %v1480_v63, %v1484_v3  ;;  %v2203_v32 = vsel %vm6261_vm4, %v2195_v2, %v2202_v19  ;;  %v2212_v48 = vrot.slane %v2210_v39, 7  ;;  %v2213_v49 = vshll.u32 %v2062_v26, 16  ;;  %v1347_v50 = vld [vmem:[#allocation2 + $0x78] sm:$0xf] }
  0xb1   : > { %5948 = vmatmul.msk.bf16.gmra.mxu0 %vm800_vm5, %v6132_v56  ;;  %v1489_v56 = vor.u32 %v1488_v45, %v1484_v3  ;;  %v1770_v28 = vunpack.c.l.b16 %v1485_v14  ;;  %v2457_v43 = vunpack.c.l.b16 %v2203_v32  ;;  %v1516_v45 = vshll.u32 %v1342_v36, 16  ;;  %v6135_v14 = vld [vmem:[#allocation2 + $0x54] sm:$0xff] }
  0xb2   : > { %v1513_v46 = vor.u32 %v1512_v38, %v1508_v37  ;;  %v2221_v51 = vrot.slane %v2219_v41, 7  ;;  %v2222_v54 = vshll.u32 %v2063_v30, 16  ;;  %v254_v57 = vsel %vm6501_vm7, 0, %v253_v52 }
  0xb3   : > { %v1490_v0 = vrot.slane %v1489_v56, 4  ;;  %v1344_v56 = vld [vmem:[#allocation2 + $0x68] sm:$0xf]  ;;  %255 = vst [vmem:[#allocation2 + $0x7c] sm:$0x1] %v254_v57  ;;  %v1518_v61 = vrot.slane %v1516_v45, 5 }
  0xb4   : > { %v1514_v60 = vrot.slane %v1513_v46, 4  ;;  %v1521_v63 = vshrl.u32 %v1343_v55, 16  ;;  %v1530_v1 = vshll.u32 %v1344_v56, 16  ;;  %v2217_v5 = vrot.slane %v2212_v48, 4 }
  0xb5   : > { %v1495_v16 = vsel %vm6536_vm10, %v1490_v0, %v1494_v4  ;;  %v1524_v0 = vshll.u32 %v1343_v55, 16  ;;  %v1534_v4 = vshrl.u32 %v1344_v56, 16  ;;  %v2224_v6 = vor.u32 %v2222_v54, %v2221_v51  ;;  %v6121_v51 = vld [vmem:[#allocation2 + $0x64] sm:$0xff] }
  0xb6   : > { %v1771_v29 = vunpack.c.l.b16 %v1495_v16  ;;  %v1523_v16 = vrot.slane %v1521_v63, 4  ;;  %v1532_v2 = vrot.slane %v1530_v1, 5  ;;  %v1558_v63 = vshrl.u32 %v1347_v50, 16  ;;  %v6136_v1 = vld [vmem:[#allocation2 + $0x64] sm:$0xff] }
  0xb7   : > { %v1526_v17 = vrot.slane %v1524_v0, 5  ;;  %v1536_v18 = vrot.slane %v1534_v4, 4  ;;  %v2225_v19 = vsel %vm6261_vm4, %v2217_v5, %v2224_v6  ;;  %v2068_v4 = vld [vmem:[#allocation2 + $0x84] sm:$0xf] }
  0xb8   : > { %5835 = vmatmul.msk.bf16.gmra.mxu2 %vm800_vm5, %v1796_v12  ;;  %v1340_v12 = vld [vmem:[#allocation2 + $0x54] sm:$0xf]  ;;  %v1798_v44 = vpack.c.b16 %v1771_v29, %v1770_v28  ;;  %v2459_v26 = vunpack.c.l.b16 %v2225_v19 }
  0xb9   : > { %v1500_v21 = vshll.u32 %v1340_v12, 16  ;;  %v1527_v28 = vor.u32 %v1526_v17, %v1523_v16  ;;  %v1537_v29 = vor.u32 %v1536_v18, %v1532_v2  ;;  %v1560_v16 = vrot.slane %v1558_v63, 4 }
  0xba   : > { %5868 = vmatmul.msk.bf16.gmra.mxu3 %vm800_vm5, %v2482_v20  ;;  %v1497_v20 = vshrl.u32 %v1340_v12, 16  ;;  %v1519_v12 = vsel %vm6536_vm10, %v1514_v60, %v1518_v61  ;;  %v2254_v17 = vshrl.u32 %v2068_v4, 16 }
  0xbb   : > { %v1502_v35 = vrot.slane %v1500_v21, 5  ;;  %v2065_v21 = vld [vmem:[#allocation2 + $0x74] sm:$0xf]  ;;  %v1773_v23 = vunpack.c.l.b16 %v1519_v12  ;;  %v1528_v40 = vrot.slane %v1527_v28, 4  ;;  %v1538_v41 = vrot.slane %v1537_v29, 4 }
  0xbc   : > { %v2235_v45 = vshll.u32 %v2065_v21, 16  ;;  %v2256_v29 = vrot.slane %v2254_v17, 7  ;;  %v2070_v17 = vld [vmem:[#allocation2 + $0x90] sm:$0x8] }
  0xbd   : > { %v1533_v52 = vsel %vm6536_vm10, %v1528_v40, %v1532_v2  ;;  %v2067_v2 = vld [vmem:[#allocation2 + $0x80] sm:$0x8] }
  0xbe   : > { %5819 = vmatmul.msk.bf16.gmra.mxu1 %vm800_vm5, %v6118_v34  ;;  %v1499_v34 = vrot.slane %v1497_v20, 4  ;;  %v1345_v20 = vld [vmem:[#allocation2 + $0x6c] sm:$0x1]  ;;  %v2249_v28 = vshrl.u32 %v2067_v2, 16 }
  0xbf   : > { %v1540_v30 = vshll.u32 %v1345_v20, 16 }
  0xc0   : > { %v1503_v3 = vor.u32 %v1502_v35, %v1499_v34  ;;  %v2064_v35 = vld [vmem:[#allocation2 + $0x70] sm:$0x8] }
  0xc1   : > { %5949 = vmatmul.msk.bf16.gmra.mxu0 %vm800_vm5, %v6133_v42  ;;  %v2456_v42 = vunpack.c.l.b16 %v2194_v31  ;;  %v2232_v31 = vshrl.u32 %v2065_v21, 16 }
  0xc2   : > { %v1504_v58 = vrot.slane %v1503_v3, 4 }
  0xc3   : > { %v2484_v53 = vpack.c.b16 %v2457_v43, %v2456_v42  ;;  %v1542_v42 = vrot.slane %v1540_v30, 5  ;;  %v259_v43 = vld [vmem:[#allocation2 + $0x8c] sm:$0x1]  ;;  %v2234_v3 = vrot.slane %v2232_v31, 7  ;;  %v2257_v30 = vshll.u32 %v2068_v4, 16 }
  0xc4   : > { %v1509_v11 = vsel %vm6536_vm10, %v1504_v58, %v1508_v37  ;;  %v260_v46 = vsel %vm6501_vm7, 0, %v259_v43  ;;  %v2071_v4 = vld [vmem:[#allocation2 + $0x94] sm:$0xf] }
  0xc5   : > { %v1772_v22 = vunpack.c.l.b16 %v1509_v11  ;;  %261 = vst [vmem:[#allocation2 + $0x8c] sm:$0x1] %v260_v46  ;;  %v2237_v55 = vor.u32 %v2235_v45, %v2234_v3  ;;  %v2239_v58 = vrot.slane %v2234_v3, 4  ;;  %v2259_v3 = vor.u32 %v2257_v30, %v2256_v29 }
  0xc7   : > { %v1799_v37 = vpack.c.b16 %v1773_v23, %v1772_v22 }
  0xc8   : > { %5836 = vmatmul.msk.bf16.gmra.mxu2 %vm800_vm5, %v1797_v62  ;;  %v5854_v62 = vrot.slane %v2205_v47, 11 }
  0xca   : > { %5869 = vmatmul.msk.bf16.gmra.mxu3 %vm800_vm5, %v2483_v27  ;;  %v2215_v27 = vor.u32 %v2213_v49, %v2212_v48  ;;  %v1346_v49 = vld [vmem:[#allocation2 + $0x74] sm:$0xf] }
  0xcb   : > { %v1545_v61 = vshrl.u32 %v1346_v49, 16 }
  0xcc   : > { %v2216_v13 = vsel %vm6261_vm4, %v5854_v62, %v2215_v27  ;;  %v1548_v62 = vshll.u32 %v1346_v49, 16  ;;  %v1554_v27 = vshll.u32 %v1347_v50, 16  ;;  %v6122_v49 = vld [vmem:[#allocation2 + $0x74] sm:$0xff]  ;;  %v2261_v50 = vrot.slane %v2256_v29, 4 }
  0xcd   : > { %v2458_v24 = vunpack.c.l.b16 %v2216_v13  ;;  %v1547_v12 = vrot.slane %v1545_v61, 4  ;;  %v2279_v29 = vshll.u32 %v2071_v4, 16 }
  0xce   : > { %5820 = vmatmul.msk.bf16.gmra.mxu1 %vm800_vm5, %v6119_v33  ;;  %v1550_v13 = vrot.slane %v1548_v62, 5 }
  0xcf   : > { %v2485_v39 = vpack.c.b16 %v2459_v26, %v2458_v24 }
  0xd0   : > { %v1551_v24 = vor.u32 %v1550_v13, %v1547_v12 }
  0xd1   : > { %5950 = vmatmul.msk.bf16.gmra.mxu0 %vm800_vm5, %v6134_v25  ;;  %v2066_v25 = vld [vmem:[#allocation2 + $0x78] sm:$0xf] }
  0xd2   : > { %v2241_v36 = vshrl.u32 %v2066_v25, 16  ;;  %v2244_v48 = vshll.u32 %v2066_v25, 16 }
  0xd4   : > { %v2243_v47 = vrot.slane %v2241_v36, 7 }
  0xd6   : > { %v2246_v60 = vor.u32 %v2244_v48, %v2243_v47 }
  0xd8   : > { %5837 = vmatmul.msk.bf16.gmra.mxu2 %vm800_vm5, %v1798_v44  ;;  %v2227_v44 = vshrl.u32 %v2064_v35, 16  ;;  %v2247_v11 = vsel %vm6261_vm4, %v2239_v58, %v2246_v60  ;;  %v265_v35 = vld [vmem:[#allocation2 + $0x9c] sm:$0x1]  ;;  %v6137_v58 = vld [vmem:[#allocation2 + $0x74] sm:$0xff] }
  0xd9   : > { %v2461_v20 = vunpack.c.l.b16 %v2247_v11  ;;  %v266_v40 = vsel %vm6501_vm7, 0, %v265_v35  ;;  %v1353_v35 = vld [vmem:[#allocation2 + $0x98] sm:$0xf] }
  0xda   : > { %5870 = vmatmul.msk.bf16.gmra.mxu3 %vm800_vm5, %v2484_v53  ;;  %v1543_v53 = vsel %vm6536_vm10, %v1538_v41, %v1542_v42  ;;  %v5855_v54 = vrot.slane %v2227_v44, 11  ;;  %v1552_v41 = vrot.slane %v1551_v24, 4  ;;  %v5856_v44 = vrot.slane %v2249_v28, 11  ;;  %267 = vst [vmem:[#allocation2 + $0x9c] sm:$0x1] %v266_v40 }
  0xdb   : > { %v902_v8 = vpop.f32.mrf.mxu2  ;;  %v887_v9 = vpop.f32.mrf.mxu1  ;;  %v1775_v5 = vunpack.c.l.b16 %v1543_v53  ;;  %v271_v24 = vld [vmem:[#allocation2 + $0xac] sm:$0x1] }
  0xdc   : > { %959 = vst.msk [vmem:[#allocation3 + $0x80] sm:$0xff] %vm942_vm11, %v902_v8  ;;  %v2069_v8 = vld [vmem:[#allocation2 + $0x88] sm:$0xf]  ;;  %v272_v30 = vsel %vm6501_vm7, 0, %v271_v24 }
  0xdd   : > { %v922_v33 = vpop.f32.mrf.mxu3  ;;  %953 = vst.msk [vmem:[#allocation3 + $0x50] sm:$0xff] %vm942_vm11, %v887_v9  ;;  %v2238_v9 = vsel %vm6261_vm4, %v5855_v54, %v2237_v55  ;;  %v2263_v18 = vshrl.u32 %v2069_v8, 16 }
  0xde   : > { %967 = vst.msk [vmem:[#allocation3 + $0xc0] sm:$0xff] %vm942_vm11, %v922_v33  ;;  %5821 = vmatmul.msk.bf16.gmra.mxu1 %vm800_vm5, %v6120_v59  ;;  %v1774_v59 = vunpack.c.l.b16 %v1533_v52  ;;  %v1348_v33 = vld [vmem:[#allocation2 + $0x7c] sm:$0x1]  ;;  %v2460_v19 = vunpack.c.l.b16 %v2238_v9 }
  0xdf   : > { %v1564_v25 = vshll.u32 %v1348_v33, 16  ;;  %v2276_v33 = vshrl.u32 %v2071_v4, 16  ;;  %273 = vst [vmem:[#allocation2 + $0xac] sm:$0x1] %v272_v30 }
  0xe0   : > { %v1800_v22 = vpack.c.b16 %v1775_v5, %v1774_v59  ;;  %v2486_v36 = vpack.c.b16 %v2461_v20, %v2460_v19 }
  0xe1   : > { %5951 = vmatmul.msk.bf16.gmra.mxu0 %vm800_vm5, %v6135_v14  ;;  %v6656_v14 = vrot.slane %v1554_v27, 5  ;;  %v1566_v43 = vrot.slane %v1564_v25, 5  ;;  %v2278_v28 = vrot.slane %v2276_v33, 7 }
  0xe3   : > { %v904_v32 = vpop.f32.mrf.mxu2  ;;  %v889_v34 = vpop.f32.mrf.mxu1  ;;  %v1561_v26 = vor.u32 %v1560_v16, %v6656_v14  ;;  %v1557_v54 = vsel %vm6536_vm10, %v1552_v41, %v6656_v14  ;;  %v2281_v40 = vor.u32 %v2279_v29, %v2278_v28  ;;  %v2283_v41 = vrot.slane %v2278_v28, 4 }
  0xe4   : > { %960 = vst.msk [vmem:[#allocation3 + $0x88] sm:$0xff] %vm942_vm11, %v904_v32  ;;  %v2265_v32 = vrot.slane %v2263_v18, 7  ;;  %v1776_v59 = vunpack.c.l.b16 %v1557_v54 }
  0xe5   : > { %v924_v38 = vpop.f32.mrf.mxu3  ;;  %954 = vst.msk [vmem:[#allocation3 + $0x58] sm:$0xff] %vm942_vm11, %v889_v34  ;;  %v2266_v34 = vshll.u32 %v2069_v8, 16  ;;  %v1562_v42 = vrot.slane %v1561_v26, 4  ;;  %v2072_v8 = vld [vmem:[#allocation2 + $0x98] sm:$0xf]  ;;  %v2271_v26 = vshrl.u32 %v2070_v17, 16 }
  0xe6   : > { %968 = vst.msk [vmem:[#allocation3 + $0xc8] sm:$0xff] %vm942_vm11, %v924_v38  ;;  %v1349_v38 = vld [vmem:[#allocation2 + $0x84] sm:$0xf]  ;;  %v2285_v2 = vshrl.u32 %v2072_v8, 16 }
  0xe7   : > { %v1569_v45 = vshrl.u32 %v1349_v38, 16  ;;  %v1572_v46 = vshll.u32 %v1349_v38, 16  ;;  %v1567_v55 = vsel %vm6536_vm10, %v1562_v42, %v1566_v43  ;;  %v6123_v38 = vld [vmem:[#allocation2 + $0x84] sm:$0xff] }
  0xe8   : > { %5838 = vmatmul.msk.bf16.gmra.mxu2 %vm800_vm5, %v1799_v37  ;;  %v1777_v5 = vunpack.c.l.b16 %v1567_v55 }
  0xe9   : > { %v1571_v60 = vrot.slane %v1569_v45, 4  ;;  %v1574_v61 = vrot.slane %v1572_v46, 5 }
  0xea   : > { %5871 = vmatmul.msk.bf16.gmra.mxu3 %vm800_vm5, %v2485_v39  ;;  %v1350_v39 = vld [vmem:[#allocation2 + $0x88] sm:$0xf]  ;;  %v1801_v18 = vpack.c.b16 %v1777_v5, %v1776_v59 }
  0xeb   : > { %v907_v56 = vpop.f32.mrf.mxu2  ;;  %v892_v57 = vpop.f32.mrf.mxu1  ;;  %v1578_v47 = vshll.u32 %v1350_v39, 16  ;;  %v1582_v48 = vshrl.u32 %v1350_v39, 16  ;;  %v1575_v11 = vor.u32 %v1574_v61, %v1571_v60  ;;  %v5857_v39 = vrot.slane %v2271_v26, 11 }
  0xec   : > { %961 = vst.msk [vmem:[#allocation3 + $0x90] sm:$0xff] %vm942_vm11, %v907_v56  ;;  %v2260_v56 = vsel %vm6261_vm4, %v5856_v44, %v2259_v3  ;;  %v1229_v3 = vld [vmem:[#allocation3] sm:$0xff] }
  0xed   : > { %v927_v0 = vpop.f32.mrf.mxu3  ;;  %955 = vst.msk [vmem:[#allocation3 + $0x60] sm:$0xff] %vm942_vm11, %v892_v57  ;;  %v6677_v62 = vrot.slane %v1578_v47, 5  ;;  %v1584_v27 = vrot.slane %v1582_v48, 4  ;;  %v1602_v47 = vshll.u32 %v1353_v35, 16  ;;  %v1606_v48 = vshrl.u32 %v1353_v35, 16 }
  0xee   : > { %969 = vst.msk [vmem:[#allocation3 + $0xd0] sm:$0xff] %vm942_vm11, %v927_v0  ;;  %5822 = vmatmul.msk.bf16.gmra.mxu1 %vm800_vm5, %v6121_v51  ;;  %v867_v6 = vpop.f32.mrf.mxu0  ;;  %v2268_v51 = vor.u32 %v2266_v34, %v2265_v32  ;;  %v2288_v32 = vshll.u32 %v2072_v8, 16  ;;  %v1352_v34 = vld [vmem:[#allocation2 + $0x94] sm:$0xf] }
  0xef   : > { %945 = vst.msk [vmem:[#allocation3 + $0x10] sm:$0xff] %vm942_vm11, %v867_v6  ;;  %v2462_v6 = vunpack.c.l.b16 %v2260_v56  ;;  %v1585_v12 = vor.u32 %v1584_v27, %v6677_v62  ;;  %v1593_v42 = vshrl.u32 %v1352_v34, 16  ;;  %v1596_v46 = vshll.u32 %v1352_v34, 16  ;;  %v2075_v27 = vld [vmem:[#allocation2 + $0xa8] sm:$0xf] }
  0xf0   : > { %v2269_v0 = vsel %vm6261_vm4, %v2261_v50, %v2268_v51  ;;  %v6138_v51 = vld [vmem:[#allocation2 + $0x84] sm:$0xff]  ;;  %v2282_v56 = vsel %vm6261_vm4, %v5857_v39, %v2281_v40  ;;  %v6707_v61 = vrot.slane %v1602_v47, 5  ;;  %v2307_v5 = vshrl.u32 %v2075_v27, 16  ;;  %v6124_v39 = vld [vmem:[#allocation2 + $0x94] sm:$0xff] }
  0xf1   : > { %5952 = vmatmul.msk.bf16.gmra.mxu0 %vm800_vm5, %v6136_v1  ;;  %v1351_v1 = vld [vmem:[#allocation2 + $0x8c] sm:$0x1]  ;;  %v2463_v9 = vunpack.c.l.b16 %v2269_v0  ;;  %v1598_v60 = vrot.slane %v1596_v46, 5  ;;  %v2464_v4 = vunpack.c.l.b16 %v2282_v56  ;;  %v2310_v24 = vshll.u32 %v2075_v27, 16  ;;  %v2078_v27 = vld [vmem:[#allocation2 + $0xb8] sm:$0xf] }
  0xf2   : > { %v1588_v13 = vshll.u32 %v1351_v1, 16  ;;  %v2073_v1 = vld [vmem:[#allocation2 + $0xa0] sm:$0x8] }
  0xf3   : > { %v909_v21 = vpop.f32.mrf.mxu2  ;;  %v894_v23 = vpop.f32.mrf.mxu1  ;;  %v2487_v20 = vpack.c.b16 %v2463_v9, %v2462_v6 }
  0xf4   : > { %962 = vst.msk [vmem:[#allocation3 + $0x98] sm:$0xff] %vm942_vm11, %v909_v21  ;;  %v1576_v21 = vrot.slane %v1575_v11, 4  ;;  %v1230_v11 = vld [vmem:[#allocation3 + $0x8] sm:$0xff] }
  0xf5   : > { %v929_v31 = vpop.f32.mrf.mxu3  ;;  %956 = vst.msk [vmem:[#allocation3 + $0x68] sm:$0xff] %vm942_vm11, %v894_v23  ;;  %v1590_v23 = vrot.slane %v1588_v13, 5 }
  0xf6   : > { %970 = vst.msk [vmem:[#allocation3 + $0xd8] sm:$0xff] %vm942_vm11, %v929_v31  ;;  %v869_v37 = vpop.f32.mrf.mxu0  ;;  %v2287_v31 = vrot.slane %v2285_v2, 7 }
  0xf7   : > { %946 = vst.msk [vmem:[#allocation3 + $0x18] sm:$0xff] %vm942_vm11, %v869_v37 }
  0xf8   : > { %5839 = vmatmul.msk.bf16.gmra.mxu2 %vm800_vm5, %v1800_v22  ;;  %v1586_v22 = vrot.slane %v1585_v12, 4  ;;  %v2290_v45 = vor.u32 %v2288_v32, %v2287_v31 }
  0xfa   : > { %5872 = vmatmul.msk.bf16.gmra.mxu3 %vm800_vm5, %v2486_v36  ;;  %v1581_v36 = vsel %vm6536_vm10, %v1576_v21, %v6677_v62  ;;  %v1591_v37 = vsel %vm6536_vm10, %v1586_v22, %v1590_v23  ;;  %v1608_v62 = vrot.slane %v1606_v48, 4  ;;  %v2309_v23 = vrot.slane %v2307_v5, 7 }
  0xfb   : > { %v912_v52 = vpop.f32.mrf.mxu2  ;;  %v897_v53 = vpop.f32.mrf.mxu1  ;;  %v1779_v54 = vunpack.c.l.b16 %v1591_v37 }
  0xfc   : > { %963 = vst.msk [vmem:[#allocation3 + $0xa0] sm:$0xff] %vm942_vm11, %v912_v52  ;;  %v2074_v52 = vld [vmem:[#allocation2 + $0xa4] sm:$0xf]  ;;  %v1609_v13 = vor.u32 %v1608_v62, %v6707_v61 }
  0xfd   : > { %v932_v57 = vpop.f32.mrf.mxu3  ;;  %957 = vst.msk [vmem:[#allocation3 + $0x70] sm:$0xff] %vm942_vm11, %v897_v53  ;;  %v1778_v53 = vunpack.c.l.b16 %v1581_v36  ;;  %v2298_v0 = vshrl.u32 %v2074_v52, 16  ;;  %v2301_v2 = vshll.u32 %v2074_v52, 16 }
  0xfe   : > { %971 = vst.msk [vmem:[#allocation3 + $0xe0] sm:$0xff] %vm942_vm11, %v932_v57  ;;  %5823 = vmatmul.msk.bf16.gmra.mxu1 %vm800_vm5, %v6122_v49  ;;  %v872_v63 = vpop.f32.mrf.mxu0  ;;  %v1595_v57 = vrot.slane %v1593_v42, 4  ;;  %v1610_v29 = vrot.slane %v1609_v13, 4 }
  0xff   : > { %947 = vst.msk [vmem:[#allocation3 + $0x20] sm:$0xff] %vm942_vm11, %v872_v63  ;;  %v1354_v63 = vld [vmem:[#allocation2 + $0x9c] sm:$0x1]  ;;  %v1802_v8 = vpack.c.b16 %v1779_v54, %v1778_v53  ;;  %v2300_v17 = vrot.slane %v2298_v0, 7 }
 0x100   : > { %v1599_v12 = vor.u32 %v1598_v60, %v1595_v57  ;;  %v1612_v33 = vshll.u32 %v1354_v63, 16  ;;  %v1357_v57 = vld [vmem:[#allocation2 + $0xac] sm:$0x1] }
 0x101   : > { %5953 = vmatmul.msk.bf16.gmra.mxu0 %vm800_vm5, %v6137_v58  ;;  %v2291_v58 = vsel %vm6261_vm4, %v2283_v41, %v2290_v45  ;;  %v2303_v32 = vor.u32 %v2301_v2, %v2300_v17  ;;  %v2305_v40 = vrot.slane %v2300_v17, 4  ;;  %v2312_v41 = vor.u32 %v2310_v24, %v2309_v23 }
 0x102   : > { %v2465_v59 = vunpack.c.l.b16 %v2291_v58  ;;  %v1600_v28 = vrot.slane %v1599_v12, 4  ;;  %v1614_v30 = vrot.slane %v1612_v33, 5  ;;  %v2077_v58 = vld [vmem:[#allocation2 + $0xb4] sm:$0xf]  ;;  %v2329_v12 = vshrl.u32 %v2078_v27, 16 }
 0x103   : > { %v914_v14 = vpop.f32.mrf.mxu2  ;;  %v899_v16 = vpop.f32.mrf.mxu1  ;;  %v2313_v56 = vsel %vm6261_vm4, %v2305_v40, %v2312_v41  ;;  %v2320_v5 = vshrl.u32 %v2077_v58, 16 }
 0x104   : > { %964 = vst.msk [vmem:[#allocation3 + $0xa8] sm:$0xff] %vm942_vm11, %v914_v14  ;;  %v2488_v21 = vpack.c.b16 %v2465_v59, %v2464_v4  ;;  %v1615_v47 = vsel %vm6536_vm10, %v1610_v29, %v1614_v30  ;;  %v2467_v0 = vunpack.c.l.b16 %v2313_v56  ;;  %v1636_v59 = vshll.u32 %v1357_v57, 16  ;;  %v1358_v30 = vld [vmem:[#allocation2 + $0xb4] sm:$0xf] }
 0x105   : > { %v934_v19 = vpop.f32.mrf.mxu3  ;;  %958 = vst.msk [vmem:[#allocation3 + $0x78] sm:$0xff] %vm942_vm11, %v899_v16  ;;  %v2293_v16 = vshrl.u32 %v2073_v1, 16  ;;  %v2332_v29 = vshll.u32 %v2078_v27, 16  ;;  %v1641_v40 = vshrl.u32 %v1358_v30, 16  ;;  %v1644_v41 = vshll.u32 %v1358_v30, 16 }
 0x106   : > { %972 = vst.msk [vmem:[#allocation3 + $0xe8] sm:$0xff] %vm942_vm11, %v934_v19  ;;  %v874_v25 = vpop.f32.mrf.mxu0  ;;  %v1355_v19 = vld [vmem:[#allocation2 + $0xa4] sm:$0xf] }
 0x107   : > { %948 = vst.msk [vmem:[#allocation3 + $0x28] sm:$0xff] %vm942_vm11, %v874_v25  ;;  %v1356_v25 = vld [vmem:[#allocation2 + $0xa8] sm:$0xf]  ;;  %v5858_v31 = vrot.slane %v2293_v16, 11  ;;  %v1617_v34 = vshrl.u32 %v1355_v19, 16  ;;  %v1620_v36 = vshll.u32 %v1355_v19, 16 }
 0x108   : > { %5840 = vmatmul.msk.bf16.gmra.mxu2 %vm800_vm5, %v1801_v18  ;;  %v1626_v37 = vshll.u32 %v1356_v25, 16 }
 0x109   : > { %v2304_v48 = vsel %vm6261_vm4, %v5858_v31, %v2303_v32  ;;  %v1622_v52 = vrot.slane %v1620_v36, 5  ;;  %v1359_v32 = vld [vmem:[#allocation2 + $0xb8] sm:$0xf] }
 0x10a   : > { %5873 = vmatmul.msk.bf16.gmra.mxu3 %vm800_vm5, %v2487_v20  ;;  %v277_v20 = vld [vmem:[#allocation2 + $0xbc] sm:$0x1]  ;;  %v6727_v53 = vrot.slane %v1626_v37, 5  ;;  %v2466_v62 = vunpack.c.l.b16 %v2304_v48  ;;  %v6125_v37 = vld [vmem:[#allocation2 + $0xa4] sm:$0xff] }
 0x10b   : > { %v917_v43 = vpop.f32.mrf.mxu2  ;;  %v1149_v44 = vpop.f32.mrf.mxu1  ;;  %v278_v26 = vsel %vm6501_vm7, 0, %v277_v20  ;;  %v1638_v20 = vrot.slane %v1636_v59, 5 }
 0x10c   : > { %965 = vst.msk [vmem:[#allocation3 + $0xb0] sm:$0xff] %vm942_vm11, %v917_v43  ;;  %v1261_v49 = vadd.f32 %v1229_v3, %v1149_v44  ;;  %v1231_v44 = vld [vmem:[#allocation3 + $0x10] sm:$0xff]  ;;  %v1605_v3 = vsel %vm6536_vm10, %v1600_v28, %v6707_v61  ;;  %v1781_v61 = vunpack.c.l.b16 %v1615_v47  ;;  %v2489_v2 = vpack.c.b16 %v2467_v0, %v2466_v62 }
 0x10d   : > { %v937_v50 = vpop.f32.mrf.mxu3  ;;  %279 = vst [vmem:[#allocation2 + $0xbc] sm:$0x1] %v278_v26  ;;  %v1780_v60 = vunpack.c.l.b16 %v1605_v3  ;;  %v2323_v26 = vshll.u32 %v2077_v58, 16  ;;  %v2331_v28 = vrot.slane %v2329_v12, 7  ;;  %v1654_v47 = vshrl.u32 %v1359_v32, 16 }
 0x10e   : > { %973 = vst.msk [vmem:[#allocation3 + $0xf0] sm:$0xff] %vm942_vm11, %v937_v50  ;;  %5824 = vmatmul.msk.bf16.gmra.mxu1 %vm800_vm5, %v6123_v38  ;;  %v877_v55 = vpop.f32.mrf.mxu0  ;;  %v1630_v38 = vshrl.u32 %v1356_v25, 16  ;;  %v6139_v50 = vld [vmem:[#allocation2 + $0x94] sm:$0xff]  ;;  %v2322_v25 = vrot.slane %v2320_v5, 7 }
 0x10f   : > { %1293 = vst.msk [vmem:[#allocation3] sm:$0xff] %vm942_vm11, %v1261_v49  ;;  %v1803_v33 = vpack.c.b16 %v1781_v61, %v1780_v60  ;;  %v1643_v60 = vrot.slane %v1641_v40, 4  ;;  %v1646_v61 = vrot.slane %v1644_v41, 5 }
 0x110   : > { %949 = vst.msk [vmem:[#allocation3 + $0x30] sm:$0xff] %vm942_vm11, %v877_v55  ;;  %v1632_v54 = vrot.slane %v1630_v38, 4  ;;  %v2327_v3 = vrot.slane %v2322_v25, 4 }
 0x111   : > { %5954 = vmatmul.msk.bf16.gmra.mxu0 %vm800_vm5, %v6138_v51  ;;  %v1619_v51 = vrot.slane %v1617_v34, 4 }
 0x112   : > { %v1633_v4 = vor.u32 %v1632_v54, %v6727_v53  ;;  %v2080_v54 = vld [vmem:[#allocation2 + $0xc4] sm:$0xf] }
 0x113   : > { %v919_v6 = vpop.f32.mrf.mxu2  ;;  %v1151_v9 = vpop.f32.mrf.mxu1  ;;  %v1623_v1 = vor.u32 %v1622_v52, %v1619_v51 }
 0x114   : > { %966 = vst.msk [vmem:[#allocation3 + $0xb8] sm:$0xff] %vm942_vm11, %v919_v6  ;;  %v1262_v14 = vadd.f32 %v1230_v11, %v1151_v9  ;;  %v1232_v9 = vld [vmem:[#allocation3 + $0x18] sm:$0xff]  ;;  %v2076_v11 = vld [vmem:[#allocation2 + $0xb0] sm:$0x8]  ;;  %v1634_v19 = vrot.slane %v1633_v4, 4 }
 0x115   : > { %v939_v18 = vpop.f32.mrf.mxu3  ;;  %v2315_v24 = vshrl.u32 %v2076_v11, 16  ;;  %v2081_v4 = vld [vmem:[#allocation2 + $0xc8] sm:$0xf]  ;;  %v1360_v5 = vld [vmem:[#allocation2 + $0xbc] sm:$0x1] }
 0x116   : > { %974 = vst.msk [vmem:[#allocation3 + $0xf8] sm:$0xff] %vm942_vm11, %v939_v18  ;;  %v879_v22 = vpop.f32.mrf.mxu0  ;;  %v1950_v35 = vld [vmem:[#allocation3] sm:$0xff]  ;;  %v1624_v18 = vrot.slane %v1623_v1, 4  ;;  %v1639_v36 = vsel %vm6536_vm10, %v1634_v19, %v1638_v20  ;;  %v1656_v1 = vrot.slane %v1654_v47, 4  ;;  %v1660_v19 = vshll.u32 %v1360_v5, 16 }
 0x117   : > { %1294 = vst.msk [vmem:[#allocation3 + $0x8] sm:$0xff] %vm942_vm11, %v1262_v14  ;;  %v5859_v38 = vrot.slane %v2315_v24, 11  ;;  %v1783_v57 = vunpack.c.l.b16 %v1639_v36  ;;  %v2345_v24 = vshll.u32 %v2080_v54, 16  ;;  %v1362_v36 = vld [vmem:[#allocation2 + $0xc8] sm:$0xf] }
 0x118   : > { %5841 = vmatmul.msk.bf16.gmra.mxu2 %vm800_vm5, %v1802_v8  ;;  %950 = vst.msk [vmem:[#allocation3 + $0x38] sm:$0xff] %vm942_vm11, %v879_v22  ;;  %v1662_v40 = vrot.slane %v1660_v19, 5  ;;  %v1674_v47 = vshll.u32 %v1362_v36, 16 }
 0x11a   : > { %5874 = vmatmul.msk.bf16.gmra.mxu3 %vm800_vm5, %v2488_v21  ;;  %v283_v21 = vld [vmem:[#allocation2 + $0xcc] sm:$0x1] }
 0x11b   : > { %v1870_v42 = vpop.f32.mrf.mxu2  ;;  %v1154_v43 = vpop.f32.mrf.mxu1  ;;  %v284_v31 = vsel %vm6501_vm7, 0, %v283_v21 }
 0x11c   : > { %v1982_v45 = vadd.f32 %v1950_v35, %v1870_v42  ;;  %v1263_v46 = vadd.f32 %v1231_v44, %v1154_v43  ;;  %v1629_v35 = vsel %vm6536_vm10, %v1624_v18, %v6727_v53  ;;  %285 = vst [vmem:[#allocation2 + $0xcc] sm:$0x1] %v284_v31  ;;  %v1233_v44 = vld [vmem:[#allocation3 + $0x20] sm:$0xff] }
 0x11d   : > { %v2556_v49 = vpop.f32.mrf.mxu3  ;;  %v1782_v52 = vunpack.c.l.b16 %v1629_v35  ;;  %v6140_v53 = vld [vmem:[#allocation2 + $0xa4] sm:$0xff]  ;;  %v2354_v35 = vshll.u32 %v2081_v4, 16 }
 0x11e   : > { %2014 = vst.msk [vmem:[#allocation3] sm:$0xff] %vm942_vm11, %v1982_v45  ;;  %5825 = vmatmul.msk.bf16.gmra.mxu1 %vm800_vm5, %v6124_v39  ;;  %v6731_v55 = vpop.f32.mrf.mxu0  ;;  %v1951_v63 = vld [vmem:[#allocation3 + $0x8] sm:$0xff]  ;;  %v2325_v39 = vor.u32 %v2323_v26, %v2322_v25  ;;  %v2334_v45 = vor.u32 %v2332_v29, %v2331_v28  ;;  %v1361_v28 = vld [vmem:[#allocation2 + $0xc4] sm:$0xf]  ;;  %v289_v29 = vld [vmem:[#allocation2 + $0xdc] sm:$0x1] }
 0x11f   : > { %1295 = vst.msk [vmem:[#allocation3 + $0x10] sm:$0xff] %vm942_vm11, %v1263_v46  ;;  %v1650_v46 = vshll.u32 %v1359_v32, 16  ;;  %v1804_v11 = vpack.c.b16 %v1783_v57, %v1782_v52  ;;  %v290_v41 = vsel %vm6501_vm7, 0, %v289_v29 }
 0x120   : > { %v2326_v27 = vsel %vm6261_vm4, %v5859_v38, %v2325_v39  ;;  %291 = vst [vmem:[#allocation2 + $0xdc] sm:$0x1] %v290_v41 }
 0x121   : > { %5955 = vmatmul.msk.bf16.gmra.mxu0 %vm800_vm5, %v6139_v50  ;;  %v6761_v0 = vrot.slane %v1650_v46, 5  ;;  %v2468_v12 = vunpack.c.l.b16 %v2326_v27  ;;  %v1668_v46 = vshll.u32 %v1361_v28, 16 }
 0x123   : > { %v1872_v6 = vpop.f32.mrf.mxu2  ;;  %v1156_v8 = vpop.f32.mrf.mxu1  ;;  %v1657_v18 = vor.u32 %v1656_v1, %v6761_v0 }
 0x124   : > { %v1983_v13 = vadd.f32 %v1951_v63, %v1872_v6  ;;  %v1264_v14 = vadd.f32 %v1232_v9, %v1156_v8  ;;  %v2335_v63 = vsel %vm6261_vm4, %v2327_v3, %v2334_v45  ;;  %v2079_v6 = vld [vmem:[#allocation2 + $0xc0] sm:$0x8]  ;;  %v2342_v8 = vshrl.u32 %v2080_v54, 16 }
 0x125   : > { %v2636_v16 = vld [vmem:[#allocation3] sm:$0xff]  ;;  %v2558_v17 = vpop.f32.mrf.mxu3  ;;  %v1658_v39 = vrot.slane %v1657_v18, 4  ;;  %v1665_v3 = vshrl.u32 %v1361_v28, 16 }
 0x126   : > { %v2668_v22 = vadd.f32 %v2636_v16, %v2556_v49  ;;  %2015 = vst.msk [vmem:[#allocation3 + $0x8] sm:$0xff] %vm942_vm11, %v1983_v13  ;;  %v6739_v23 = vpop.f32.mrf.mxu0  ;;  %v1952_v34 = vld [vmem:[#allocation3 + $0x10] sm:$0xff]  ;;  %v2469_v13 = vunpack.c.l.b16 %v2335_v63 }
 0x127   : > { %1296 = vst.msk [vmem:[#allocation3 + $0x18] sm:$0xff] %vm942_vm11, %v1264_v14  ;;  %v6141_v63 = vld [vmem:[#allocation2 + $0xb4] sm:$0xff]  ;;  %v1667_v1 = vrot.slane %v1665_v3, 4 }
 0x128   : > { %2700 = vst.msk [vmem:[#allocation3] sm:$0xff] %vm942_vm11, %v2668_v22  ;;  %5842 = vmatmul.msk.bf16.gmra.mxu2 %vm800_vm5, %v1803_v33  ;;  %v2351_v33 = vshrl.u32 %v2081_v4, 16  ;;  %v2344_v22 = vrot.slane %v2342_v8, 7  ;;  %v2490_v31 = vpack.c.b16 %v2469_v13, %v2468_v12  ;;  %v1670_v4 = vrot.slane %v1668_v46, 5  ;;  %v2083_v12 = vld [vmem:[#allocation2 + $0xd4] sm:$0xf] }
 0x12a   : > { %5875 = vmatmul.msk.bf16.gmra.mxu3 %vm800_vm5, %v2489_v2  ;;  %v1647_v2 = vor.u32 %v1646_v61, %v1643_v60  ;;  %v1663_v60 = vsel %vm6536_vm10, %v1658_v39, %v1662_v40  ;;  %v1671_v19 = vor.u32 %v1670_v4, %v1667_v1  ;;  %v295_v39 = vld [vmem:[#allocation2 + $0xec] sm:$0x1] }
 0x12b   : > { %v1875_v42 = vpop.f32.mrf.mxu2  ;;  %v1159_v43 = vpop.f32.mrf.mxu1 }
 0x12c   : > { %v1984_v48 = vadd.f32 %v1952_v34, %v1875_v42  ;;  %v1265_v49 = vadd.f32 %v1233_v44, %v1159_v43  ;;  %v2353_v34 = vrot.slane %v2351_v33, 7  ;;  %v1648_v38 = vrot.slane %v1647_v2, 4 }
 0x12d   : > { %v2637_v50 = vld [vmem:[#allocation3 + $0x8] sm:$0xff]  ;;  %v2561_v51 = vpop.f32.mrf.mxu3  ;;  %v2347_v44 = vor.u32 %v2345_v24, %v2344_v22 }
 0x12e   : > { %v2669_v56 = vadd.f32 %v2637_v50, %v2558_v17  ;;  %2016 = vst.msk [vmem:[#allocation3 + $0x10] sm:$0xff] %vm942_vm11, %v1984_v48  ;;  %5826 = vmatmul.msk.bf16.gmra.mxu1 %vm800_vm5, %v6125_v37  ;;  %v6754_v58 = vpop.f32.mrf.mxu0  ;;  %v1953_v9 = vld [vmem:[#allocation3 + $0x18] sm:$0xff]  ;;  %v1234_v17 = vld [vmem:[#allocation3 + $0x28] sm:$0xff]  ;;  %v1678_v48 = vshrl.u32 %v1362_v36, 16  ;;  %v2349_v50 = vrot.slane %v2344_v22, 4  ;;  %v1653_v54 = vsel %vm6536_vm10, %v1648_v38, %v6761_v0 }
 0x12f   : > { %v2986_v62 = vld [vmem:[#allocation3] sm:$0xff]  ;;  %1297 = vst.msk [vmem:[#allocation3 + $0x20] sm:$0xff] %vm942_vm11, %v1265_v49  ;;  %v6126_v49 = vld [vmem:[#allocation2 + $0xb4] sm:$0xff]  ;;  %v1784_v33 = vunpack.c.l.b16 %v1653_v54  ;;  %v1672_v36 = vrot.slane %v1671_v19, 4 }
 0x130   : > { %2701 = vst.msk [vmem:[#allocation3 + $0x8] sm:$0xff] %vm942_vm11, %v2669_v56  ;;  %v3018_v59 = vadd.f32 %v2986_v62, %v6731_v55  ;;  %v2337_v55 = vshrl.u32 %v2079_v6, 16  ;;  %v1680_v5 = vrot.slane %v1678_v48, 4 }
 0x131   : > { %5956 = vmatmul.msk.bf16.gmra.mxu0 %vm800_vm5, %v6140_v53 }
 0x132   : > { %3050 = vst.msk [vmem:[#allocation3] sm:$0xff] %vm942_vm11, %v3018_v59  ;;  %v5860_v43 = vrot.slane %v2337_v55, 11  ;;  %v6786_v59 = vrot.slane %v1674_v47, 5  ;;  %v296_v47 = vsel %vm6501_vm7, 0, %v295_v39 }
 0x133   : > { %v1877_v14 = vpop.f32.mrf.mxu2  ;;  %v1161_v16 = vpop.f32.mrf.mxu1  ;;  %297 = vst [vmem:[#allocation2 + $0xec] sm:$0x1] %v296_v47  ;;  %v301_v47 = vld [vmem:[#allocation2 + $0xfc] sm:$0x1] }
 0x134   : > { %v1985_v20 = vadd.f32 %v1953_v9, %v1877_v14  ;;  %v1266_v21 = vadd.f32 %v1234_v17, %v1161_v16  ;;  %v2348_v61 = vsel %vm6261_vm4, %v5860_v43, %v2347_v44  ;;  %v1363_v9 = vld [vmem:[#allocation2 + $0xcc] sm:$0x1]  ;;  %v1785_v14 = vunpack.c.l.b16 %v1663_v60  ;;  %v2084_v17 = vld [vmem:[#allocation2 + $0xd8] sm:$0xf]  ;;  %v1237_v60 = vld [vmem:[#allocation3 + $0x40] sm:$0xff] }
 0x135   : > { %v2638_v25 = vld [vmem:[#allocation3 + $0x10] sm:$0xff]  ;;  %v2563_v26 = vpop.f32.mrf.mxu3  ;;  %v2470_v16 = vunpack.c.l.b16 %v2348_v61  ;;  %v1681_v55 = vor.u32 %v1680_v5, %v6786_v59  ;;  %v2367_v44 = vshll.u32 %v2083_v12, 16  ;;  %v2376_v46 = vshll.u32 %v2084_v17, 16 }
 0x136   : > { %v2670_v30 = vadd.f32 %v2638_v25, %v2561_v51  ;;  %2017 = vst.msk [vmem:[#allocation3 + $0x18] sm:$0xff] %vm942_vm11, %v1985_v20  ;;  %v6769_v32 = vpop.f32.mrf.mxu0  ;;  %v1954_v45 = vld [vmem:[#allocation3 + $0x20] sm:$0xff]  ;;  %v2356_v51 = vor.u32 %v2354_v35, %v2353_v34  ;;  %v1684_v20 = vshll.u32 %v1363_v9, 16  ;;  %v1236_v25 = vld [vmem:[#allocation3 + $0x38] sm:$0xff]  ;;  %v1805_v29 = vpack.c.b16 %v1785_v14, %v1784_v33 }
 0x137   : > { %v2987_v37 = vld [vmem:[#allocation3 + $0x8] sm:$0xff]  ;;  %1298 = vst.msk [vmem:[#allocation3 + $0x28] sm:$0xff] %vm942_vm11, %v1266_v21  ;;  %v2364_v21 = vshrl.u32 %v2083_v12, 16  ;;  %v2086_v14 = vld [vmem:[#allocation2 + $0xe4] sm:$0xf] }
 0x138   : > { %2702 = vst.msk [vmem:[#allocation3 + $0x10] sm:$0xff] %vm942_vm11, %v2670_v30  ;;  %v3019_v42 = vadd.f32 %v2987_v37, %v6739_v23  ;;  %5843 = vmatmul.msk.bf16.gmra.mxu2 %vm800_vm5, %v1804_v11  ;;  %v1235_v23 = vld [vmem:[#allocation3 + $0x30] sm:$0xff]  ;;  %v2357_v8 = vsel %vm6261_vm4, %v2349_v50, %v2356_v51  ;;  %v1682_v37 = vrot.slane %v1681_v55, 4  ;;  %v1686_v38 = vrot.slane %v1684_v20, 5  ;;  %v1365_v51 = vld [vmem:[#allocation2 + $0xd8] sm:$0xf] }
 0x139   : > { %v2471_v18 = vunpack.c.l.b16 %v2357_v8  ;;  %v2366_v43 = vrot.slane %v2364_v21, 7  ;;  %v1698_v5 = vshll.u32 %v1365_v51, 16  ;;  %v2087_v55 = vld [vmem:[#allocation2 + $0xe8] sm:$0xf] }
 0x13a   : > { %3051 = vst.msk [vmem:[#allocation3 + $0x8] sm:$0xff] %vm942_vm11, %v3019_v42  ;;  %5876 = vmatmul.msk.bf16.gmra.mxu3 %vm800_vm5, %v2490_v31 }
 0x13b   : > { %v1880_v52 = vpop.f32.mrf.mxu2  ;;  %v1164_v53 = vpop.f32.mrf.mxu1  ;;  %v2491_v35 = vpack.c.b16 %v2471_v18, %v2470_v16  ;;  %v2371_v61 = vrot.slane %v2366_v43, 4  ;;  %v6827_v21 = vrot.slane %v1698_v5, 5 }
 0x13c   : > { %v1986_v56 = vadd.f32 %v1954_v45, %v1880_v52  ;;  %v1267_v57 = vadd.f32 %v1235_v23, %v1164_v53  ;;  %v6127_v52 = vld [vmem:[#allocation2 + $0xc4] sm:$0xff]  ;;  %v1677_v53 = vsel %vm6536_vm10, %v1672_v36, %v6786_v59  ;;  %v1687_v23 = vsel %vm6536_vm10, %v1682_v37, %v1686_v38 }
 0x13d   : > { %v2639_v62 = vld [vmem:[#allocation3 + $0x18] sm:$0xff]  ;;  %v2566_v27 = vpop.f32.mrf.mxu3  ;;  %v1786_v12 = vunpack.c.l.b16 %v1677_v53  ;;  %v1238_v36 = vld [vmem:[#allocation3 + $0x48] sm:$0xff] }
 0x13e   : > { %v2671_v6 = vadd.f32 %v2639_v62, %v2563_v26  ;;  %2018 = vst.msk [vmem:[#allocation3 + $0x20] sm:$0xff] %vm942_vm11, %v1986_v56  ;;  %5827 = vmatmul.msk.bf16.gmra.mxu1 %vm800_vm5, %v6126_v49  ;;  %v6790_v0 = vpop.f32.mrf.mxu0  ;;  %v1955_v2 = vld [vmem:[#allocation3 + $0x28] sm:$0xff]  ;;  %v2082_v26 = vld [vmem:[#allocation2 + $0xd0] sm:$0x8]  ;;  %v1364_v49 = vld [vmem:[#allocation2 + $0xd4] sm:$0xf] }
 0x13f   : > { %v2988_v11 = vld [vmem:[#allocation3 + $0x10] sm:$0xff]  ;;  %1299 = vst.msk [vmem:[#allocation3 + $0x30] sm:$0xff] %vm942_vm11, %v1267_v57  ;;  %v2359_v42 = vshrl.u32 %v2082_v26, 16  ;;  %v2386_v26 = vshrl.u32 %v2086_v14, 16 }
 0x140   : > { %2703 = vst.msk [vmem:[#allocation3 + $0x18] sm:$0xff] %vm942_vm11, %v2671_v6  ;;  %v3020_v13 = vadd.f32 %v2988_v11, %v6754_v58  ;;  %v2373_v58 = vshrl.u32 %v2084_v17, 16  ;;  %v1702_v6 = vshrl.u32 %v1365_v51, 16  ;;  %v6142_v11 = vld [vmem:[#allocation2 + $0xc4] sm:$0xff] }
 0x141   : > { %5957 = vmatmul.msk.bf16.gmra.mxu0 %vm800_vm5, %v6141_v63  ;;  %v5861_v54 = vrot.slane %v2359_v42, 11  ;;  %v1692_v63 = vshll.u32 %v1364_v49, 16  ;;  %v1367_v42 = vld [vmem:[#allocation2 + $0xe4] sm:$0xf] }
 0x142   : > { %3052 = vst.msk [vmem:[#allocation3 + $0x10] sm:$0xff] %vm942_vm11, %v3020_v13  ;;  %v2375_v45 = vrot.slane %v2373_v58, 7  ;;  %v1787_v13 = vunpack.c.l.b16 %v1687_v23  ;;  %v1368_v23 = vld [vmem:[#allocation2 + $0xe8] sm:$0xf] }
 0x143   : > { %v1882_v22 = vpop.f32.mrf.mxu2  ;;  %v1166_v24 = vpop.f32.mrf.mxu1  ;;  %v1694_v19 = vrot.slane %v1692_v63, 5 }
 0x144   : > { %v1987_v28 = vadd.f32 %v1955_v2, %v1882_v22  ;;  %v1268_v30 = vadd.f32 %v1236_v25, %v1166_v24  ;;  %v2378_v62 = vor.u32 %v2376_v46, %v2375_v45  ;;  %v1704_v22 = vrot.slane %v1702_v6, 4  ;;  %v1366_v25 = vld [vmem:[#allocation2 + $0xdc] sm:$0x1] }
 0x145   : > { %v2640_v31 = vld [vmem:[#allocation3 + $0x20] sm:$0xff]  ;;  %v2568_v34 = vpop.f32.mrf.mxu3  ;;  %v2388_v45 = vrot.slane %v2386_v26, 7  ;;  %v2389_v46 = vshll.u32 %v2086_v14, 16  ;;  %v202_v14 = vld [vmem:[%s6232_s19 + $0x78] sm:$0xf] }
 0x146   : > { %v2672_v40 = vadd.f32 %v2640_v31, %v2566_v27  ;;  %2019 = vst.msk [vmem:[#allocation3 + $0x28] sm:$0xff] %vm942_vm11, %v1987_v28  ;;  %v6801_v41 = vpop.f32.mrf.mxu0  ;;  %v1956_v50 = vld [vmem:[#allocation3 + $0x30] sm:$0xff]  ;;  %v1689_v27 = vshrl.u32 %v1364_v49, 16  ;;  %v2379_v2 = vsel %vm6261_vm4, %v2371_v61, %v2378_v62  ;;  %v1705_v39 = vor.u32 %v1704_v22, %v6827_v21  ;;  %v2090_v26 = vld [vmem:[#allocation2 + $0xf8] sm:$0xf] }
 0x147   : > { %v2989_v3 = vld [vmem:[#allocation3 + $0x18] sm:$0xff]  ;;  %1300 = vst.msk [vmem:[#allocation3 + $0x38] sm:$0xff] %vm942_vm11, %v1268_v30  ;;  %v2473_v28 = vunpack.c.l.b16 %v2379_v2  ;;  %v2395_v30 = vshrl.u32 %v2087_v55, 16  ;;  %v2391_v63 = vor.u32 %v2389_v46, %v2388_v45  ;;  %v2393_v5 = vrot.slane %v2388_v45, 4 }
 0x148   : > { %2704 = vst.msk [vmem:[#allocation3 + $0x20] sm:$0xff] %vm942_vm11, %v2672_v40  ;;  %v3021_v48 = vadd.f32 %v2989_v3, %v6769_v32  ;;  %5844 = vmatmul.msk.bf16.gmra.mxu2 %vm800_vm5, %v1805_v29  ;;  %v2369_v32 = vor.u32 %v2367_v44, %v2366_v43  ;;  %v1691_v18 = vrot.slane %v1689_v27, 4  ;;  %v2085_v29 = vld [vmem:[#allocation2 + $0xe0] sm:$0x8]  ;;  %v1708_v40 = vshll.u32 %v1366_v25, 16 }
 0x149   : > { %v2381_v3 = vshrl.u32 %v2085_v29, 16  ;;  %v2397_v51 = vrot.slane %v2395_v30, 7  ;;  %347 = vst.msk [vmem:[#allocation2 + $0x104] sm:$0xf] %vm204_vm1, %v202_v14  ;;  %v1369_v29 = vld [vmem:[#allocation2 + $0xec] sm:$0x1] }
 0x14a   : > { %3053 = vst.msk [vmem:[#allocation3 + $0x18] sm:$0xff] %vm942_vm11, %v3021_v48  ;;  %5877 = vmatmul.msk.bf16.gmra.mxu3 %vm800_vm5, %v2491_v35  ;;  %v2370_v17 = vsel %vm6261_vm4, %v5861_v54, %v2369_v32  ;;  %v1695_v37 = vor.u32 %v1694_v19, %v1691_v18  ;;  %v1713_v54 = vshrl.u32 %v1367_v42, 16  ;;  %v302_v32 = vsel %vm6501_vm7, 0, %v301_v47  ;;  %v6849_v19 = vld [vmem:[#allocation2 + $0xf4] sm:$0xf] }
 0x14b   : > { %v1885_v56 = vpop.f32.mrf.mxu2  ;;  %v1169_v57 = vpop.f32.mrf.mxu1  ;;  %v2472_v58 = vunpack.c.l.b16 %v2370_v17  ;;  %v1710_v61 = vrot.slane %v1708_v40, 5  ;;  %v5862_v27 = vrot.slane %v2381_v3, 11  ;;  %303 = vst [vmem:[#allocation2 + $0xfc] sm:$0x1] %v302_v32  ;;  %v1732_v45 = vshll.u32 %v1369_v29, 16 }
 0x14c   : > { %v1988_v1 = vadd.f32 %v1956_v50, %v1885_v56  ;;  %v1269_v4 = vadd.f32 %v1237_v60, %v1169_v57  ;;  %v1696_v57 = vrot.slane %v1695_v37, 4  ;;  %v1706_v60 = vrot.slane %v1705_v39, 4  ;;  %v2088_v37 = vld [vmem:[#allocation2 + $0xf0] sm:$0x8] }
 0x14d   : > { %v2641_v8 = vld [vmem:[#allocation3 + $0x28] sm:$0xff]  ;;  %v2571_v9 = vpop.f32.mrf.mxu3  ;;  %v2492_v49 = vpack.c.b16 %v2473_v28, %v2472_v58  ;;  %v2417_v39 = vshrl.u32 %v2090_v26, 16  ;;  %v2403_v46 = vshrl.u32 %v2088_v37, 16  ;;  %v2420_v32 = vshll.u32 %v2090_v26, 16 }
 0x14e   : > { %v2673_v59 = vadd.f32 %v2641_v8, %v2568_v34  ;;  %2020 = vst.msk [vmem:[#allocation3 + $0x30] sm:$0xff] %vm942_vm11, %v1988_v1  ;;  %5828 = vmatmul.msk.bf16.gmra.mxu1 %vm800_vm5, %v6127_v52  ;;  %v6818_v33 = vpop.f32.mrf.mxu0  ;;  %v1957_v24 = vld [vmem:[#allocation3 + $0x38] sm:$0xff]  ;;  %v1806_v34 = vpack.c.b16 %v1787_v13, %v1786_v12  ;;  %v2398_v52 = vshll.u32 %v2087_v55, 16  ;;  %v1716_v1 = vshll.u32 %v1367_v42, 16 }
 0x14f   : > { %v2990_v16 = vld [vmem:[#allocation3 + $0x20] sm:$0xff]  ;;  %1301 = vst.msk [vmem:[#allocation3 + $0x40] sm:$0xff] %vm942_vm11, %v1269_v4  ;;  %v6128_v4 = vld [vmem:[#allocation2 + $0xd4] sm:$0xff]  ;;  %v1726_v8 = vshrl.u32 %v1368_v23, 16  ;;  %v1715_v13 = vrot.slane %v1713_v54, 4  ;;  %v1701_v2 = vsel %vm6536_vm10, %v1696_v57, %v6827_v21  ;;  %v1711_v18 = vsel %vm6536_vm10, %v1706_v60, %v1710_v61 }
 0x150   : > { %2705 = vst.msk [vmem:[#allocation3 + $0x28] sm:$0xff] %vm942_vm11, %v2673_v59  ;;  %v3022_v20 = vadd.f32 %v2990_v16, %v6790_v0  ;;  %v2400_v6 = vor.u32 %v2398_v52, %v2397_v51  ;;  %v1239_v59 = vld [vmem:[#allocation3 + $0x50] sm:$0xff]  ;;  %v203_v55 = vld [vmem:[%s6232_s19 + $0x7c] sm:$0xf]  ;;  %v1718_v25 = vrot.slane %v1716_v1, 5  ;;  %v2419_v54 = vrot.slane %v2417_v39, 7 }
 0x151   : > { %5958 = vmatmul.msk.bf16.gmra.mxu0 %vm800_vm5, %v6142_v11  ;;  %v6143_v12 = vld [vmem:[#allocation2 + $0xd4] sm:$0xff]  ;;  %348 = vst.msk [vmem:[#allocation2 + $0x108] sm:$0xf] %vm204_vm1, %v203_v55  ;;  %v6886_v55 = vld [vmem:[#allocation2 + $0x104] sm:$0xf] }
 0x152   : > { %3054 = vst.msk [vmem:[#allocation3 + $0x20] sm:$0xff] %vm942_vm11, %v3022_v20  ;;  %v2401_v28 = vsel %vm6261_vm4, %v2393_v5, %v2400_v6  ;;  %v1240_v51 = vld [vmem:[#allocation3 + $0x58] sm:$0xff]  ;;  %v1734_v5 = vrot.slane %v1732_v45, 5  ;;  %v5863_v6 = vrot.slane %v2403_v46, 11  ;;  %v2430_v39 = vshrl.u32 %v6886_v55, 16 }
 0x153   : > { %v1887_v31 = vpop.f32.mrf.mxu2  ;;  %v1171_v35 = vpop.f32.mrf.mxu1  ;;  %v1371_v57 = vld [vmem:[#allocation2 + $0xf8] sm:$0xf]  ;;  %v3082_v45 = vld [vmem:[#allocation2 + $0x14] sm:$0xf] }
 0x154   : > { %v1989_v0 = vadd.f32 %v1957_v24, %v1887_v31  ;;  %v1270_v38 = vadd.f32 %v1238_v36, %v1171_v35  ;;  %v2392_v24 = vsel %vm6261_vm4, %v5862_v27, %v2391_v63  ;;  %v1728_v31 = vrot.slane %v1726_v8, 4 }
 0x155   : > { %v2642_v43 = vld [vmem:[#allocation3 + $0x30] sm:$0xff]  ;;  %v2573_v44 = vpop.f32.mrf.mxu3  ;;  %v1788_v35 = vunpack.c.l.b16 %v1701_v2  ;;  %v1789_v36 = vunpack.c.l.b16 %v1711_v18  ;;  %v2474_v42 = vunpack.c.l.b16 %v2392_v24  ;;  %v6129_v2 = vld [vmem:[#allocation2 + $0xe4] sm:$0xff] }
 0x156   : > { %v2674_v48 = vadd.f32 %v2642_v43, %v2571_v9  ;;  %2021 = vst.msk [vmem:[#allocation3 + $0x38] sm:$0xff] %vm942_vm11, %v1989_v0  ;;  %v6833_v50 = vpop.f32.mrf.mxu0  ;;  %v1958_v62 = vld [vmem:[#allocation3 + $0x40] sm:$0xff]  ;;  %v2408_v0 = vshrl.u32 %v6849_v19, 16  ;;  %v2475_v43 = vunpack.c.l.b16 %v2401_v28 }
 0x157   : > { %v2991_v53 = vld [vmem:[#allocation3 + $0x28] sm:$0xff]  ;;  %1302 = vst.msk [vmem:[#allocation3 + $0x48] sm:$0xff] %vm942_vm11, %v1270_v38  ;;  %v1241_v24 = vld [vmem:[#allocation3 + $0x60] sm:$0xff] }
 0x158   : > { %2706 = vst.msk [vmem:[#allocation3 + $0x30] sm:$0xff] %vm942_vm11, %v2674_v48  ;;  %v3023_v56 = vadd.f32 %v2991_v53, %v6801_v41  ;;  %5845 = vmatmul.msk.bf16.gmra.mxu2 %vm800_vm5, %v1806_v34  ;;  %v1722_v41 = vshll.u32 %v1368_v23, 16  ;;  %v1807_v48 = vpack.c.b16 %v1789_v36, %v1788_v35  ;;  %v2410_v52 = vrot.slane %v2408_v0, 7  ;;  %v1372_v35 = vld [vmem:[#allocation2 + $0xfc] sm:$0x1]  ;;  %v6144_v0 = vld [vmem:[#allocation2 + $0xe4] sm:$0xff] }
 0x15a   : > { %3055 = vst.msk [vmem:[#allocation3 + $0x28] sm:$0xff] %vm942_vm11, %v3023_v56  ;;  %5878 = vmatmul.msk.bf16.gmra.mxu3 %vm800_vm5, %v2492_v49  ;;  %v6862_v30 = vrot.slane %v1722_v41, 5  ;;  %v1370_v56 = vld [vmem:[#allocation2 + $0xf4] sm:$0xf]  ;;  %v2415_v14 = vrot.slane %v2410_v52, 4 }
 0x15b   : > { %v1890_v9 = vpop.f32.mrf.mxu2  ;;  %v1174_v11 = vpop.f32.mrf.mxu1  ;;  %v1737_v8 = vshrl.u32 %v1370_v56, 16 }
 0x15c   : > { %v1990_v16 = vadd.f32 %v1958_v62, %v1890_v9  ;;  %v1271_v17 = vadd.f32 %v1239_v59, %v1174_v11  ;;  %v1729_v3 = vor.u32 %v1728_v31, %v6862_v30  ;;  %v2493_v62 = vpack.c.b16 %v2475_v43, %v2474_v42 }
 0x15d   : > { %v2643_v20 = vld [vmem:[#allocation3 + $0x38] sm:$0xff]  ;;  %v2576_v22 = vpop.f32.mrf.mxu3  ;;  %v1740_v9 = vshll.u32 %v1370_v56, 16  ;;  %v1746_v11 = vshll.u32 %v1371_v57, 16  ;;  %v1750_v59 = vshrl.u32 %v1371_v57, 16  ;;  %v2432_v56 = vrot.slane %v2430_v39, 7 }
 0x15e   : > { %v2675_v58 = vadd.f32 %v2643_v20, %v2573_v44  ;;  %2022 = vst.msk [vmem:[#allocation3 + $0x40] sm:$0xff] %vm942_vm11, %v1990_v16  ;;  %5829 = vmatmul.msk.bf16.gmra.mxu1 %vm800_vm5, %v6128_v4  ;;  %v6858_v21 = vpop.f32.mrf.mxu0  ;;  %v1959_v40 = vld [vmem:[#allocation3 + $0x48] sm:$0xff]  ;;  %v1719_v44 = vor.u32 %v1718_v25, %v1715_v13  ;;  %v1730_v4 = vrot.slane %v1729_v3, 4  ;;  %v2422_v16 = vor.u32 %v2420_v32, %v2419_v54 }
 0x15f   : > { %v2992_v34 = vld [vmem:[#allocation3 + $0x30] sm:$0xff]  ;;  %1303 = vst.msk [vmem:[#allocation3 + $0x50] sm:$0xff] %vm942_vm11, %v1271_v17  ;;  %v1739_v25 = vrot.slane %v1737_v8, 4  ;;  %v1742_v26 = vrot.slane %v1740_v9, 5  ;;  %v1752_v28 = vrot.slane %v1750_v59, 4  ;;  %v2433_v54 = vshll.u32 %v6886_v55, 16 }
 0x160   : > { %2707 = vst.msk [vmem:[#allocation3 + $0x38] sm:$0xff] %vm942_vm11, %v2675_v58  ;;  %v3024_v38 = vadd.f32 %v2992_v34, %v6818_v33  ;;  %v2411_v33 = vshll.u32 %v6849_v19, 16  ;;  %v1720_v27 = vrot.slane %v1719_v44, 4  ;;  %v1735_v19 = vsel %vm6536_vm10, %v1730_v4, %v1734_v5 }
 0x161   : > { %5959 = vmatmul.msk.bf16.gmra.mxu0 %vm800_vm5, %v6143_v12  ;;  %v6890_v58 = vrot.slane %v1746_v11, 5  ;;  %v2423_v34 = vsel %vm6261_vm4, %v2415_v14, %v2422_v16  ;;  %v1791_v44 = vunpack.c.l.b16 %v1735_v19 }
 0x162   : > { %3056 = vst.msk [vmem:[#allocation3 + $0x30] sm:$0xff] %vm942_vm11, %v3024_v38  ;;  %v2413_v13 = vor.u32 %v2411_v33, %v2410_v52  ;;  %v1725_v18 = vsel %vm6536_vm10, %v1720_v27, %v6862_v30  ;;  %v2091_v38 = vld [vmem:[#allocation2 + $0x100] sm:$0x8]  ;;  %v3083_v52 = vld [vmem:[#allocation2 + $0x18] sm:$0xf] }
 0x163   : > { %v1892_v47 = vpop.f32.mrf.mxu2  ;;  %v1176_v49 = vpop.f32.mrf.mxu1  ;;  %v1790_v43 = vunpack.c.l.b16 %v1725_v18  ;;  %v3140_v27 = vshll.u32 %v3083_v52, 16 }
 0x164   : > { %v1991_v53 = vadd.f32 %v1959_v40, %v1892_v47  ;;  %v1272_v23 = vadd.f32 %v1240_v51, %v1176_v49  ;;  %v2414_v30 = vsel %vm6261_vm4, %v5863_v6, %v2413_v13  ;;  %v1743_v49 = vor.u32 %v1742_v26, %v1739_v25  ;;  %v1242_v6 = vld [vmem:[#allocation3 + $0x68] sm:$0xff]  ;;  %v3084_v26 = vld [vmem:[#allocation2 + $0x1c] sm:$0x1] }
 0x165   : > { %v2644_v60 = vld [vmem:[#allocation3 + $0x40] sm:$0xff]  ;;  %v2578_v61 = vpop.f32.mrf.mxu3  ;;  %v2476_v47 = vunpack.c.l.b16 %v2414_v30  ;;  %v1753_v51 = vor.u32 %v1752_v28, %v6890_v58  ;;  %v1808_v5 = vpack.c.b16 %v1791_v44, %v1790_v43 }
 0x166   : > { %v2676_v63 = vadd.f32 %v2644_v60, %v2576_v22  ;;  %2023 = vst.msk [vmem:[#allocation3 + $0x48] sm:$0xff] %vm942_vm11, %v1991_v53  ;;  %v6873_v1 = vpop.f32.mrf.mxu0  ;;  %v1960_v17 = vld [vmem:[#allocation3 + $0x50] sm:$0xff]  ;;  %v1756_v53 = vshll.u32 %v1372_v35, 16  ;;  %v1744_v8 = vrot.slane %v1743_v49, 4 }
 0x167   : > { %v2993_v41 = vld [vmem:[#allocation3 + $0x38] sm:$0xff]  ;;  %1304 = vst.msk [vmem:[#allocation3 + $0x58] sm:$0xff] %vm942_vm11, %v1272_v23  ;;  %v2425_v23 = vshrl.u32 %v2091_v38, 16  ;;  %v1754_v9 = vrot.slane %v1753_v51, 4  ;;  %v6931_v38 = vld [vmem:[#allocation2 + $0x24] sm:$0xf] }
 0x168   : > { %2708 = vst.msk [vmem:[#allocation3 + $0x40] sm:$0xff] %vm942_vm11, %v2676_v63  ;;  %v3025_v12 = vadd.f32 %v2993_v41, %v6833_v50  ;;  %5846 = vmatmul.msk.bf16.gmra.mxu2 %vm800_vm5, %v1807_v48  ;;  %v6888_v50 = vld [vmem:[#allocation2 + $0x108] sm:$0xf]  ;;  %v2477_v48 = vunpack.c.l.b16 %v2423_v34  ;;  %v3144_v63 = vshrl.u32 %v3083_v52, 16  ;;  %v1749_v30 = vsel %vm6536_vm10, %v1744_v8, %v6890_v58 }
 0x169   : > { %v2439_v40 = vshrl.u32 %v6888_v50, 16  ;;  %v2442_v60 = vshll.u32 %v6888_v50, 16  ;;  %v5864_v13 = vrot.slane %v2425_v23, 11  ;;  %v6933_v58 = vld [vmem:[#allocation2 + $0x28] sm:$0xf]  ;;  %v3855_v23 = vshrl.u32 %v6931_v38, 16 }
 0x16a   : > { %3057 = vst.msk [vmem:[#allocation3 + $0x38] sm:$0xff] %vm942_vm11, %v3025_v12  ;;  %5879 = vmatmul.msk.bf16.gmra.mxu3 %vm800_vm5, %v2493_v62  ;;  %v3134_v62 = vshll.u32 %v3082_v45, 16  ;;  %v2494_v41 = vpack.c.b16 %v2477_v48, %v2476_v47  ;;  %v1758_v12 = vrot.slane %v1756_v53, 5  ;;  %v3085_v47 = vld [vmem:[#allocation2 + $0x24] sm:$0xf]  ;;  %v6145_v53 = vld [vmem:[#allocation2 + $0xf4] sm:$0xff] }
 0x16b   : > { %v1895_v20 = vpop.f32.mrf.mxu2  ;;  %v1179_v22 = vpop.f32.mrf.mxu1  ;;  %v2441_v57 = vrot.slane %v2439_v40, 7  ;;  %v3086_v48 = vld [vmem:[#allocation2 + $0x28] sm:$0xf] }
 0x16c   : > { %v1992_v29 = vadd.f32 %v1960_v17, %v1895_v20  ;;  %v1273_v31 = vadd.f32 %v1241_v24, %v1179_v22  ;;  %v2435_v17 = vor.u32 %v2433_v54, %v2432_v56  ;;  %v3136_v20 = vrot.slane %v3134_v62, 5  ;;  %v3801_v62 = vld [vmem:[#allocation2 + $0x20] sm:$0x8] }
 0x16d   : > { %v2645_v36 = vld [vmem:[#allocation3 + $0x48] sm:$0xff]  ;;  %v2581_v37 = vpop.f32.mrf.mxu3  ;;  %v2444_v18 = vor.u32 %v2442_v60, %v2441_v57  ;;  %v6913_v22 = vrot.slane %v3140_v27, 5  ;;  %v3146_v24 = vrot.slane %v3144_v63, 4  ;;  %v1759_v34 = vsel %vm6536_vm10, %v1754_v9, %v1758_v12 }
 0x16e   : > { %v2677_v42 = vadd.f32 %v2645_v36, %v2578_v61  ;;  %2024 = vst.msk [vmem:[#allocation3 + $0x50] sm:$0xff] %vm942_vm11, %v1992_v29  ;;  %5830 = vmatmul.msk.bf16.gmra.mxu1 %vm800_vm5, %v6129_v2  ;;  %v6900_v3 = vpop.f32.mrf.mxu0  ;;  %v1961_v32 = vld [vmem:[#allocation3 + $0x58] sm:$0xff]  ;;  %v3131_v61 = vshrl.u32 %v3082_v45, 16  ;;  %v2437_v2 = vrot.slane %v2432_v56, 4  ;;  %v2436_v35 = vsel %vm6261_vm4, %v5864_v13, %v2435_v17  ;;  %v4837_v13 = vld [vmem:[#allocation2 + $0x24] sm:$0xf] }
 0x16f   : > { %v2994_v46 = vld [vmem:[#allocation3 + $0x40] sm:$0xff]  ;;  %1305 = vst.msk [vmem:[#allocation3 + $0x60] sm:$0xff] %vm942_vm11, %v1273_v31  ;;  %v6130_v31 = vld [vmem:[#allocation2 + $0xf4] sm:$0xff]  ;;  %v6935_v45 = vunpack.c.l.b16 %v1749_v30  ;;  %v2478_v52 = vunpack.c.l.b16 %v2436_v35  ;;  %v3864_v54 = vshrl.u32 %v6933_v58, 16  ;;  %v3155_v63 = vshrl.u32 %v3085_v47, 16 }
 0x170   : > { %2709 = vst.msk [vmem:[#allocation3 + $0x48] sm:$0xff] %vm942_vm11, %v2677_v42  ;;  %v3026_v33 = vadd.f32 %v2994_v46, %v6858_v21  ;;  %v3133_v19 = vrot.slane %v3131_v61, 4  ;;  %v1243_v42 = vld [vmem:[#allocation3 + $0x70] sm:$0xff]  ;;  %v6937_v46 = vunpack.c.l.b16 %v1759_v34  ;;  %v3858_v12 = vshll.u32 %v6931_v38, 16 }
 0x171   : > { %5960 = vmatmul.msk.bf16.gmra.mxu0 %vm800_vm5, %v6144_v0  ;;  %v3150_v0 = vshll.u32 %v3084_v26, 16  ;;  %v3867_v17 = vshll.u32 %v6933_v58, 16  ;;  %v4886_v30 = vshrl.u32 %v4837_v13, 16 }
 0x172   : > { %3058 = vst.msk [vmem:[#allocation3 + $0x40] sm:$0xff] %vm942_vm11, %v3026_v33  ;;  %v3137_v36 = vor.u32 %v3136_v20, %v3133_v19  ;;  %v3157_v20 = vrot.slane %v3155_v63, 4 }
 0x173   : > { %v1897_v4 = vpop.f32.mrf.mxu2  ;;  %v1181_v21 = vpop.f32.mrf.mxu1  ;;  %v3152_v61 = vrot.slane %v3150_v0, 5  ;;  %v6961_v0 = vld [vmem:[#allocation2 + $0x34] sm:$0xf] }
 0x174   : > { %v1993_v11 = vadd.f32 %v1961_v32, %v1897_v4  ;;  %v1274_v59 = vadd.f32 %v1242_v6, %v1181_v21  ;;  %v3138_v57 = vrot.slane %v3137_v36, 4  ;;  %v3158_v4 = vshll.u32 %v3085_v47, 16 }
 0x175   : > { %v2646_v14 = vld [vmem:[#allocation3 + $0x50] sm:$0xff]  ;;  %v2583_v16 = vpop.f32.mrf.mxu3  ;;  %v3168_v21 = vshrl.u32 %v3086_v48, 16  ;;  %v3880_v63 = vshll.u32 %v6961_v0, 16 }
 0x176   : > { %v2678_v55 = vadd.f32 %v2646_v14, %v2581_v37  ;;  %2025 = vst.msk [vmem:[#allocation3 + $0x58] sm:$0xff] %vm942_vm11, %v1993_v11  ;;  %v6911_v50 = vpop.f32.mrf.mxu0  ;;  %v1962_v29 = vld [vmem:[#allocation3 + $0x60] sm:$0xff]  ;;  %v3147_v37 = vor.u32 %v3146_v24, %v6913_v22  ;;  %v3850_v11 = vshrl.u32 %v3801_v62, 16  ;;  %v3143_v14 = vsel %vm6536_vm10, %v3138_v57, %v6913_v22 }
 0x177   : > { %v2995_v25 = vld [vmem:[#allocation3 + $0x48] sm:$0xff]  ;;  %1306 = vst.msk [vmem:[#allocation3 + $0x68] sm:$0xff] %vm942_vm11, %v1274_v59  ;;  %v3857_v59 = vrot.slane %v3855_v23, 7  ;;  %v3160_v24 = vrot.slane %v3158_v4, 5  ;;  %v3170_v26 = vrot.slane %v3168_v21, 4  ;;  %v4889_v22 = vshll.u32 %v4837_v13, 16 }
 0x178   : > { %2710 = vst.msk [vmem:[#allocation3 + $0x50] sm:$0xff] %vm942_vm11, %v2678_v55  ;;  %v3027_v28 = vadd.f32 %v2995_v25, %v6873_v1  ;;  %5847 = vmatmul.msk.bf16.gmra.mxu2 %vm800_vm5, %v1808_v5  ;;  %v2445_v1 = vsel %vm6261_vm4, %v2437_v2, %v2444_v18  ;;  %v3148_v60 = vrot.slane %v3147_v37, 4  ;;  %v3164_v5 = vshll.u32 %v3086_v48, 16  ;;  %v4838_v2 = vld [vmem:[#allocation2 + $0x28] sm:$0xf]  ;;  %v1244_v55 = vld [vmem:[#allocation3 + $0x78] sm:$0xff] }
 0x179   : > { %v2479_v33 = vunpack.c.l.b16 %v2445_v1  ;;  %v5980_v1 = vrot.slane %v3850_v11, 11  ;;  %v3860_v36 = vor.u32 %v3858_v12, %v3857_v59  ;;  %v3862_v37 = vrot.slane %v3857_v59, 4  ;;  %v3804_v48 = vld [vmem:[#allocation2 + $0x30] sm:$0x8]  ;;  %v4839_v4 = vld [vmem:[#allocation2 + $0x2c] sm:$0x1] }
 0x17a   : > { %3059 = vst.msk [vmem:[#allocation3 + $0x48] sm:$0xff] %vm942_vm11, %v3027_v28  ;;  %5880 = vmatmul.msk.bf16.gmra.mxu3 %vm800_vm5, %v2494_v41  ;;  %v1809_v41 = vpack.c.b16 %v6937_v46, %v6935_v45  ;;  %v6959_v25 = vrot.slane %v3164_v5, 5  ;;  %v4895_v38 = vshll.u32 %v4838_v2, 16  ;;  %v3161_v45 = vor.u32 %v3160_v24, %v3157_v20  ;;  %v3088_v59 = vld [vmem:[#allocation2 + $0x34] sm:$0xf] }
 0x17b   : > { %v1900_v39 = vpop.f32.mrf.mxu2  ;;  %v1184_v40 = vpop.f32.mrf.mxu1  ;;  %v2495_v9 = vpack.c.b16 %v2479_v33, %v2478_v52  ;;  %v6971_v52 = vld [vmem:[#allocation2 + $0x38] sm:$0xf]  ;;  %v3877_v33 = vshrl.u32 %v6961_v0, 16  ;;  %v4891_v23 = vrot.slane %v4889_v22, 5 }
 0x17c   : > { %v1994_v43 = vadd.f32 %v1962_v29, %v1900_v39  ;;  %v1275_v44 = vadd.f32 %v1243_v42, %v1184_v40  ;;  %v3516_v40 = vunpack.c.l.b16 %v3143_v14  ;;  %v3171_v46 = vor.u32 %v3170_v26, %v6959_v25  ;;  %v3089_v26 = vld [vmem:[#allocation2 + $0x38] sm:$0xf] }
 0x17d   : > { %v2647_v49 = vld [vmem:[#allocation3 + $0x58] sm:$0xff]  ;;  %v2586_v51 = vpop.f32.mrf.mxu3  ;;  %v6976_v57 = vrot.slane %v4895_v38, 5  ;;  %v3886_v11 = vshrl.u32 %v6971_v52, 16 }
 0x17e   : > { %v2679_v32 = vadd.f32 %v2647_v49, %v2583_v16  ;;  %2026 = vst.msk [vmem:[#allocation3 + $0x60] sm:$0xff] %vm942_vm11, %v1994_v43  ;;  %5831 = vmatmul.msk.bf16.gmra.mxu1 %vm800_vm5, %v6130_v31  ;;  %v6943_v56 = vpop.f32.mrf.mxu0  ;;  %v1963_v8 = vld [vmem:[#allocation3 + $0x68] sm:$0xff]  ;;  %v3866_v16 = vrot.slane %v3864_v54, 7  ;;  %v4899_v49 = vshrl.u32 %v4838_v2, 16 }
 0x17f   : > { %v2996_v27 = vld [vmem:[#allocation3 + $0x50] sm:$0xff]  ;;  %1307 = vst.msk [vmem:[#allocation3 + $0x70] sm:$0xff] %vm942_vm11, %v1275_v44  ;;  %v3087_v31 = vld [vmem:[#allocation2 + $0x2c] sm:$0x1]  ;;  %v6146_v2 = vld [vmem:[#allocation2 + $0x104] sm:$0xff] }
 0x180   : > { %2711 = vst.msk [vmem:[#allocation3 + $0x58] sm:$0xff] %vm942_vm11, %v2679_v32  ;;  %v3028_v6 = vadd.f32 %v2996_v27, %v6900_v3  ;;  %v3153_v3 = vsel %vm6536_vm10, %v3148_v60, %v3152_v61  ;;  %v3869_v43 = vor.u32 %v3867_v17, %v3866_v16  ;;  %v3174_v47 = vshll.u32 %v3087_v31, 16 }
 0x181   : > { %5961 = vmatmul.msk.bf16.gmra.mxu0 %vm800_vm5, %v6145_v53  ;;  %v3517_v42 = vunpack.c.l.b16 %v3153_v3  ;;  %v4888_v53 = vrot.slane %v4886_v30, 4  ;;  %v3861_v32 = vsel %vm6261_vm4, %v5980_v1, %v3860_v36  ;;  %v4901_v60 = vrot.slane %v4899_v49, 4 }
 0x182   : > { %3060 = vst.msk [vmem:[#allocation3 + $0x50] sm:$0xff] %vm942_vm11, %v3028_v6  ;;  %v3870_v62 = vsel %vm6261_vm4, %v3862_v37, %v3869_v43  ;;  %v3872_v27 = vshrl.u32 %v3804_v48, 16  ;;  %v3162_v6 = vrot.slane %v3161_v45, 4  ;;  %v4203_v17 = vunpack.c.l.b16 %v3861_v32  ;;  %v1246_v48 = vld [vmem:[#allocation3 + $0x88] sm:$0xff] }
 0x183   : > { %v1902_v18 = vpop.f32.mrf.mxu2  ;;  %v1186_v19 = vpop.f32.mrf.mxu1  ;;  %v3548_v61 = vpack.c.b16 %v3517_v42, %v3516_v40  ;;  %v4892_v14 = vor.u32 %v4891_v23, %v4888_v53  ;;  %v4204_v20 = vunpack.c.l.b16 %v3870_v62  ;;  %v3188_v40 = vshll.u32 %v3089_v26, 16  ;;  %v4841_v53 = vld [vmem:[#allocation2 + $0x38] sm:$0xf] }
 0x184   : > { %v1995_v28 = vadd.f32 %v1963_v8, %v1902_v18  ;;  %v1276_v29 = vadd.f32 %v1244_v55, %v1186_v19  ;;  %v3176_v8 = vrot.slane %v3174_v47, 5  ;;  %v4902_v18 = vor.u32 %v4901_v60, %v6976_v57 }
 0x185   : > { %v2648_v34 = vld [vmem:[#allocation3 + $0x60] sm:$0xff]  ;;  %v2588_v35 = vpop.f32.mrf.mxu3  ;;  %v4905_v19 = vshll.u32 %v4839_v4, 16  ;;  %v3167_v30 = vsel %vm6536_vm10, %v3162_v6, %v6959_v25  ;;  %v6995_v22 = vrot.slane %v3872_v27, 11  ;;  %v4893_v0 = vrot.slane %v4892_v14, 4 }
 0x186   : > { %v2680_v58 = vadd.f32 %v2648_v34, %v2586_v51  ;;  %2027 = vst.msk [vmem:[#allocation3 + $0x68] sm:$0xff] %vm942_vm11, %v1995_v28  ;;  %v6964_v39 = vpop.f32.mrf.mxu0  ;;  %v1964_v54 = vld [vmem:[#allocation3 + $0x70] sm:$0xff]  ;;  %v3179_v28 = vshrl.u32 %v3088_v59, 16  ;;  %v3888_v34 = vrot.slane %v3886_v11, 7  ;;  %v4903_v25 = vrot.slane %v4902_v18, 4 }
 0x187   : > { %v2997_v44 = vld [vmem:[#allocation3 + $0x58] sm:$0xff]  ;;  %1308 = vst.msk [vmem:[#allocation3 + $0x78] sm:$0xff] %vm942_vm11, %v1276_v29  ;;  %v3182_v29 = vshll.u32 %v3088_v59, 16  ;;  %v3192_v42 = vshrl.u32 %v3089_v26, 16  ;;  %v4235_v43 = vpack.c.b16 %v4204_v20, %v4203_v17  ;;  %v7007_v49 = vunpack.c.l.b16 %v3167_v30  ;;  %v7030_v59 = vld [vmem:[#allocation2 + $0x40] sm:$0x8] }
 0x188   : > { %2712 = vst.msk [vmem:[#allocation3 + $0x60] sm:$0xff] %vm942_vm11, %v2680_v58  ;;  %v3029_v51 = vadd.f32 %v2997_v44, %v6911_v50  ;;  %5848 = vmatmul.msk.bf16.gmra.mxu2 %vm800_vm5, %v1809_v41  ;;  %v1245_v50 = vld [vmem:[#allocation3 + $0x80] sm:$0xff]  ;;  %v3172_v41 = vrot.slane %v3171_v46, 4  ;;  %v4907_v58 = vrot.slane %v4905_v19, 5  ;;  %v3181_v44 = vrot.slane %v3179_v28, 4 }
 0x189   : > { %v3184_v45 = vrot.slane %v3182_v29, 5  ;;  %v4898_v60 = vsel %vm6536_vm10, %v4893_v0, %v6976_v57  ;;  %v7023_v4 = vrot.slane %v3188_v40, 5  ;;  %v3091_v40 = vld [vmem:[#allocation2 + $0x44] sm:$0xf] }
 0x18a   : > { %3061 = vst.msk [vmem:[#allocation3 + $0x58] sm:$0xff] %vm942_vm11, %v3029_v51  ;;  %5881 = vmatmul.msk.bf16.gmra.mxu3 %vm800_vm5, %v2495_v9  ;;  %v6984_v9 = vrot.slane %v3877_v33, 7  ;;  %v3177_v36 = vsel %vm6536_vm10, %v3172_v41, %v3176_v8  ;;  %v6147_v8 = vld [vmem:[#allocation2 + $0x24] sm:$0xff]  ;;  %v5271_v26 = vunpack.c.l.b16 %v4898_v60 }
 0x18b   : > { %v1905_v5 = vpop.f32.mrf.mxu2  ;;  %v1189_v21 = vpop.f32.mrf.mxu1  ;;  %v7009_v51 = vunpack.c.l.b16 %v3177_v36  ;;  %v3185_v57 = vor.u32 %v3184_v45, %v3181_v44 }
 0x18c   : > { %v1996_v12 = vadd.f32 %v1964_v54, %v1905_v5  ;;  %v1277_v13 = vadd.f32 %v1245_v50, %v1189_v21  ;;  %v7003_v37 = vor.u32 %v3880_v63, %v6984_v9  ;;  %v3090_v50 = vld [vmem:[#allocation2 + $0x3c] sm:$0x1]  ;;  %v4908_v63 = vsel %vm6536_vm10, %v4903_v25, %v4907_v58  ;;  %v7025_v21 = vld [vmem:[#allocation2 + $0x48] sm:$0xf] }
 0x18d   : > { %v2649_v3 = vld [vmem:[#allocation3 + $0x68] sm:$0xff]  ;;  %v2591_v16 = vpop.f32.mrf.mxu3  ;;  %v3194_v5 = vrot.slane %v3192_v42, 4  ;;  %v3198_v14 = vshll.u32 %v3090_v50, 16  ;;  %v3549_v18 = vpack.c.b16 %v7009_v51, %v7007_v49  ;;  %v5272_v28 = vunpack.c.l.b16 %v4908_v63 }
 0x18e   : > { %v2681_v55 = vadd.f32 %v2649_v3, %v2588_v35  ;;  %2028 = vst.msk [vmem:[#allocation3 + $0x70] sm:$0xff] %vm942_vm11, %v1996_v12  ;;  %5964 = vmatmul.msk.bf16.vlgmr.msra.gmra.mxu1 %vm800_vm5, %v3548_v61  ;;  %v6989_v24 = vpop.f32.mrf.mxu0  ;;  %v3889_v35 = vshll.u32 %v6971_v52, 16  ;;  %v1965_v38 = vld [vmem:[#allocation3 + $0x78] sm:$0xff]  ;;  %v3884_v52 = vrot.slane %v6984_v9, 4  ;;  %v3883_v32 = vsel %vm6261_vm4, %v6995_v22, %v7003_v37  ;;  %v7019_v61 = vld [vmem:[#allocation2 + $0x44] sm:$0xf] }
 0x18f   : > { %v2998_v31 = vld [vmem:[#allocation3 + $0x60] sm:$0xff]  ;;  %1309 = vst.msk [vmem:[#allocation3 + $0x80] sm:$0xff] %vm942_vm11, %v1277_v13  ;;  %v4919_v13 = vshll.u32 %v4841_v53, 16  ;;  %v3899_v3 = vshrl.u32 %v7019_v61, 16  ;;  %v3195_v29 = vor.u32 %v3194_v5, %v7023_v4  ;;  %v4205_v22 = vunpack.c.l.b16 %v3883_v32  ;;  %v1247_v37 = vld [vmem:[#allocation3 + $0x90] sm:$0xff] }
 0x190   : > { %2713 = vst.msk [vmem:[#allocation3 + $0x68] sm:$0xff] %vm942_vm11, %v2681_v55  ;;  %v3030_v1 = vadd.f32 %v2998_v31, %v6943_v56  ;;  %v4840_v56 = vld [vmem:[#allocation2 + $0x34] sm:$0xf]  ;;  %v3891_v33 = vor.u32 %v3889_v35, %v3888_v34  ;;  %v4842_v31 = vld [vmem:[#allocation2 + $0x3c] sm:$0x1]  ;;  %v3894_v34 = vshrl.u32 %v7030_v59, 16 }
 0x191   : > { %5962 = vmatmul.msk.bf16.gmra.mxu0 %vm800_vm5, %v6146_v2  ;;  %v4910_v6 = vshrl.u32 %v4840_v56, 16  ;;  %v4913_v12 = vshll.u32 %v4840_v56, 16  ;;  %v4923_v2 = vshrl.u32 %v4841_v53, 16  ;;  %v7039_v55 = vrot.slane %v4919_v13, 5  ;;  %v3092_v56 = vld [vmem:[#allocation2 + $0x48] sm:$0xf] }
 0x192   : > { %3062 = vst.msk [vmem:[#allocation3 + $0x60] sm:$0xff] %vm942_vm11, %v3030_v1  ;;  %v3908_v35 = vshrl.u32 %v7025_v21, 16  ;;  %v3186_v0 = vrot.slane %v3185_v57, 4  ;;  %v7048_v25 = vrot.slane %v3899_v3, 7  ;;  %v4929_v45 = vshll.u32 %v4842_v31, 16 }
 0x193   : > { %v1907_v46 = vpop.f32.mrf.mxu2  ;;  %v1191_v47 = vpop.f32.mrf.mxu1  ;;  %v4912_v17 = vrot.slane %v4910_v6, 4  ;;  %v4915_v19 = vrot.slane %v4913_v12, 5  ;;  %v4925_v30 = vrot.slane %v4923_v2, 4  ;;  %v3196_v49 = vrot.slane %v3195_v29, 4  ;;  %v1248_v2 = vld [vmem:[#allocation3 + $0x98] sm:$0xff] }
 0x194   : > { %v1997_v23 = vadd.f32 %v1965_v38, %v1907_v46  ;;  %v1278_v54 = vadd.f32 %v1246_v48, %v1191_v47  ;;  %v3200_v38 = vrot.slane %v3198_v14, 5  ;;  %v5303_v48 = vpack.c.b16 %v5272_v28, %v5271_v26  ;;  %v3093_v31 = vld [vmem:[#allocation2 + $0x4c] sm:$0x1] }
 0x195   : > { %v2650_v62 = vld [vmem:[#allocation3 + $0x70] sm:$0xff]  ;;  %v2593_v27 = vpop.f32.mrf.mxu3  ;;  %v4916_v58 = vor.u32 %v4915_v19, %v4912_v17  ;;  %v4926_v44 = vor.u32 %v4925_v30, %v7039_v55  ;;  %v3902_v51 = vshll.u32 %v7019_v61, 16  ;;  %v3206_v32 = vshll.u32 %v3091_v40, 16 }
 0x196   : > { %v2682_v41 = vadd.f32 %v2650_v62, %v2591_v16  ;;  %2029 = vst.msk [vmem:[#allocation3 + $0x78] sm:$0xff] %vm942_vm11, %v1997_v23  ;;  %v7028_v11 = vpop.f32.mrf.mxu0  ;;  %v1966_v20 = vld [vmem:[#allocation3 + $0x80] sm:$0xff]  ;;  %v3910_v23 = vrot.slane %v3908_v35, 7  ;;  %v3191_v61 = vsel %vm6536_vm10, %v3186_v0, %v7023_v4  ;;  %v3212_v63 = vshll.u32 %v3092_v56, 16  ;;  %v6148_v0 = vld [vmem:[#allocation2 + $0x34] sm:$0xff] }
 0x197   : > { %v2999_v9 = vld [vmem:[#allocation3 + $0x68] sm:$0xff]  ;;  %1310 = vst.msk [vmem:[#allocation3 + $0x88] sm:$0xff] %vm942_vm11, %v1278_v54  ;;  %v3203_v54 = vshrl.u32 %v3091_v40, 16  ;;  %v4917_v62 = vrot.slane %v4916_v58, 4  ;;  %v4927_v5 = vrot.slane %v4926_v44, 4  ;;  %v3216_v6 = vshrl.u32 %v3092_v56, 16 }
 0x198   : > { %2714 = vst.msk [vmem:[#allocation3 + $0x70] sm:$0xff] %vm942_vm11, %v2682_v41  ;;  %v3031_v16 = vadd.f32 %v2999_v9, %v6964_v39  ;;  %5997 = vmatmul.msk.bf16.vlgmr.msra.gmra.mxu2 %vm800_vm5, %v4235_v43  ;;  %v3892_v39 = vsel %vm6261_vm4, %v3884_v52, %v3891_v33  ;;  %v3911_v52 = vshll.u32 %v7025_v21, 16  ;;  %v4931_v21 = vrot.slane %v4929_v45, 5  ;;  %v3810_v40 = vld [vmem:[#allocation2 + $0x50] sm:$0x8] }
 0x199   : > { %v4206_v50 = vunpack.c.l.b16 %v3892_v39  ;;  %v3904_v57 = vor.u32 %v3902_v51, %v7048_v25  ;;  %v3906_v59 = vrot.slane %v7048_v25, 4  ;;  %v3201_v4 = vsel %vm6536_vm10, %v3196_v49, %v3200_v38  ;;  %v7078_v39 = vld [vmem:[#allocation2 + $0x54] sm:$0xf]  ;;  %v7095_v51 = vld [vmem:[#allocation2 + $0x58] sm:$0xf] }
 0x19a   : > { %3063 = vst.msk [vmem:[#allocation3 + $0x68] sm:$0xff] %vm942_vm11, %v3031_v16  ;;  %6078 = vmatmul.msk.bf16.vlgmr.msra.gmra.mxu3 %vm800_vm5, %v6147_v8  ;;  %v5982_v8 = vrot.slane %v3894_v34, 11  ;;  %v3913_v12 = vor.u32 %v3911_v52, %v3910_v23  ;;  %v3205_v13 = vrot.slane %v3203_v54, 4  ;;  %v3208_v9 = vrot.slane %v3206_v32, 5  ;;  %v4845_v32 = vld [vmem:[#allocation2 + $0x4c] sm:$0x1] }
 0x19b   : > { %v1910_v1 = vpop.f32.mrf.mxu2  ;;  %v1194_v36 = vpop.f32.mrf.mxu1  ;;  %v4236_v3 = vpack.c.b16 %v4206_v50, %v4205_v22  ;;  %v7069_v16 = vunpack.c.l.b16 %v3191_v61  ;;  %v7074_v19 = vrot.slane %v3212_v63, 5  ;;  %v4932_v29 = vsel %vm6536_vm10, %v4927_v5, %v4931_v21 }
 0x19c   : > { %v1998_v42 = vadd.f32 %v1966_v20, %v1910_v1  ;;  %v1279_v43 = vadd.f32 %v1247_v37, %v1194_v36  ;;  %v4844_v20 = vld [vmem:[#allocation2 + $0x48] sm:$0xf]  ;;  %v3218_v30 = vrot.slane %v3216_v6, 4  ;;  %v3521_v35 = vunpack.c.l.b16 %v3201_v4  ;;  %v1249_v6 = vld [vmem:[#allocation3 + $0xa0] sm:$0xff] }
 0x19d   : > { %v2651_v46 = vld [vmem:[#allocation3 + $0x78] sm:$0xff]  ;;  %v2596_v47 = vpop.f32.mrf.mxu3  ;;  %v3905_v1 = vsel %vm6261_vm4, %v5982_v8, %v3904_v57  ;;  %v7087_v25 = vsel %vm6261_vm4, %v3906_v59, %v3913_v12  ;;  %v3209_v58 = vor.u32 %v3208_v9, %v3205_v13  ;;  %v5274_v45 = vunpack.c.l.b16 %v4932_v29 }
 0x19e   : > { %v2683_v33 = vadd.f32 %v2651_v46, %v2593_v27  ;;  %2030 = vst.msk [vmem:[#allocation3 + $0x80] sm:$0xff] %vm942_vm11, %v1998_v42  ;;  %5965 = vmatmul.msk.bf16.gmra.mxu1 %vm800_vm5, %v3549_v18  ;;  %v7055_v53 = vpop.f32.mrf.mxu0  ;;  %v1967_v41 = vld [vmem:[#allocation3 + $0x88] sm:$0xff]  ;;  %v4922_v18 = vsel %vm6536_vm10, %v4917_v62, %v7039_v55  ;;  %v4943_v42 = vshll.u32 %v4844_v20, 16  ;;  %v3222_v56 = vshll.u32 %v3093_v31, 16 }
 0x19f   : > { %v3000_v60 = vld [vmem:[#allocation3 + $0x70] sm:$0xff]  ;;  %1311 = vst.msk [vmem:[#allocation3 + $0x90] sm:$0xff] %vm942_vm11, %v1279_v43  ;;  %v5273_v44 = vunpack.c.l.b16 %v4922_v18  ;;  %v3921_v46 = vshrl.u32 %v7078_v39, 16  ;;  %v3219_v49 = vor.u32 %v3218_v30, %v7074_v19  ;;  %v4947_v52 = vshrl.u32 %v4844_v20, 16 }
 0x1a0   : > { %2715 = vst.msk [vmem:[#allocation3 + $0x78] sm:$0xff] %vm942_vm11, %v2683_v33  ;;  %v3032_v27 = vadd.f32 %v3000_v60, %v6989_v24  ;;  %v4843_v24 = vld [vmem:[#allocation2 + $0x44] sm:$0xf]  ;;  %v3550_v23 = vpack.c.b16 %v3521_v35, %v7069_v16  ;;  %v3916_v54 = vshrl.u32 %v3810_v40, 16  ;;  %v3210_v61 = vrot.slane %v3209_v58, 4 }
 0x1a1   : > { %6095 = vmatmul.msk.bf16.vlgmr.msra.gmra.mxu0 %vm800_vm5, %v5303_v48  ;;  %v4934_v36 = vshrl.u32 %v4843_v24, 16  ;;  %v4937_v55 = vshll.u32 %v4843_v24, 16  ;;  %v4207_v48 = vunpack.c.l.b16 %v3905_v1  ;;  %v7101_v62 = vrot.slane %v4943_v42, 5  ;;  %v3095_v24 = vld [vmem:[#allocation2 + $0x58] sm:$0xf] }
 0x1a2   : > { %3064 = vst.msk [vmem:[#allocation3 + $0x70] sm:$0xff] %vm942_vm11, %v3032_v27  ;;  %v4949_v63 = vrot.slane %v4947_v52, 4  ;;  %v3094_v27 = vld [vmem:[#allocation2 + $0x54] sm:$0xf]  ;;  %v3224_v8 = vrot.slane %v3222_v56, 5  ;;  %v7103_v57 = vrot.slane %v3921_v46, 7 }
 0x1a3   : > { %v1912_v14 = vpop.f32.mrf.mxu2  ;;  %v1196_v17 = vpop.f32.mrf.mxu1  ;;  %v4936_v60 = vrot.slane %v4934_v36, 4  ;;  %v4939_v50 = vrot.slane %v4937_v55, 5  ;;  %v3924_v59 = vshll.u32 %v7078_v39, 16  ;;  %v3220_v13 = vrot.slane %v3219_v49, 4  ;;  %v1250_v46 = vld [vmem:[#allocation3 + $0xa8] sm:$0xff] }
 0x1a4   : > { %v1999_v26 = vadd.f32 %v1967_v41, %v1912_v14  ;;  %v1280_v28 = vadd.f32 %v1248_v2, %v1196_v17  ;;  %v5304_v41 = vpack.c.b16 %v5274_v45, %v5273_v44  ;;  %v3930_v9 = vshrl.u32 %v7095_v51, 16  ;;  %v3096_v44 = vld [vmem:[#allocation2 + $0x5c] sm:$0x1]  ;;  %v4846_v45 = vld [vmem:[#allocation2 + $0x54] sm:$0xf] }
 0x1a5   : > { %v2652_v22 = vld [vmem:[#allocation3 + $0x80] sm:$0xff]  ;;  %v2598_v34 = vpop.f32.mrf.mxu3  ;;  %v4940_v17 = vor.u32 %v4939_v50, %v4936_v60  ;;  %v4953_v2 = vshll.u32 %v4845_v32, 16  ;;  %v3227_v16 = vshrl.u32 %v3094_v27, 16  ;;  %v3230_v18 = vshll.u32 %v3094_v27, 16 }
 0x1a6   : > { %v2684_v37 = vadd.f32 %v2652_v22, %v2596_v47  ;;  %2031 = vst.msk [vmem:[#allocation3 + $0x88] sm:$0xff] %vm942_vm11, %v1999_v26  ;;  %v7083_v38 = vpop.f32.mrf.mxu0  ;;  %v1968_v33 = vld [vmem:[#allocation3 + $0x90] sm:$0xff]  ;;  %v7114_v29 = vrot.slane %v3916_v54, 11  ;;  %v4950_v31 = vor.u32 %v4949_v63, %v7101_v62  ;;  %v7119_v39 = vor.u32 %v3924_v59, %v7103_v57  ;;  %v7139_v60 = vld [vmem:[#allocation2 + $0x64] sm:$0xf] }
 0x1a7   : > { %v3001_v43 = vld [vmem:[#allocation3 + $0x78] sm:$0xff]  ;;  %1312 = vst.msk [vmem:[#allocation3 + $0x98] sm:$0xff] %vm942_vm11, %v1280_v28  ;;  %v3215_v28 = vsel %vm6536_vm10, %v3210_v61, %v7074_v19  ;;  %v3928_v22 = vrot.slane %v7103_v57, 4  ;;  %v3240_v35 = vshrl.u32 %v3095_v24, 16  ;;  %v3225_v19 = vsel %vm6536_vm10, %v3220_v13, %v3224_v8 }
 0x1a8   : > { %2716 = vst.msk [vmem:[#allocation3 + $0x80] sm:$0xff] %vm942_vm11, %v2684_v37  ;;  %v3033_v47 = vadd.f32 %v3001_v43, %v7028_v11  ;;  %5998 = vmatmul.msk.bf16.gmra.mxu2 %vm800_vm5, %v4236_v3  ;;  %v4208_v11 = vunpack.c.l.b16 %v7087_v25  ;;  %v3932_v36 = vrot.slane %v3930_v9, 7  ;;  %v3933_v55 = vshll.u32 %v7095_v51, 16 }
 0x1a9   : > { %v4955_v25 = vrot.slane %v4953_v2, 5  ;;  %v3229_v58 = vrot.slane %v3227_v16, 4  ;;  %v3232_v40 = vrot.slane %v3230_v18, 5  ;;  %v4951_v43 = vrot.slane %v4950_v31, 4 }
 0x1aa   : > { %3065 = vst.msk [vmem:[#allocation3 + $0x78] sm:$0xff] %vm942_vm11, %v3033_v47  ;;  %6079 = vmatmul.msk.bf16.gmra.mxu3 %vm800_vm5, %v6148_v0  ;;  %v4941_v0 = vrot.slane %v4940_v17, 4  ;;  %v4237_v42 = vpack.c.b16 %v4208_v11, %v4207_v48  ;;  %v7129_v47 = vunpack.c.l.b16 %v3215_v28  ;;  %v7131_v49 = vunpack.c.l.b16 %v3225_v19 }
 0x1ab   : > { %v1915_v5 = vpop.f32.mrf.mxu2  ;;  %v1199_v21 = vpop.f32.mrf.mxu1  ;;  %v3242_v52 = vrot.slane %v3240_v35, 4  ;;  %v3927_v48 = vsel %vm6261_vm4, %v7114_v29, %v7119_v39  ;;  %v3935_v32 = vor.u32 %v3933_v55, %v3932_v36  ;;  %v3233_v63 = vor.u32 %v3232_v40, %v3229_v58  ;;  %v1251_v55 = vld [vmem:[#allocation3 + $0xb0] sm:$0xff] }
 0x1ac   : > { %v2000_v4 = vadd.f32 %v1968_v33, %v1915_v5  ;;  %v1281_v12 = vadd.f32 %v1249_v6, %v1199_v21  ;;  %v4847_v33 = vld [vmem:[#allocation2 + $0x58] sm:$0xf]  ;;  %v4946_v61 = vsel %vm6536_vm10, %v4941_v0, %v7101_v62  ;;  %v3246_v27 = vshll.u32 %v3096_v44, 16  ;;  %v7144_v5 = vld [vmem:[#allocation2 + $0x60] sm:$0x8] }
 0x1ad   : > { %v2653_v14 = vld [vmem:[#allocation3 + $0x88] sm:$0xff]  ;;  %v2601_v3 = vpop.f32.mrf.mxu3  ;;  %v4958_v21 = vshrl.u32 %v4846_v45, 16  ;;  %v4956_v59 = vsel %vm6536_vm10, %v4951_v43, %v4955_v25  ;;  %v4967_v13 = vshll.u32 %v4847_v33, 16  ;;  %v3551_v62 = vpack.c.b16 %v7131_v49, %v7129_v47  ;;  %v4848_v25 = vld [vmem:[#allocation2 + $0x5c] sm:$0x1] }
 0x1ae   : > { %v2685_v20 = vadd.f32 %v2653_v14, %v2598_v34  ;;  %2032 = vst.msk [vmem:[#allocation3 + $0x90] sm:$0xff] %vm942_vm11, %v2000_v4  ;;  %5966 = vmatmul.msk.bf16.gmra.mxu1 %vm800_vm5, %v3550_v23  ;;  %v7109_v26 = vpop.f32.mrf.mxu0  ;;  %v3236_v34 = vshll.u32 %v3095_v24, 16  ;;  %v1969_v37 = vld [vmem:[#allocation3 + $0x98] sm:$0xff]  ;;  %v7151_v4 = vld [vmem:[#allocation2 + $0x68] sm:$0xf]  ;;  %v3943_v14 = vshrl.u32 %v7139_v60, 16  ;;  %v5275_v2 = vunpack.c.l.b16 %v4946_v61 }
 0x1af   : > { %v3002_v30 = vld [vmem:[#allocation3 + $0x80] sm:$0xff]  ;;  %1313 = vst.msk [vmem:[#allocation3 + $0xa0] sm:$0xff] %vm942_vm11, %v1281_v12  ;;  %v4961_v12 = vshll.u32 %v4846_v45, 16  ;;  %v3938_v16 = vshrl.u32 %v7144_v5, 16  ;;  %v5276_v28 = vunpack.c.l.b16 %v4956_v59  ;;  %v3234_v29 = vrot.slane %v3233_v63, 4 }
 0x1b0   : > { %2717 = vst.msk [vmem:[#allocation3 + $0x88] sm:$0xff] %vm942_vm11, %v2685_v20  ;;  %v3034_v1 = vadd.f32 %v3002_v30, %v7055_v53  ;;  %v7133_v51 = vrot.slane %v3236_v34, 5  ;;  %v3952_v31 = vshrl.u32 %v7151_v4, 16  ;;  %v4971_v30 = vshrl.u32 %v4847_v33, 16 }
 0x1b1   : > { %6096 = vmatmul.msk.bf16.gmra.mxu0 %vm800_vm5, %v5304_v41  ;;  %v6149_v41 = vld [vmem:[#allocation2 + $0x44] sm:$0xff]  ;;  %v4963_v18 = vrot.slane %v4961_v12, 5  ;;  %v3248_v39 = vrot.slane %v3246_v27, 5  ;;  %v3946_v34 = vshll.u32 %v7139_v60, 16  ;;  %v7170_v35 = vrot.slane %v4967_v13, 5 }
 0x1b2   : > { %3066 = vst.msk [vmem:[#allocation3 + $0x80] sm:$0xff] %vm942_vm11, %v3034_v1  ;;  %v3243_v24 = vor.u32 %v3242_v52, %v7133_v51  ;;  %v3097_v1 = vld [vmem:[#allocation2 + $0x64] sm:$0xf]  ;;  %v3945_v0 = vrot.slane %v3943_v14, 7  ;;  %v4973_v40 = vrot.slane %v4971_v30, 4  ;;  %v3955_v47 = vshll.u32 %v7151_v4, 16 }
 0x1b3   : > { %v1917_v53 = vpop.f32.mrf.mxu2  ;;  %v1201_v56 = vpop.f32.mrf.mxu1  ;;  %v3251_v57 = vshrl.u32 %v3097_v1, 16  ;;  %v3254_v44 = vshll.u32 %v3097_v1, 16  ;;  %v1252_v14 = vld [vmem:[#allocation3 + $0xb8] sm:$0xff]  ;;  %v7205_v30 = vld [vmem:[#allocation2 + $0x70] sm:$0x8] }
 0x1b4   : > { %v2001_v23 = vadd.f32 %v1969_v37, %v1917_v53  ;;  %v1282_v54 = vadd.f32 %v1250_v46, %v1201_v56  ;;  %v3244_v37 = vrot.slane %v3243_v24, 4  ;;  %v4209_v53 = vunpack.c.l.b16 %v3927_v48 }
 0x1b5   : > { %v2654_v50 = vld [vmem:[#allocation3 + $0x90] sm:$0xff]  ;;  %v2603_v11 = vpop.f32.mrf.mxu3  ;;  %v5305_v56 = vpack.c.b16 %v5276_v28, %v5275_v2  ;;  %v3954_v46 = vrot.slane %v3952_v31, 7  ;;  %v3239_v48 = vsel %vm6536_vm10, %v3234_v29, %v7133_v51  ;;  %v3253_v5 = vrot.slane %v3251_v57, 4  ;;  %v3099_v29 = vld [vmem:[#allocation2 + $0x6c] sm:$0x1] }
 0x1b6   : > { %v2686_v6 = vadd.f32 %v2654_v50, %v2601_v3  ;;  %2033 = vst.msk [vmem:[#allocation3 + $0x98] sm:$0xff] %vm942_vm11, %v2001_v23  ;;  %v7147_v8 = vpop.f32.mrf.mxu0  ;;  %v4960_v3 = vrot.slane %v4958_v21, 4  ;;  %v1970_v20 = vld [vmem:[#allocation3 + $0xa0] sm:$0xff]  ;;  %v4974_v23 = vor.u32 %v4973_v40, %v7170_v35  ;;  %v7182_v50 = vrot.slane %v3938_v16, 11 }
 0x1b7   : > { %v3003_v9 = vld [vmem:[#allocation3 + $0x88] sm:$0xff]  ;;  %1314 = vst.msk [vmem:[#allocation3 + $0xa8] sm:$0xff] %vm942_vm11, %v1282_v54  ;;  %v4977_v54 = vshll.u32 %v4848_v25, 16  ;;  %v3249_v27 = vsel %vm6536_vm10, %v3244_v37, %v3248_v39  ;;  %v3256_v21 = vrot.slane %v3254_v44, 5  ;;  %v3957_v59 = vor.u32 %v3955_v47, %v3954_v46  ;;  %v4849_v16 = vld [vmem:[#allocation2 + $0x64] sm:$0xf] }
 0x1b8   : > { %2718 = vst.msk [vmem:[#allocation3 + $0x90] sm:$0xff] %vm942_vm11, %v2686_v6  ;;  %v3035_v17 = vadd.f32 %v3003_v9, %v7083_v38  ;;  %5999 = vmatmul.msk.bf16.gmra.mxu2 %vm800_vm5, %v4237_v42  ;;  %v3936_v38 = vsel %vm6261_vm4, %v3928_v22, %v3935_v32  ;;  %v4964_v58 = vor.u32 %v4963_v18, %v4960_v3  ;;  %v3098_v32 = vld [vmem:[#allocation2 + $0x68] sm:$0xf]  ;;  %v4975_v12 = vrot.slane %v4974_v23, 4  ;;  %v7192_v9 = vld [vmem:[#allocation2 + $0x74] sm:$0xf] }
 0x1b9   : > { %v4210_v52 = vunpack.c.l.b16 %v3936_v38  ;;  %v3260_v51 = vshll.u32 %v3098_v32, 16  ;;  %v3264_v4 = vshrl.u32 %v3098_v32, 16  ;;  %v4979_v13 = vrot.slane %v4977_v54, 5  ;;  %v4850_v38 = vld [vmem:[#allocation2 + $0x68] sm:$0xf]  ;;  %v6150_v37 = vld [vmem:[#allocation2 + $0x54] sm:$0xff] }
 0x1ba   : > { %3067 = vst.msk [vmem:[#allocation3 + $0x88] sm:$0xff] %vm942_vm11, %v3035_v17  ;;  %6080 = vmatmul.msk.bf16.gmra.mxu3 %vm800_vm5, %v6149_v41  ;;  %v4965_v61 = vrot.slane %v4964_v58, 4  ;;  %v3950_v41 = vrot.slane %v3945_v0, 4  ;;  %v7194_v3 = vunpack.c.l.b16 %v3239_v48  ;;  %v7196_v17 = vunpack.c.l.b16 %v3249_v27  ;;  %v1253_v27 = vld [vmem:[#allocation3 + $0xc0] sm:$0xff] }
 0x1bb   : > { %v1920_v19 = vpop.f32.mrf.mxu2  ;;  %v1204_v36 = vpop.f32.mrf.mxu1  ;;  %v3257_v31 = vor.u32 %v3256_v21, %v3253_v5  ;;  %v4980_v25 = vsel %vm6536_vm10, %v4975_v12, %v4979_v13  ;;  %v4982_v40 = vshrl.u32 %v4849_v16, 16  ;;  %v3960_v57 = vshrl.u32 %v7205_v30, 16  ;;  %v3100_v12 = vld [vmem:[#allocation2 + $0x74] sm:$0xf] }
 0x1bc   : > { %v2002_v42 = vadd.f32 %v1970_v20, %v1920_v19  ;;  %v1283_v43 = vadd.f32 %v1251_v55, %v1204_v36  ;;  %v4970_v2 = vsel %vm6536_vm10, %v4965_v61, %v7170_v35  ;;  %v7209_v1 = vsel %vm6261_vm4, %v3950_v41, %v3957_v59 }
 0x1bd   : > { %v2655_v45 = vld [vmem:[#allocation3 + $0x98] sm:$0xff]  ;;  %v2606_v22 = vpop.f32.mrf.mxu3  ;;  %v7211_v35 = vrot.slane %v3260_v51, 5  ;;  %v3266_v19 = vrot.slane %v3264_v4, 4  ;;  %v3965_v36 = vshrl.u32 %v7192_v9, 16  ;;  %v7219_v58 = vunpack.c.l.b16 %v4970_v2 }
 0x1be   : > { %v2687_v49 = vadd.f32 %v2655_v45, %v2603_v11  ;;  %2034 = vst.msk [vmem:[#allocation3 + $0xa0] sm:$0xff] %vm942_vm11, %v2002_v42  ;;  %5967 = vmatmul.msk.bf16.gmra.mxu1 %vm800_vm5, %v3551_v62  ;;  %v7175_v33 = vpop.f32.mrf.mxu0  ;;  %v7184_v11 = vor.u32 %v3946_v34, %v3945_v0  ;;  %v1971_v6 = vld [vmem:[#allocation3 + $0xa8] sm:$0xff]  ;;  %v4985_v44 = vshll.u32 %v4849_v16, 16  ;;  %v4991_v45 = vshll.u32 %v4850_v38, 16 }
 0x1bf   : > { %v3004_v60 = vld [vmem:[#allocation3 + $0x90] sm:$0xff]  ;;  %1315 = vst.msk [vmem:[#allocation3 + $0xb0] sm:$0xff] %vm942_vm11, %v1283_v43  ;;  %v3270_v43 = vshll.u32 %v3099_v29, 16  ;;  %v4984_v46 = vrot.slane %v4982_v40, 4  ;;  %v4995_v47 = vshrl.u32 %v4850_v38, 16  ;;  %v3267_v23 = vor.u32 %v3266_v19, %v7211_v35 }
 0x1c0   : > { %2719 = vst.msk [vmem:[#allocation3 + $0x98] sm:$0xff] %vm942_vm11, %v2687_v49  ;;  %v3036_v63 = vadd.f32 %v3004_v60, %v7109_v26  ;;  %v4238_v26 = vpack.c.b16 %v4210_v52, %v4209_v53  ;;  %v3949_v28 = vsel %vm6261_vm4, %v7182_v50, %v7184_v11  ;;  %v3258_v53 = vrot.slane %v3257_v31, 4  ;;  %v4851_v50 = vld [vmem:[#allocation2 + $0x6c] sm:$0x1] }
 0x1c1   : > { %6097 = vmatmul.msk.bf16.gmra.mxu0 %vm800_vm5, %v5305_v56  ;;  %v7226_v56 = vld [vmem:[#allocation2 + $0x78] sm:$0xf]  ;;  %v5278_v52 = vunpack.c.l.b16 %v4980_v25  ;;  %v4987_v54 = vrot.slane %v4985_v44, 5  ;;  %v7229_v32 = vrot.slane %v4991_v45, 5  ;;  %v7235_v60 = vrot.slane %v3965_v36, 7 }
 0x1c2   : > { %3068 = vst.msk [vmem:[#allocation3 + $0x90] sm:$0xff] %vm942_vm11, %v3036_v63  ;;  %v3968_v48 = vshll.u32 %v7192_v9, 16  ;;  %v4997_v11 = vrot.slane %v4995_v47, 4  ;;  %v4211_v5 = vunpack.c.l.b16 %v3949_v28  ;;  %v4212_v21 = vunpack.c.l.b16 %v7209_v1 }
 0x1c3   : > { %v1922_v62 = vpop.f32.mrf.mxu2  ;;  %v1206_v24 = vpop.f32.mrf.mxu1  ;;  %v3272_v51 = vrot.slane %v3270_v43, 5  ;;  %v4988_v4 = vor.u32 %v4987_v54, %v4984_v46  ;;  %v3268_v9 = vrot.slane %v3267_v23, 4  ;;  %v3263_v2 = vsel %vm6536_vm10, %v3258_v53, %v7211_v35  ;;  %v3102_v23 = vld [vmem:[#allocation2 + $0x7c] sm:$0x1] }
 0x1c4   : > { %v2003_v18 = vadd.f32 %v1971_v6, %v1922_v62  ;;  %v1284_v20 = vadd.f32 %v1252_v14, %v1206_v24  ;;  %v3974_v6 = vshrl.u32 %v7226_v56, 16  ;;  %v4998_v24 = vor.u32 %v4997_v11, %v7229_v32 }
 0x1c5   : > { %v2656_v39 = vld [vmem:[#allocation3 + $0xa0] sm:$0xff]  ;;  %v2608_v34 = vpop.f32.mrf.mxu3  ;;  %v5001_v14 = vshll.u32 %v4851_v50, 16  ;;  %v5985_v16 = vrot.slane %v3960_v57, 11  ;;  %v3977_v31 = vshll.u32 %v7226_v56, 16  ;;  %v3275_v30 = vshrl.u32 %v3100_v12, 16  ;;  %v1254_v57 = vld [vmem:[#allocation3 + $0xc8] sm:$0xff] }
 0x1c6   : > { %v2688_v55 = vadd.f32 %v2656_v39, %v2606_v22  ;;  %2035 = vst.msk [vmem:[#allocation3 + $0xa8] sm:$0xff] %vm942_vm11, %v2003_v18  ;;  %v7215_v0 = vpop.f32.mrf.mxu0  ;;  %v1972_v49 = vld [vmem:[#allocation3 + $0xb0] sm:$0xff]  ;;  %v3970_v18 = vor.u32 %v3968_v48, %v7235_v60  ;;  %v3976_v29 = vrot.slane %v3974_v6, 7  ;;  %v3278_v38 = vshll.u32 %v3100_v12, 16  ;;  %v4853_v56 = vld [vmem:[#allocation2 + $0x78] sm:$0xf] }
 0x1c7   : > { %v3005_v42 = vld [vmem:[#allocation3 + $0x98] sm:$0xff]  ;;  %1316 = vst.msk [vmem:[#allocation3 + $0xb8] sm:$0xff] %vm942_vm11, %v1284_v20  ;;  %v3273_v35 = vsel %vm6536_vm10, %v3268_v9, %v3272_v51  ;;  %v4999_v19 = vrot.slane %v4998_v24, 4  ;;  %v5003_v36 = vrot.slane %v5001_v14, 5  ;;  %v7258_v25 = vunpack.c.l.b16 %v3263_v2 }
 0x1c8   : > { %2720 = vst.msk [vmem:[#allocation3 + $0xa0] sm:$0xff] %vm942_vm11, %v2688_v55  ;;  %v3037_v22 = vadd.f32 %v3005_v42, %v7147_v8  ;;  %6000 = vmatmul.msk.bf16.gmra.mxu2 %vm800_vm5, %v4238_v26  ;;  %v3552_v8 = vpack.c.b16 %v7196_v17, %v7194_v3  ;;  %v5306_v26 = vpack.c.b16 %v5278_v52, %v7219_v58  ;;  %v3101_v20 = vld [vmem:[#allocation2 + $0x78] sm:$0xf]  ;;  %v3972_v58 = vrot.slane %v7235_v60, 4  ;;  %v4852_v42 = vld [vmem:[#allocation2 + $0x74] sm:$0xf] }
 0x1c9   : > { %v3284_v55 = vshll.u32 %v3101_v20, 16  ;;  %v3288_v40 = vshrl.u32 %v3101_v20, 16  ;;  %v3971_v44 = vsel %vm6261_vm4, %v5985_v16, %v3970_v18  ;;  %v3979_v45 = vor.u32 %v3977_v31, %v3976_v29  ;;  %v6151_v60 = vld [vmem:[#allocation2 + $0x64] sm:$0xff]  ;;  %v3819_v16 = vld [vmem:[#allocation2 + $0x80] sm:$0x8] }
 0x1ca   : > { %3069 = vst.msk [vmem:[#allocation3 + $0x98] sm:$0xff] %vm942_vm11, %v3037_v22  ;;  %6081 = vmatmul.msk.bf16.gmra.mxu3 %vm800_vm5, %v6150_v37  ;;  %v4239_v37 = vpack.c.b16 %v4212_v21, %v4211_v5  ;;  %v3277_v22 = vrot.slane %v3275_v30, 4  ;;  %v3280_v53 = vrot.slane %v3278_v38, 5  ;;  %v5004_v48 = vsel %vm6536_vm10, %v4999_v19, %v5003_v36  ;;  %v7275_v21 = vld [vmem:[#allocation2 + $0x84] sm:$0xf] }
 0x1cb   : > { %v1925_v61 = vpop.f32.mrf.mxu2  ;;  %v1209_v63 = vpop.f32.mrf.mxu1  ;;  %v7270_v50 = vrot.slane %v3284_v55, 5  ;;  %v5006_v11 = vshrl.u32 %v4852_v42, 16  ;;  %v3290_v5 = vrot.slane %v3288_v40, 4  ;;  %v5019_v6 = vshrl.u32 %v4853_v56, 16  ;;  %v3103_v31 = vld [vmem:[#allocation2 + $0x84] sm:$0xf] }
 0x1cc   : > { %v2004_v41 = vadd.f32 %v1972_v49, %v1925_v61  ;;  %v1285_v59 = vadd.f32 %v1253_v27, %v1209_v63  ;;  %v7263_v49 = vunpack.c.l.b16 %v3273_v35  ;;  %v5009_v61 = vshll.u32 %v4852_v42, 16  ;;  %v4854_v19 = vld [vmem:[#allocation2 + $0x7c] sm:$0x1] }
 0x1cd   : > { %v2657_v13 = vld [vmem:[#allocation3 + $0xa8] sm:$0xff]  ;;  %v2611_v62 = vpop.f32.mrf.mxu3  ;;  %v3281_v51 = vor.u32 %v3280_v53, %v3277_v22  ;;  %v5280_v2 = vunpack.c.l.b16 %v5004_v48  ;;  %v3987_v18 = vshrl.u32 %v7275_v21, 16  ;;  %v3291_v20 = vor.u32 %v3290_v5, %v7270_v50 }
 0x1ce   : > { %v2689_v3 = vadd.f32 %v2657_v13, %v2608_v34  ;;  %2036 = vst.msk [vmem:[#allocation3 + $0xb0] sm:$0xff] %vm942_vm11, %v2004_v41  ;;  %5968 = vmatmul.msk.bf16.gmra.mxu1 %vm800_vm5, %v3552_v8  ;;  %v7244_v17 = vpop.f32.mrf.mxu0  ;;  %v4989_v34 = vrot.slane %v4988_v4, 4  ;;  %v1973_v1 = vld [vmem:[#allocation3 + $0xb8] sm:$0xff]  ;;  %v3294_v4 = vshll.u32 %v3102_v23, 16  ;;  %v4213_v13 = vunpack.c.l.b16 %v3971_v44 }
 0x1cf   : > { %v3006_v28 = vld [vmem:[#allocation3 + $0xa0] sm:$0xff]  ;;  %1317 = vst.msk [vmem:[#allocation3 + $0xc0] sm:$0xff] %vm942_vm11, %v1285_v59  ;;  %v3980_v59 = vsel %vm6261_vm4, %v3972_v58, %v3979_v45  ;;  %v5011_v9 = vrot.slane %v5009_v61, 5  ;;  %v3553_v14 = vpack.c.b16 %v7263_v49, %v7258_v25  ;;  %v5021_v29 = vrot.slane %v5019_v6, 4 }
 0x1d0   : > { %2721 = vst.msk [vmem:[#allocation3 + $0xa8] sm:$0xff] %vm942_vm11, %v2689_v3  ;;  %v3038_v39 = vadd.f32 %v3006_v28, %v7175_v33  ;;  %v4994_v52 = vsel %vm6536_vm10, %v4989_v34, %v7229_v32  ;;  %v5015_v32 = vshll.u32 %v4853_v56, 16  ;;  %v3282_v34 = vrot.slane %v3281_v51, 4 }
 0x1d1   : > { %6098 = vmatmul.msk.bf16.gmra.mxu0 %vm800_vm5, %v5306_v26  ;;  %v5008_v26 = vrot.slane %v5006_v11, 4  ;;  %v5279_v3 = vunpack.c.l.b16 %v4994_v52  ;;  %v3982_v25 = vshrl.u32 %v3819_v16, 16  ;;  %v3990_v58 = vshll.u32 %v7275_v21, 16 }
 0x1d2   : > { %3070 = vst.msk [vmem:[#allocation3 + $0xa0] sm:$0xff] %vm942_vm11, %v3038_v39  ;;  %v7291_v28 = vrot.slane %v5015_v32, 5  ;;  %v1255_v39 = vld [vmem:[#allocation3 + $0xd0] sm:$0xff]  ;;  %v3299_v44 = vshrl.u32 %v3103_v31, 16  ;;  %v3302_v45 = vshll.u32 %v3103_v31, 16  ;;  %v3292_v56 = vrot.slane %v3291_v20, 4 }
 0x1d3   : > { %v1927_v33 = vpop.f32.mrf.mxu2  ;;  %v1211_v43 = vpop.f32.mrf.mxu1  ;;  %v5012_v36 = vor.u32 %v5011_v9, %v5008_v26  ;;  %v3287_v52 = vsel %vm6536_vm10, %v3282_v34, %v7270_v50  ;;  %v5986_v21 = vrot.slane %v3982_v25, 11  ;;  %v3822_v34 = vld [vmem:[#allocation2 + $0x90] sm:$0x8] }
 0x1d4   : > { %v2005_v46 = vadd.f32 %v1973_v1, %v1927_v33  ;;  %v1286_v47 = vadd.f32 %v1254_v57, %v1211_v43  ;;  %v3296_v1 = vrot.slane %v3294_v4, 5  ;;  %v5307_v33 = vpack.c.b16 %v5280_v2, %v5279_v3  ;;  %v3104_v57 = vld [vmem:[#allocation2 + $0x88] sm:$0xf]  ;;  %v3105_v4 = vld [vmem:[#allocation2 + $0x8c] sm:$0x1] }
 0x1d5   : > { %v2658_v54 = vld [vmem:[#allocation3 + $0xb0] sm:$0xff]  ;;  %v2613_v8 = vpop.f32.mrf.mxu3  ;;  %v7295_v43 = vrot.slane %v3987_v18, 7  ;;  %v3308_v11 = vshll.u32 %v3104_v57, 16  ;;  %v3312_v61 = vshrl.u32 %v3104_v57, 16  ;;  %v3301_v6 = vrot.slane %v3299_v44, 4 }
 0x1d6   : > { %v2690_v63 = vadd.f32 %v2658_v54, %v2611_v62  ;;  %2037 = vst.msk [vmem:[#allocation3 + $0xb8] sm:$0xff] %vm942_vm11, %v2005_v46  ;;  %v7273_v27 = vpop.f32.mrf.mxu0  ;;  %v7283_v62 = vld [vmem:[#allocation2 + $0x88] sm:$0xf]  ;;  %v1974_v24 = vld [vmem:[#allocation3 + $0xc0] sm:$0xff]  ;;  %v5022_v46 = vor.u32 %v5021_v29, %v7291_v28  ;;  %v3304_v50 = vrot.slane %v3302_v45, 5  ;;  %v4004_v45 = vshrl.u32 %v3822_v34, 16 }
 0x1d7   : > { %v3007_v41 = vld [vmem:[#allocation3 + $0xa8] sm:$0xff]  ;;  %1318 = vst.msk [vmem:[#allocation3 + $0xc8] sm:$0xff] %vm942_vm11, %v1286_v47  ;;  %v3996_v35 = vshrl.u32 %v7283_v62, 16  ;;  %v5025_v47 = vshll.u32 %v4854_v19, 16  ;;  %v3999_v54 = vshll.u32 %v7283_v62, 16  ;;  %v3992_v32 = vor.u32 %v3990_v58, %v7295_v43  ;;  %v1256_v62 = vld [vmem:[#allocation3 + $0xd8] sm:$0xff] }
 0x1d8   : > { %2722 = vst.msk [vmem:[#allocation3 + $0xb0] sm:$0xff] %vm942_vm11, %v2690_v63  ;;  %v3039_v12 = vadd.f32 %v3007_v41, %v7215_v0  ;;  %6001 = vmatmul.msk.bf16.gmra.mxu2 %vm800_vm5, %v4239_v37  ;;  %v4214_v0 = vunpack.c.l.b16 %v3980_v59  ;;  %v4855_v63 = vld [vmem:[#allocation2 + $0x84] sm:$0xf]  ;;  %v3297_v41 = vsel %vm6536_vm10, %v3292_v56, %v3296_v1  ;;  %v7314_v59 = vunpack.c.l.b16 %v3287_v52  ;;  %v7342_v44 = vld [vmem:[#allocation2 + $0x98] sm:$0xf] }
 0x1d9   : > { %v3998_v23 = vrot.slane %v3996_v35, 7  ;;  %v5027_v51 = vrot.slane %v5025_v47, 5  ;;  %v3994_v26 = vrot.slane %v7295_v43, 4  ;;  %v5030_v3 = vshrl.u32 %v4855_v63, 16  ;;  %v4857_v52 = vld [vmem:[#allocation2 + $0x8c] sm:$0x1] }
 0x1da   : > { %3071 = vst.msk [vmem:[#allocation3 + $0xa8] sm:$0xff] %vm942_vm11, %v3039_v12  ;;  %6082 = vmatmul.msk.bf16.gmra.mxu3 %vm800_vm5, %v6151_v60  ;;  %v4240_v48 = vpack.c.b16 %v4214_v0, %v4213_v13  ;;  %v7320_v18 = vrot.slane %v3308_v11, 5  ;;  %v3314_v0 = vrot.slane %v3312_v61, 4  ;;  %v3529_v31 = vunpack.c.l.b16 %v3297_v41  ;;  %v3107_v11 = vld [vmem:[#allocation2 + $0x98] sm:$0xf] }
 0x1db   : > { %v1930_v30 = vpop.f32.mrf.mxu2  ;;  %v1214_v38 = vpop.f32.mrf.mxu1  ;;  %v4001_v9 = vor.u32 %v3999_v54, %v3998_v23 }
 0x1dc   : > { %v2006_v55 = vadd.f32 %v1974_v24, %v1930_v30  ;;  %v1287_v37 = vadd.f32 %v1255_v39, %v1214_v38  ;;  %v3993_v30 = vsel %vm6261_vm4, %v5986_v21, %v3992_v32  ;;  %v3305_v38 = vor.u32 %v3304_v50, %v3301_v6 }
 0x1dd   : > { %v2659_v40 = vld [vmem:[#allocation3 + $0xb8] sm:$0xff]  ;;  %v2616_v42 = vpop.f32.mrf.mxu3  ;;  %v3318_v39 = vshll.u32 %v3105_v4, 16  ;;  %v7332_v25 = vsel %vm6261_vm4, %v3994_v26, %v4001_v9  ;;  %v3315_v57 = vor.u32 %v3314_v0, %v7320_v18  ;;  %v4215_v54 = vunpack.c.l.b16 %v3993_v30 }
 0x1de   : > { %v2691_v22 = vadd.f32 %v2659_v40, %v2613_v8  ;;  %2038 = vst.msk [vmem:[#allocation3 + $0xc0] sm:$0xff] %vm942_vm11, %v2006_v55  ;;  %5969 = vmatmul.msk.bf16.gmra.mxu1 %vm800_vm5, %v3553_v14  ;;  %v7299_v53 = vpop.f32.mrf.mxu0  ;;  %v5013_v8 = vrot.slane %v5012_v36, 4  ;;  %v1975_v5 = vld [vmem:[#allocation3 + $0xc8] sm:$0xff]  ;;  %v5033_v36 = vshll.u32 %v4855_v63, 16  ;;  %v7336_v40 = vld [vmem:[#allocation2 + $0x94] sm:$0xf] }
 0x1df   : > { %v3008_v49 = vld [vmem:[#allocation3 + $0xb0] sm:$0xff]  ;;  %1319 = vst.msk [vmem:[#allocation3 + $0xd0] sm:$0xff] %vm942_vm11, %v1287_v37  ;;  %v4856_v14 = vld [vmem:[#allocation2 + $0x88] sm:$0xf]  ;;  %v3306_v47 = vrot.slane %v3305_v38, 4  ;;  %v4009_v21 = vshrl.u32 %v7336_v40, 16 }
 0x1e0   : > { %2723 = vst.msk [vmem:[#allocation3 + $0xb8] sm:$0xff] %vm942_vm11, %v2691_v22  ;;  %v3040_v60 = vadd.f32 %v3008_v49, %v7244_v17  ;;  %v5023_v17 = vrot.slane %v5022_v46, 4  ;;  %v5018_v24 = vsel %vm6536_vm10, %v5013_v8, %v7291_v28  ;;  %v6152_v28 = vld [vmem:[#allocation2 + $0x74] sm:$0xff]  ;;  %v5039_v55 = vshll.u32 %v4856_v14, 16 }
 0x1e1   : > { %6099 = vmatmul.msk.bf16.gmra.mxu0 %vm800_vm5, %v5307_v33  ;;  %v7334_v58 = vunpack.c.l.b16 %v5018_v24  ;;  %v5043_v33 = vshrl.u32 %v4856_v14, 16  ;;  %v5035_v22 = vrot.slane %v5033_v36, 5  ;;  %v7344_v49 = vrot.slane %v3318_v39, 5 }
 0x1e2   : > { %3072 = vst.msk [vmem:[#allocation3 + $0xb0] sm:$0xff] %vm942_vm11, %v3040_v60  ;;  %v5028_v19 = vsel %vm6536_vm10, %v5023_v17, %v5027_v51  ;;  %v7346_v23 = vrot.slane %v5039_v55, 5  ;;  %v4216_v8 = vunpack.c.l.b16 %v7332_v25  ;;  %v4012_v32 = vshll.u32 %v7336_v40, 16  ;;  %v3108_v40 = vld [vmem:[#allocation2 + $0x9c] sm:$0x1] }
 0x1e3   : > { %v1932_v12 = vpop.f32.mrf.mxu2  ;;  %v1216_v13 = vpop.f32.mrf.mxu1  ;;  %v5282_v46 = vunpack.c.l.b16 %v5028_v19  ;;  %v5045_v60 = vrot.slane %v5043_v33, 4  ;;  %v4018_v6 = vshrl.u32 %v7342_v44, 16  ;;  %v3316_v51 = vrot.slane %v3315_v57, 4  ;;  %v1258_v57 = vld [vmem:[#allocation3 + $0xe8] sm:$0xff] }
 0x1e4   : > { %v2007_v2 = vadd.f32 %v1975_v5, %v1932_v12  ;;  %v1288_v16 = vadd.f32 %v1256_v62, %v1216_v13  ;;  %v1257_v5 = vld [vmem:[#allocation3 + $0xe0] sm:$0xff]  ;;  %v3332_v9 = vshll.u32 %v3107_v11, 16  ;;  %v4241_v25 = vpack.c.b16 %v4216_v8, %v4215_v54  ;;  %v4859_v54 = vld [vmem:[#allocation2 + $0x98] sm:$0xf] }
 0x1e5   : > { %v2660_v20 = vld [vmem:[#allocation3 + $0xc0] sm:$0xff]  ;;  %v2618_v29 = vpop.f32.mrf.mxu3  ;;  %v5308_v13 = vpack.c.b16 %v5282_v46, %v7334_v58  ;;  %v3321_v39 = vsel %vm6536_vm10, %v3316_v51, %v7344_v49  ;;  %v4020_v34 = vrot.slane %v4018_v6, 7 }
 0x1e6   : > { %v2692_v1 = vadd.f32 %v2660_v20, %v2616_v42  ;;  %2039 = vst.msk [vmem:[#allocation3 + $0xc8] sm:$0xff] %vm942_vm11, %v2007_v2  ;;  %v7325_v35 = vpop.f32.mrf.mxu0  ;;  %v5032_v42 = vrot.slane %v5030_v3, 4  ;;  %v1976_v56 = vld [vmem:[#allocation3 + $0xd0] sm:$0xff]  ;;  %v7360_v3 = vrot.slane %v4004_v45, 11  ;;  %v5046_v2 = vor.u32 %v5045_v60, %v7346_v23 }
 0x1e7   : > { %v3009_v37 = vld [vmem:[#allocation3 + $0xb8] sm:$0xff]  ;;  %1320 = vst.msk [vmem:[#allocation3 + $0xd8] sm:$0xff] %vm942_vm11, %v1288_v16  ;;  %v3336_v16 = vshrl.u32 %v3107_v11, 16  ;;  %v3311_v20 = vsel %vm6536_vm10, %v3306_v47, %v7320_v18  ;;  %v7378_v55 = vrot.slane %v3332_v9, 5  ;;  %v3531_v49 = vunpack.c.l.b16 %v3321_v39 }
 0x1e8   : > { %2724 = vst.msk [vmem:[#allocation3 + $0xc0] sm:$0xff] %vm942_vm11, %v2692_v1  ;;  %v3041_v43 = vadd.f32 %v3009_v37, %v7273_v27  ;;  %6002 = vmatmul.msk.bf16.gmra.mxu2 %vm800_vm5, %v4240_v48  ;;  %v3554_v27 = vpack.c.b16 %v3529_v31, %v7314_v59  ;;  %v3106_v48 = vld [vmem:[#allocation2 + $0x94] sm:$0xf]  ;;  %v5036_v50 = vor.u32 %v5035_v22, %v5032_v42  ;;  %v5049_v59 = vshll.u32 %v4857_v52, 16 }
 0x1e9   : > { %v3323_v62 = vshrl.u32 %v3106_v48, 16  ;;  %v3326_v26 = vshll.u32 %v3106_v48, 16  ;;  %v7367_v31 = vrot.slane %v4009_v21, 7  ;;  %v3338_v37 = vrot.slane %v3336_v16, 4  ;;  %v4858_v42 = vld [vmem:[#allocation2 + $0x94] sm:$0xf] }
 0x1ea   : > { %3073 = vst.msk [vmem:[#allocation3 + $0xb8] sm:$0xff] %vm942_vm11, %v3041_v43  ;;  %6083 = vmatmul.msk.bf16.gmra.mxu3 %vm800_vm5, %v6152_v28  ;;  %v5037_v30 = vrot.slane %v5036_v50, 4  ;;  %v5051_v1 = vrot.slane %v5049_v59, 5  ;;  %v7375_v28 = vld [vmem:[#allocation2 + $0xa4] sm:$0xf]  ;;  %v5047_v58 = vrot.slane %v5046_v2, 4 }
 0x1eb   : > { %v1935_v61 = vpop.f32.mrf.mxu2  ;;  %v1219_v63 = vpop.f32.mrf.mxu1  ;;  %v3325_v18 = vrot.slane %v3323_v62, 4  ;;  %v3328_v36 = vrot.slane %v3326_v26, 5  ;;  %v4016_v45 = vrot.slane %v7367_v31, 4  ;;  %v3339_v11 = vor.u32 %v3338_v37, %v7378_v55  ;;  %v6153_v21 = vld [vmem:[#allocation2 + $0x84] sm:$0xff] }
 0x1ec   : > { %v2008_v41 = vadd.f32 %v1976_v56, %v1935_v61  ;;  %v1289_v17 = vadd.f32 %v1257_v5, %v1219_v63  ;;  %v5042_v22 = vsel %vm6536_vm10, %v5037_v30, %v7346_v23  ;;  %v4031_v56 = vshrl.u32 %v7375_v28, 16 }
 0x1ed   : > { %v2661_v4 = vld [vmem:[#allocation3 + $0xc8] sm:$0xff]  ;;  %v2621_v12 = vpop.f32.mrf.mxu3  ;;  %v3329_v48 = vor.u32 %v3328_v36, %v3325_v18  ;;  %v3342_v61 = vshll.u32 %v3108_v40, 16  ;;  %v5054_v63 = vshrl.u32 %v4858_v42, 16  ;;  %v7397_v6 = vunpack.c.l.b16 %v5042_v22  ;;  %v3109_v36 = vld [vmem:[#allocation2 + $0xa4] sm:$0xf] }
 0x1ee   : > { %v2693_v24 = vadd.f32 %v2661_v4, %v2618_v29  ;;  %2040 = vst.msk [vmem:[#allocation3 + $0xd0] sm:$0xff] %vm942_vm11, %v2008_v41  ;;  %5970 = vmatmul.msk.bf16.gmra.mxu1 %vm800_vm5, %v3554_v27  ;;  %v7358_v14 = vpop.f32.mrf.mxu0  ;;  %v4021_v29 = vshll.u32 %v7342_v44, 16  ;;  %v1977_v19 = vld [vmem:[#allocation3 + $0xd8] sm:$0xff]  ;;  %v7384_v44 = vor.u32 %v4012_v32, %v7367_v31  ;;  %v3825_v27 = vld [vmem:[#allocation2 + $0xa0] sm:$0x8]  ;;  %v5052_v32 = vsel %vm6536_vm10, %v5047_v58, %v5051_v1 }
 0x1ef   : > { %v3010_v0 = vld [vmem:[#allocation3 + $0xc0] sm:$0xff]  ;;  %1321 = vst.msk [vmem:[#allocation3 + $0xe0] sm:$0xff] %vm942_vm11, %v1289_v17  ;;  %v5057_v50 = vshll.u32 %v4858_v42, 16  ;;  %v4026_v17 = vshrl.u32 %v3825_v27, 16  ;;  %v7400_v51 = vrot.slane %v4031_v56, 7  ;;  %v4034_v59 = vshll.u32 %v7375_v28, 16 }
 0x1f0   : > { %2725 = vst.msk [vmem:[#allocation3 + $0xc8] sm:$0xff] %vm942_vm11, %v2693_v24  ;;  %v3042_v38 = vadd.f32 %v3010_v0, %v7299_v53  ;;  %v7381_v53 = vunpack.c.l.b16 %v3311_v20  ;;  %v4023_v52 = vor.u32 %v4021_v29, %v4020_v34  ;;  %v5063_v4 = vshll.u32 %v4859_v54, 16  ;;  %v4860_v29 = vld [vmem:[#allocation2 + $0x9c] sm:$0x1]  ;;  %v1259_v34 = vld [vmem:[#allocation3 + $0xf0] sm:$0xff] }
 0x1f1   : > { %6100 = vmatmul.msk.bf16.gmra.mxu0 %vm800_vm5, %v5308_v13  ;;  %v7406_v13 = vld [vmem:[#allocation2 + $0xa8] sm:$0xf]  ;;  %v5056_v62 = vrot.slane %v5054_v63, 4  ;;  %v5059_v26 = vrot.slane %v5057_v50, 5  ;;  %v5067_v9 = vshrl.u32 %v4859_v54, 16  ;;  %v5284_v2 = vunpack.c.l.b16 %v5052_v32 }
 0x1f2   : > { %3074 = vst.msk [vmem:[#allocation3 + $0xc0] sm:$0xff] %vm942_vm11, %v3042_v38  ;;  %v3330_v16 = vrot.slane %v3329_v48, 4  ;;  %v3340_v0 = vrot.slane %v3339_v11, 4  ;;  %v3344_v20 = vrot.slane %v3342_v61, 5  ;;  %v3555_v31 = vpack.c.b16 %v3531_v49, %v7381_v53  ;;  %v3110_v56 = vld [vmem:[#allocation2 + $0xa8] sm:$0xf] }
 0x1f3   : > { %v1937_v33 = vpop.f32.mrf.mxu2  ;;  %v1221_v43 = vpop.f32.mrf.mxu1  ;;  %v5069_v30 = vrot.slane %v5067_v9, 4  ;;  %v4015_v1 = vsel %vm6261_vm4, %v7360_v3, %v7384_v44  ;;  %v4024_v28 = vsel %vm6261_vm4, %v4016_v45, %v4023_v52  ;;  %v4040_v18 = vshrl.u32 %v7406_v13, 16 }
 0x1f4   : > { %v2009_v46 = vadd.f32 %v1977_v19, %v1937_v33  ;;  %v1290_v47 = vadd.f32 %v1258_v57, %v1221_v43  ;;  %v5988_v19 = vrot.slane %v4026_v17, 11  ;;  %v4036_v53 = vor.u32 %v4034_v59, %v7400_v51 }
 0x1f5   : > { %v2662_v8 = vld [vmem:[#allocation3 + $0xd0] sm:$0xff]  ;;  %v2623_v60 = vpop.f32.mrf.mxu3  ;;  %v5060_v58 = vor.u32 %v5059_v26, %v5056_v62  ;;  %v5309_v33 = vpack.c.b16 %v5284_v2, %v7397_v6  ;;  %v3335_v3 = vsel %vm6536_vm10, %v3330_v16, %v7378_v55  ;;  %v3345_v43 = vsel %vm6536_vm10, %v3340_v0, %v3344_v20  ;;  %v4861_v26 = vld [vmem:[#allocation2 + $0xa4] sm:$0xf]  ;;  %v4862_v0 = vld [vmem:[#allocation2 + $0xa8] sm:$0xf] }
 0x1f6   : > { %v2694_v5 = vadd.f32 %v2662_v8, %v2621_v12  ;;  %2041 = vst.msk [vmem:[#allocation3 + $0xd8] sm:$0xff] %vm942_vm11, %v2009_v46  ;;  %v7393_v23 = vpop.f32.mrf.mxu0  ;;  %v1978_v24 = vld [vmem:[#allocation3 + $0xe0] sm:$0xff]  ;;  %v5073_v57 = vshll.u32 %v4860_v29, 16  ;;  %v3347_v46 = vshrl.u32 %v3109_v36, 16  ;;  %v4217_v55 = vunpack.c.l.b16 %v4015_v1  ;;  %v6154_v1 = vld [vmem:[#allocation2 + $0x94] sm:$0xff] }
 0x1f7   : > { %v3011_v41 = vld [vmem:[#allocation3 + $0xc8] sm:$0xff]  ;;  %1322 = vst.msk [vmem:[#allocation3 + $0xe8] sm:$0xff] %vm942_vm11, %v1290_v47  ;;  %v3350_v47 = vshll.u32 %v3109_v36, 16  ;;  %v4218_v52 = vunpack.c.l.b16 %v4024_v28  ;;  %v4042_v27 = vrot.slane %v4040_v18, 7  ;;  %v4043_v54 = vshll.u32 %v7406_v13, 16 }
 0x1f8   : > { %2726 = vst.msk [vmem:[#allocation3 + $0xd0] sm:$0xff] %vm942_vm11, %v2694_v5  ;;  %v3043_v12 = vadd.f32 %v3011_v41, %v7325_v35  ;;  %6003 = vmatmul.msk.bf16.gmra.mxu2 %vm800_vm5, %v4241_v25  ;;  %v7411_v35 = vrot.slane %v5063_v4, 5  ;;  %v4037_v48 = vsel %vm6261_vm4, %v5988_v19, %v4036_v53  ;;  %v5061_v11 = vrot.slane %v5060_v58, 4  ;;  %v3828_v53 = vld [vmem:[#allocation2 + $0xb0] sm:$0x8] }
 0x1f9   : > { %v7441_v63 = vunpack.c.l.b16 %v3345_v43  ;;  %v5075_v5 = vrot.slane %v5073_v57, 5  ;;  %v3360_v32 = vshrl.u32 %v3110_v56, 16  ;;  %v3349_v50 = vrot.slane %v3347_v46, 4  ;;  %v4863_v46 = vld [vmem:[#allocation2 + $0xac] sm:$0x1] }
 0x1fa   : > { %3075 = vst.msk [vmem:[#allocation3 + $0xc8] sm:$0xff] %vm942_vm11, %v3043_v12  ;;  %6084 = vmatmul.msk.bf16.gmra.mxu3 %vm800_vm5, %v6153_v21  ;;  %v5070_v22 = vor.u32 %v5069_v30, %v7411_v35  ;;  %v3356_v21 = vshll.u32 %v3110_v56, 16  ;;  %v3352_v41 = vrot.slane %v3350_v47, 5  ;;  %v4242_v59 = vpack.c.b16 %v4218_v52, %v4217_v55  ;;  %v1260_v12 = vld [vmem:[#allocation3 + $0xf8] sm:$0xff]  ;;  %v3111_v30 = vld [vmem:[#allocation2 + $0xac] sm:$0x1] }
 0x1fb   : > { %v1940_v38 = vpop.f32.mrf.mxu2  ;;  %v1224_v39 = vpop.f32.mrf.mxu1  ;;  %v4038_v13 = vrot.slane %v7400_v51, 4  ;;  %v4045_v62 = vor.u32 %v4043_v54, %v4042_v27  ;;  %v7447_v2 = vunpack.c.l.b16 %v4037_v48  ;;  %v5066_v16 = vsel %vm6536_vm10, %v5061_v11, %v7411_v35  ;;  %v3112_v54 = vld [vmem:[#allocation2 + $0xb4] sm:$0xf]  ;;  %v3704_v48 = vld [vmem:[#allocation3] sm:$0xff] }
 0x1fc   : > { %v2010_v37 = vadd.f32 %v1978_v24, %v1940_v38  ;;  %v1291_v25 = vadd.f32 %v1259_v34, %v1224_v39  ;;  %v5071_v6 = vrot.slane %v5070_v22, 4  ;;  %v7454_v38 = vrot.slane %v3356_v21, 5 }
 0x1fd   : > { %v2663_v40 = vld [vmem:[#allocation3 + $0xd8] sm:$0xff]  ;;  %v2626_v42 = vpop.f32.mrf.mxu3  ;;  %v3362_v51 = vrot.slane %v3360_v32, 4  ;;  %v3353_v19 = vor.u32 %v3352_v41, %v3349_v50  ;;  %v5078_v18 = vshrl.u32 %v4861_v26, 16  ;;  %v5081_v58 = vshll.u32 %v4861_v26, 16 }
 0x1fe   : > { %v2695_v44 = vadd.f32 %v2663_v40, %v2623_v60  ;;  %2042 = vst.msk [vmem:[#allocation3 + $0xe0] sm:$0xff] %vm942_vm11, %v2010_v37  ;;  %5971 = vmatmul.msk.bf16.gmra.mxu1 %vm800_vm5, %v3555_v31  ;;  %v7429_v45 = vpop.f32.mrf.mxu0  ;;  %v7436_v60 = vunpack.c.l.b16 %v3335_v3  ;;  %v1979_v61 = vld [vmem:[#allocation3 + $0xe8] sm:$0xff]  ;;  %v5076_v35 = vsel %vm6536_vm10, %v5071_v6, %v5075_v5  ;;  %v7465_v37 = vsel %vm6261_vm4, %v4038_v13, %v4045_v62  ;;  %v7470_v3 = vld [vmem:[#allocation2 + $0xb8] sm:$0xf] }
 0x1ff   : > { %v3012_v49 = vld [vmem:[#allocation3 + $0xd0] sm:$0xff]  ;;  %1323 = vst.msk [vmem:[#allocation3 + $0xf0] sm:$0xff] %vm942_vm11, %v1291_v25  ;;  %v5285_v25 = vunpack.c.l.b16 %v5066_v16  ;;  %v5087_v40 = vshll.u32 %v4862_v0, 16  ;;  %v5080_v43 = vrot.slane %v5078_v18, 4  ;;  %v5091_v57 = vshrl.u32 %v4862_v0, 16 }
 0x200   : > { %2727 = vst.msk [vmem:[#allocation3 + $0xd8] sm:$0xff] %vm942_vm11, %v2695_v44  ;;  %v3044_v8 = vadd.f32 %v3012_v49, %v7358_v14  ;;  %v7444_v14 = vld [vmem:[#allocation2 + $0xb4] sm:$0xf]  ;;  %v3556_v29 = vpack.c.b16 %v7441_v63, %v7436_v60  ;;  %v5286_v22 = vunpack.c.l.b16 %v5076_v35  ;;  %v3363_v56 = vor.u32 %v3362_v51, %v7454_v38  ;;  %v3113_v41 = vld [vmem:[#allocation2 + $0xb8] sm:$0xf] }
 0x201   : > { %6101 = vmatmul.msk.bf16.gmra.mxu0 %vm800_vm5, %v5309_v33  ;;  %v4053_v39 = vshrl.u32 %v7444_v14, 16  ;;  %v3366_v33 = vshll.u32 %v3111_v30, 16  ;;  %v5083_v47 = vrot.slane %v5081_v58, 5  ;;  %v7473_v49 = vrot.slane %v5087_v40, 5  ;;  %v4864_v58 = vld [vmem:[#allocation2 + $0xb4] sm:$0xf] }
 0x202   : > { %3076 = vst.msk [vmem:[#allocation3 + $0xd0] sm:$0xff] %vm942_vm11, %v3044_v8  ;;  %v3354_v55 = vrot.slane %v3353_v19, 4  ;;  %v4048_v52 = vshrl.u32 %v3828_v53, 16  ;;  %v5093_v27 = vrot.slane %v5091_v57, 4  ;;  %v3371_v63 = vshrl.u32 %v3112_v54, 16 }
 0x203   : > { %v1942_v17 = vpop.f32.mrf.mxu2  ;;  %v1226_v4 = vpop.f32.mrf.mxu1  ;;  %v7478_v11 = vrot.slane %v4053_v39, 7  ;;  %v3374_v5 = vshll.u32 %v3112_v54, 16  ;;  %v5097_v50 = vshll.u32 %v4863_v46, 16  ;;  %v3368_v13 = vrot.slane %v3366_v33, 5  ;;  %v3114_v53 = vld [vmem:[#allocation2 + $0xbc] sm:$0x1] }
 0x204   : > { %v2011_v9 = vadd.f32 %v1979_v61, %v1942_v17  ;;  %v1292_v24 = vadd.f32 %v1260_v12, %v1226_v4  ;;  %v5084_v61 = vor.u32 %v5083_v47, %v5080_v43  ;;  %v5094_v6 = vor.u32 %v5093_v27, %v7473_v49  ;;  %v3705_v33 = vld [vmem:[#allocation3 + $0x8] sm:$0xff] }
 0x205   : > { %v2664_v20 = vld [vmem:[#allocation3 + $0xe0] sm:$0xff]  ;;  %v2628_v31 = vpop.f32.mrf.mxu3  ;;  %v5310_v4 = vpack.c.b16 %v5286_v22, %v5285_v25  ;;  %v3364_v12 = vrot.slane %v3363_v56, 4  ;;  %v4062_v62 = vshrl.u32 %v7470_v3, 16  ;;  %v4056_v16 = vshll.u32 %v7444_v14, 16 }
 0x206   : > { %v2696_v34 = vadd.f32 %v2664_v20, %v2626_v42  ;;  %2043 = vst.msk [vmem:[#allocation3 + $0xe8] sm:$0xff] %vm942_vm11, %v2011_v9  ;;  %v7458_v28 = vpop.f32.mrf.mxu0  ;;  %v1980_v44 = vld [vmem:[#allocation3 + $0xf0] sm:$0xff]  ;;  %v5085_v0 = vrot.slane %v5084_v61, 4  ;;  %v3373_v30 = vrot.slane %v3371_v63, 4  ;;  %v3376_v51 = vrot.slane %v3374_v5, 5 }
 0x207   : > { %v3013_v36 = vld [vmem:[#allocation3 + $0xd8] sm:$0xff]  ;;  %1324 = vst.msk [vmem:[#allocation3 + $0xf8] sm:$0xff] %vm942_vm11, %v1292_v24  ;;  %v3359_v24 = vsel %vm6536_vm10, %v3354_v55, %v7454_v38  ;;  %v3380_v39 = vshll.u32 %v3113_v41, 16  ;;  %v3369_v14 = vsel %vm6536_vm10, %v3364_v12, %v3368_v13  ;;  %v7496_v38 = vrot.slane %v4048_v52, 11  ;;  %v3831_v5 = vld [vmem:[#allocation2 + $0xc0] sm:$0x8] }
 0x208   : > { %2728 = vst.msk [vmem:[#allocation3 + $0xe0] sm:$0xff] %vm942_vm11, %v2696_v34  ;;  %v3045_v42 = vadd.f32 %v3013_v36, %v7393_v23  ;;  %6004 = vmatmul.msk.bf16.gmra.mxu2 %vm800_vm5, %v4242_v59  ;;  %v4220_v23 = vunpack.c.l.b16 %v7465_v37  ;;  %v5095_v34 = vrot.slane %v5094_v6, 4  ;;  %v4064_v19 = vrot.slane %v4062_v62, 7 }
 0x209   : > { %v4065_v18 = vshll.u32 %v7470_v3, 16  ;;  %v7501_v37 = vunpack.c.l.b16 %v3359_v24  ;;  %v4060_v25 = vrot.slane %v7478_v11, 4  ;;  %v5090_v3 = vsel %vm6536_vm10, %v5085_v0, %v7473_v49 }
 0x20a   : > { %3077 = vst.msk [vmem:[#allocation3 + $0xd8] sm:$0xff] %vm942_vm11, %v3045_v42  ;;  %6085 = vmatmul.msk.bf16.gmra.mxu3 %vm800_vm5, %v6154_v1  ;;  %v5099_v1 = vrot.slane %v5097_v50, 5  ;;  %v4243_v36 = vpack.c.b16 %v4220_v23, %v7447_v2  ;;  %v3377_v43 = vor.u32 %v3376_v51, %v3373_v30  ;;  %v7510_v57 = vrot.slane %v3380_v39, 5  ;;  %v7516_v23 = vld [vmem:[#allocation2 + $0xc4] sm:$0xf] }
 0x20b   : > { %v1945_v8 = vpop.f32.mrf.mxu2  ;;  %v3624_v60 = vpop.f32.mrf.mxu1  ;;  %v7512_v46 = vunpack.c.l.b16 %v3369_v14  ;;  %v4067_v27 = vor.u32 %v4065_v18, %v4064_v19  ;;  %v3390_v54 = vshll.u32 %v3114_v53, 16  ;;  %v5102_v49 = vshrl.u32 %v4864_v58, 16 }
 0x20c   : > { %v2012_v21 = vadd.f32 %v1980_v44, %v1945_v8  ;;  %v3736_v32 = vadd.f32 %v3704_v48, %v3624_v60  ;;  %v4865_v44 = vld [vmem:[#allocation2 + $0xb8] sm:$0xf]  ;;  %v5100_v47 = vsel %vm6536_vm10, %v5095_v34, %v5099_v1  ;;  %v7518_v8 = vld [vmem:[#allocation2 + $0xc8] sm:$0xf]  ;;  %v5105_v60 = vshll.u32 %v4864_v58, 16 }
 0x20d   : > { %v2665_v17 = vld [vmem:[#allocation3 + $0xe8] sm:$0xff]  ;;  %v2631_v59 = vpop.f32.mrf.mxu3  ;;  %v7523_v63 = vunpack.c.l.b16 %v5090_v3  ;;  %v5288_v50 = vunpack.c.l.b16 %v5100_v47  ;;  %v4084_v12 = vshrl.u32 %v7518_v8, 16  ;;  %v5104_v13 = vrot.slane %v5102_v49, 4 }
 0x20e   : > { %v2697_v26 = vadd.f32 %v2665_v17, %v2628_v31  ;;  %2044 = vst.msk [vmem:[#allocation3 + $0xf0] sm:$0xff] %vm942_vm11, %v2012_v21  ;;  %5972 = vmatmul.msk.bf16.gmra.mxu1 %vm800_vm5, %v3556_v29  ;;  %v7484_v9 = vpop.f32.mrf.mxu0  ;;  %v3384_v31 = vshrl.u32 %v3113_v41, 16  ;;  %v1981_v35 = vld [vmem:[#allocation3 + $0xf8] sm:$0xff]  ;;  %v5111_v21 = vshll.u32 %v4865_v44, 16  ;;  %v7526_v41 = vrot.slane %v3377_v43, 4 }
 0x20f   : > { %v3014_v20 = vld [vmem:[#allocation3 + $0xe0] sm:$0xff]  ;;  %3768 = vst.msk [vmem:[#allocation3] sm:$0xff] %vm942_vm11, %v3736_v32  ;;  %v5115_v32 = vshrl.u32 %v4865_v44, 16  ;;  %v5107_v62 = vrot.slane %v5105_v60, 5  ;;  %v3392_v24 = vrot.slane %v3390_v54, 5  ;;  %v3557_v30 = vpack.c.b16 %v7512_v46, %v7501_v37 }
 0x210   : > { %2729 = vst.msk [vmem:[#allocation3 + $0xe8] sm:$0xff] %vm942_vm11, %v2697_v26  ;;  %v3046_v29 = vadd.f32 %v3014_v20, %v7429_v45  ;;  %v7504_v45 = vor.u32 %v4056_v16, %v7478_v11  ;;  %v3386_v2 = vrot.slane %v3384_v31, 4  ;;  %v6155_v11 = vld [vmem:[#allocation2 + $0xa4] sm:$0xff]  ;;  %v4070_v16 = vshrl.u32 %v3831_v5, 16  ;;  %v4866_v31 = vld [vmem:[#allocation2 + $0xbc] sm:$0x1] }
 0x211   : > { %6102 = vmatmul.msk.bf16.gmra.mxu0 %vm800_vm5, %v5310_v4  ;;  %v7534_v0 = vrot.slane %v5111_v21, 5  ;;  %v5117_v20 = vrot.slane %v5115_v32, 4  ;;  %v4068_v51 = vsel %vm6261_vm4, %v4060_v25, %v4067_v27  ;;  %v4078_v39 = vshll.u32 %v7516_v23, 16 }
 0x212   : > { %3078 = vst.msk [vmem:[#allocation3 + $0xe0] sm:$0xff] %vm942_vm11, %v3046_v29  ;;  %v3387_v17 = vor.u32 %v3386_v2, %v7510_v57  ;;  %v3115_v29 = vld [vmem:[#allocation2 + $0xc4] sm:$0xf]  ;;  %v5311_v14 = vpack.c.b16 %v5288_v50, %v7523_v63  ;;  %v4086_v58 = vrot.slane %v4084_v12, 7  ;;  %v3383_v46 = vsel %vm6536_vm10, %v7526_v41, %v7510_v57  ;;  %v4868_v12 = vld [vmem:[#allocation2 + $0xc8] sm:$0xf] }
 0x213   : > { %v1947_v40 = vpop.f32.mrf.mxu2  ;;  %v3626_v42 = vpop.f32.mrf.mxu1  ;;  %v5118_v25 = vor.u32 %v5117_v20, %v7534_v0  ;;  %v3395_v3 = vshrl.u32 %v3115_v29, 16  ;;  %v3398_v43 = vshll.u32 %v3115_v29, 16  ;;  %v7581_v20 = vld [vmem:[#allocation2 + $0xd4] sm:$0xf] }
 0x214   : > { %v2013_v22 = vadd.f32 %v1981_v35, %v1947_v40  ;;  %v3737_v56 = vadd.f32 %v3705_v33, %v3626_v42  ;;  %v3706_v35 = vld [vmem:[#allocation3 + $0x10] sm:$0xff]  ;;  %v3388_v19 = vrot.slane %v3387_v17, 4  ;;  %v5121_v42 = vshll.u32 %v4866_v31, 16  ;;  %v3116_v33 = vld [vmem:[#allocation2 + $0xc8] sm:$0xf] }
 0x215   : > { %v2666_v55 = vld [vmem:[#allocation3 + $0xf0] sm:$0xff]  ;;  %v2633_v52 = vpop.f32.mrf.mxu3  ;;  %v3404_v60 = vshll.u32 %v3116_v33, 16  ;;  %v3397_v5 = vrot.slane %v3395_v3, 4  ;;  %v3400_v21 = vrot.slane %v3398_v43, 5  ;;  %v7569_v17 = vunpack.c.l.b16 %v3383_v46 }
 0x216   : > { %v2698_v48 = vadd.f32 %v2666_v55, %v2631_v59  ;;  %2045 = vst.msk [vmem:[#allocation3 + $0xf8] sm:$0xff] %vm942_vm11, %v2013_v22  ;;  %v7521_v61 = vpop.f32.mrf.mxu0  ;;  %v4075_v59 = vshrl.u32 %v7516_v23, 16  ;;  %v4391_v26 = vld [vmem:[#allocation3] sm:$0xff]  ;;  %v4222_v22 = vunpack.c.l.b16 %v4068_v51  ;;  %v3393_v23 = vsel %vm6536_vm10, %v3388_v19, %v3392_v24 }
 0x217   : > { %v3015_v6 = vld [vmem:[#allocation3 + $0xe8] sm:$0xff]  ;;  %3769 = vst.msk [vmem:[#allocation3 + $0x8] sm:$0xff] %vm942_vm11, %v3737_v56  ;;  %v7561_v55 = vrot.slane %v4070_v16, 11  ;;  %v5123_v63 = vrot.slane %v5121_v42, 5  ;;  %v3401_v31 = vor.u32 %v3400_v21, %v3397_v5  ;;  %v7588_v29 = vrot.slane %v3404_v60, 5 }
 0x218   : > { %2730 = vst.msk [vmem:[#allocation3 + $0xf0] sm:$0xff] %vm942_vm11, %v2698_v48  ;;  %v3047_v4 = vadd.f32 %v3015_v6, %v7458_v28  ;;  %6005 = vmatmul.msk.bf16.gmra.mxu2 %vm800_vm5, %v4243_v36  ;;  %v4059_v28 = vsel %vm6261_vm4, %v7496_v38, %v7504_v45  ;;  %v4077_v18 = vrot.slane %v4075_v59, 7  ;;  %v4087_v36 = vshll.u32 %v7518_v8, 16  ;;  %v4867_v48 = vld [vmem:[#allocation2 + $0xc4] sm:$0xf]  ;;  %v3707_v6 = vld [vmem:[#allocation3 + $0x18] sm:$0xff] }
 0x219   : > { %v5108_v38 = vor.u32 %v5107_v62, %v5104_v13  ;;  %v4221_v44 = vunpack.c.l.b16 %v4059_v28  ;;  %v3117_v59 = vld [vmem:[#allocation2 + $0xcc] sm:$0x1]  ;;  %v5126_v13 = vshrl.u32 %v4867_v48, 16  ;;  %v7598_v43 = vrot.slane %v3401_v31, 4  ;;  %v7610_v60 = vld [vmem:[#allocation2 + $0xd8] sm:$0xf] }
 0x21a   : > { %3079 = vst.msk [vmem:[#allocation3 + $0xe8] sm:$0xff] %vm942_vm11, %v3047_v4  ;;  %6086 = vmatmul.msk.bf16.gmra.mxu3 %vm800_vm5, %v6155_v11  ;;  %v4082_v27 = vrot.slane %v4077_v18, 4  ;;  %v4089_v8 = vor.u32 %v4087_v36, %v4086_v58  ;;  %v5119_v11 = vrot.slane %v5118_v25, 4  ;;  %v3408_v4 = vshrl.u32 %v3116_v33, 16 }
 0x21b   : > { %v4311_v34 = vpop.f32.mrf.mxu2  ;;  %v3629_v1 = vpop.f32.mrf.mxu1  ;;  %v5109_v49 = vrot.slane %v5108_v38, 4  ;;  %v4244_v32 = vpack.c.b16 %v4222_v22, %v4221_v44  ;;  %v3414_v19 = vshll.u32 %v3117_v59, 16  ;;  %v5135_v36 = vshll.u32 %v4868_v12, 16 }
 0x21c   : > { %v4423_v37 = vadd.f32 %v4391_v26, %v4311_v34  ;;  %v3738_v53 = vadd.f32 %v3706_v35, %v3629_v1  ;;  %v7579_v16 = vsel %vm6261_vm4, %v4082_v27, %v4089_v8  ;;  %v3834_v34 = vld [vmem:[#allocation2 + $0xd0] sm:$0x8]  ;;  %v6156_v35 = vld [vmem:[#allocation2 + $0xb4] sm:$0xff]  ;;  %v5128_v58 = vrot.slane %v5126_v13, 4  ;;  %v3708_v8 = vld [vmem:[#allocation3 + $0x20] sm:$0xff] }
 0x21d   : > { %v2667_v45 = vld [vmem:[#allocation3 + $0xf8] sm:$0xff]  ;;  %v4661_v40 = vpop.f32.mrf.mxu3  ;;  %v5114_v51 = vsel %vm6536_vm10, %v5109_v49, %v7534_v0  ;;  %v3410_v0 = vrot.slane %v3408_v4, 4  ;;  %v5139_v38 = vshrl.u32 %v4868_v12, 16  ;;  %v4092_v25 = vshrl.u32 %v3834_v34, 16 }
 0x21e   : > { %v2699_v2 = vadd.f32 %v2667_v45, %v2633_v52  ;;  %4455 = vst.msk [vmem:[#allocation3] sm:$0xff] %vm942_vm11, %v4423_v37  ;;  %5973 = vmatmul.msk.bf16.gmra.mxu1 %vm800_vm5, %v3557_v30  ;;  %v7552_v56 = vpop.f32.mrf.mxu0  ;;  %v7563_v52 = vor.u32 %v4078_v39, %v4077_v18  ;;  %v4392_v57 = vld [vmem:[#allocation3 + $0x8] sm:$0xff]  ;;  %v5124_v39 = vsel %vm6536_vm10, %v5119_v11, %v5123_v63  ;;  %v5129_v18 = vshll.u32 %v4867_v48, 16 }
 0x21f   : > { %v3016_v47 = vld [vmem:[#allocation3 + $0xf0] sm:$0xff]  ;;  %3770 = vst.msk [vmem:[#allocation3 + $0x10] sm:$0xff] %vm942_vm11, %v3738_v53  ;;  %v4097_v53 = vshrl.u32 %v7581_v20, 16  ;;  %v5290_v3 = vunpack.c.l.b16 %v5124_v39  ;;  %v7600_v44 = vrot.slane %v5135_v36, 5  ;;  %v5141_v22 = vrot.slane %v5139_v38, 4 }
 0x220   : > { %2731 = vst.msk [vmem:[#allocation3 + $0xf8] sm:$0xff] %vm942_vm11, %v2699_v2  ;;  %v3048_v54 = vadd.f32 %v3016_v47, %v7484_v9  ;;  %v7571_v9 = vunpack.c.l.b16 %v3393_v23  ;;  %v4081_v24 = vsel %vm6261_vm4, %v7561_v55, %v7563_v52  ;;  %v5131_v42 = vrot.slane %v5129_v18, 5  ;;  %v4869_v2 = vld [vmem:[#allocation2 + $0xcc] sm:$0x1]  ;;  %v3118_v55 = vld [vmem:[#allocation2 + $0xd4] sm:$0xf] }
 0x221   : > { %6103 = vmatmul.msk.bf16.gmra.mxu0 %vm800_vm5, %v5311_v14  ;;  %v4223_v46 = vunpack.c.l.b16 %v4081_v24  ;;  %v4224_v47 = vunpack.c.l.b16 %v7579_v16  ;;  %v7607_v23 = vrot.slane %v3414_v19, 5  ;;  %v3119_v52 = vld [vmem:[#allocation2 + $0xd8] sm:$0xf]  ;;  %v3411_v49 = vor.u32 %v3410_v0, %v7588_v29  ;;  %v3120_v0 = vld [vmem:[#allocation2 + $0xdc] sm:$0x1] }
 0x222   : > { %3080 = vst.msk [vmem:[#allocation3 + $0xf0] sm:$0xff] %vm942_vm11, %v3048_v54  ;;  %v7612_v48 = vrot.slane %v4097_v53, 7  ;;  %v5132_v11 = vor.u32 %v5131_v42, %v5128_v58  ;;  %v3419_v21 = vshrl.u32 %v3118_v55, 16  ;;  %v3428_v59 = vshll.u32 %v3119_v52, 16  ;;  %v4870_v53 = vld [vmem:[#allocation2 + $0xd4] sm:$0xf] }
 0x223   : > { %v4313_v50 = vpop.f32.mrf.mxu2  ;;  %v3631_v41 = vpop.f32.mrf.mxu1  ;;  %v5991_v13 = vrot.slane %v4092_v25, 11  ;;  %v3407_v16 = vsel %vm6536_vm10, %v7598_v43, %v7588_v29  ;;  %v4245_v36 = vpack.c.b16 %v4224_v47, %v4223_v46 }
 0x224   : > { %v4424_v62 = vadd.f32 %v4392_v57, %v4313_v50  ;;  %v3739_v26 = vadd.f32 %v3707_v6, %v3631_v41  ;;  %v4100_v57 = vshll.u32 %v7581_v20, 16  ;;  %v3412_v20 = vrot.slane %v3411_v49, 4 }
 0x225   : > { %v4741_v30 = vld [vmem:[#allocation3] sm:$0xff]  ;;  %v4663_v28 = vpop.f32.mrf.mxu3  ;;  %v5133_v39 = vrot.slane %v5132_v11, 4  ;;  %v3421_v31 = vrot.slane %v3419_v21, 4  ;;  %v7631_v18 = vrot.slane %v3428_v59, 5  ;;  %v4104_v42 = vrot.slane %v7612_v48, 4 }
 0x226   : > { %v4773_v1 = vadd.f32 %v4741_v30, %v4661_v40  ;;  %4456 = vst.msk [vmem:[#allocation3 + $0x8] sm:$0xff] %vm942_vm11, %v4424_v62  ;;  %v7591_v14 = vpop.f32.mrf.mxu0  ;;  %v5289_v40 = vunpack.c.l.b16 %v5114_v51  ;;  %v4393_v33 = vld [vmem:[#allocation3 + $0x10] sm:$0xff]  ;;  %v4106_v62 = vshrl.u32 %v7610_v60, 16  ;;  %v4102_v30 = vor.u32 %v4100_v57, %v7612_v48  ;;  %v7664_v21 = vld [vmem:[#allocation2 + $0xe8] sm:$0xf] }
 0x227   : > { %v3017_v37 = vld [vmem:[#allocation3 + $0xf8] sm:$0xff]  ;;  %3771 = vst.msk [vmem:[#allocation3 + $0x18] sm:$0xff] %vm942_vm11, %v3739_v26  ;;  %v3432_v26 = vshrl.u32 %v3119_v52, 16  ;;  %v5138_v43 = vsel %vm6536_vm10, %v5133_v39, %v7600_v44  ;;  %v3438_v52 = vshll.u32 %v3120_v0, 16  ;;  %v5153_v57 = vshll.u32 %v4870_v53, 16 }
 0x228   : > { %4805 = vst.msk [vmem:[#allocation3] sm:$0xff] %vm942_vm11, %v4773_v1  ;;  %v3049_v45 = vadd.f32 %v3017_v37, %v7521_v61  ;;  %6006 = vmatmul.msk.bf16.gmra.mxu2 %vm800_vm5, %v4244_v32  ;;  %v3558_v61 = vpack.c.b16 %v7571_v9, %v7569_v17  ;;  %v3422_v32 = vshll.u32 %v3118_v55, 16  ;;  %v5312_v41 = vpack.c.b16 %v5290_v3, %v5289_v40 }
 0x229   : > { %v5142_v17 = vor.u32 %v5141_v22, %v7600_v44  ;;  %v5145_v9 = vshll.u32 %v4869_v2, 16  ;;  %v3434_v29 = vrot.slane %v3432_v26, 4  ;;  %v4108_v37 = vrot.slane %v4106_v62, 7  ;;  %v7645_v22 = vld [vmem:[#allocation2 + $0xe4] sm:$0xf] }
 0x22a   : > { %3081 = vst.msk [vmem:[#allocation3 + $0xf8] sm:$0xff] %vm942_vm11, %v3049_v45  ;;  %6087 = vmatmul.msk.bf16.gmra.mxu3 %vm800_vm5, %v6156_v35  ;;  %v3424_v34 = vrot.slane %v3422_v32, 5  ;;  %v3417_v45 = vsel %vm6536_vm10, %v3412_v20, %v7607_v23  ;;  %v7637_v40 = vunpack.c.l.b16 %v3407_v16  ;;  %v4103_v25 = vsel %vm6261_vm4, %v5991_v13, %v4102_v30  ;;  %v4872_v30 = vld [vmem:[#allocation2 + $0xdc] sm:$0x1] }
 0x22b   : > { %v4316_v27 = vpop.f32.mrf.mxu2  ;;  %v3634_v54 = vpop.f32.mrf.mxu1  ;;  %v5143_v35 = vrot.slane %v5142_v17, 4  ;;  %v5147_v19 = vrot.slane %v5145_v9, 5  ;;  %v3435_v55 = vor.u32 %v3434_v29, %v7631_v18  ;;  %v4119_v32 = vshrl.u32 %v7645_v22, 16  ;;  %v3837_v9 = vld [vmem:[#allocation2 + $0xe0] sm:$0x8] }
 0x22c   : > { %v4425_v63 = vadd.f32 %v4393_v33, %v4316_v27  ;;  %v3740_v5 = vadd.f32 %v3708_v8, %v3634_v54  ;;  %v3425_v2 = vor.u32 %v3424_v34, %v3421_v31  ;;  %v5150_v27 = vshrl.u32 %v4870_v53, 16  ;;  %v7654_v54 = vld [vmem:[%s8095_s2] ss:$0 sm:$0xff]  ;;  %v6157_v8 = vld [vmem:[#allocation2 + $0xc4] sm:$0xff]  ;;  %v3710_v34 = vld [vmem:[#allocation3 + $0x30] sm:$0xff] }
 0x22d   : > { %v4742_v6 = vld [vmem:[#allocation3 + $0x8] sm:$0xff]  ;;  %v4666_v50 = vpop.f32.mrf.mxu3  ;;  %v5148_v23 = vsel %vm6536_vm10, %v5143_v35, %v5147_v19  ;;  %v3436_v62 = vrot.slane %v3435_v55, 4  ;;  %v3440_v26 = vrot.slane %v3438_v52, 5  ;;  %v5155_v16 = vrot.slane %v5153_v57, 5 }
 0x22e   : > { %v4774_v4 = vadd.f32 %v4742_v6, %v4663_v28  ;;  %4457 = vst.msk [vmem:[#allocation3 + $0x10] sm:$0xff] %vm942_vm11, %v4425_v63  ;;  %5974 = vmatmul.msk.bf16.gmra.mxu1 %vm800_vm5, %v3558_v61  ;;  %v7618_v12 = vpop.f32.mrf.mxu0  ;;  %v4109_v28 = vshll.u32 %v7610_v60, 16  ;;  %v4394_v1 = vld [vmem:[#allocation3 + $0x18] sm:$0xff]  ;;  %v3539_v60 = vunpack.c.l.b16 %v3417_v45  ;;  %v7660_v63 = vunpack.c.l.b16 %v4103_v25 }
 0x22f   : > { %v5459_v24 = vld [vmem:[#allocation3] sm:$0xff]  ;;  %3772 = vst.msk [vmem:[#allocation3 + $0x20] sm:$0xff] %vm942_vm11, %v3740_v5  ;;  %v4871_v61 = vld [vmem:[#allocation2 + $0xd8] sm:$0xf]  ;;  %v7662_v5 = vunpack.c.l.b16 %v5138_v43  ;;  %v3426_v17 = vrot.slane %v3425_v2, 4  ;;  %v4114_v35 = vshrl.u32 %v3837_v9, 16  ;;  %v3441_v25 = vsel %vm6536_vm10, %v3436_v62, %v3440_v26 }
 0x230   : > { %4806 = vst.msk [vmem:[#allocation3 + $0x8] sm:$0xff] %vm942_vm11, %v4774_v4  ;;  %v5491_v51 = vadd.f32 %v5459_v24, %v7552_v56  ;;  %v3709_v56 = vld [vmem:[#allocation3 + $0x28] sm:$0xff]  ;;  %v4111_v48 = vor.u32 %v4109_v28, %v4108_v37  ;;  %v5159_v6 = vshll.u32 %v4871_v61, 16  ;;  %v5163_v59 = vshrl.u32 %v4871_v61, 16  ;;  %v7719_v62 = vld [vmem:[#allocation2 + $0xf4] sm:$0xf] }
 0x231   : > { %6104 = vmatmul.msk.bf16.gmra.mxu0 %vm800_vm5, %v5312_v41  ;;  %v5292_v41 = vunpack.c.l.b16 %v5148_v23  ;;  %v5152_v24 = vrot.slane %v5150_v27, 4  ;;  %v3559_v20 = vpack.c.b16 %v3539_v60, %v7637_v40  ;;  %v7683_v19 = vrot.slane %v4119_v32, 7  ;;  %v4873_v26 = vld [vmem:[#allocation2 + $0xe4] sm:$0xf] }
 0x232   : > { %5523 = vst.msk [vmem:[#allocation3] sm:$0xff] %vm942_vm11, %v5491_v51  ;;  %v7679_v28 = vrot.slane %v5159_v6, 5  ;;  %v5165_v51 = vrot.slane %v5163_v59, 4  ;;  %v4122_v29 = vshll.u32 %v7645_v22, 16  ;;  %v3431_v40 = vsel %vm6536_vm10, %v3426_v17, %v7631_v18 }
 0x233   : > { %v4318_v58 = vpop.f32.mrf.mxu2  ;;  %v3636_v38 = vpop.f32.mrf.mxu1  ;;  %v5313_v53 = vpack.c.b16 %v5292_v41, %v7662_v5  ;;  %v7701_v23 = vrot.slane %v4114_v35, 11  ;;  %v7708_v27 = vunpack.c.l.b16 %v3431_v40  ;;  %v7711_v57 = vunpack.c.l.b16 %v3441_v25 }
 0x234   : > { %v4426_v33 = vadd.f32 %v4394_v1, %v4318_v58  ;;  %v3741_v3 = vadd.f32 %v3709_v56, %v3636_v38  ;;  %v4112_v1 = vsel %vm6261_vm4, %v4104_v42, %v4111_v48  ;;  %v4128_v58 = vshrl.u32 %v7664_v21, 16  ;;  %v3122_v38 = vld [vmem:[#allocation2 + $0xe8] sm:$0xf] }
 0x235   : > { %v4743_v46 = vld [vmem:[#allocation3 + $0x10] sm:$0xff]  ;;  %v4668_v47 = vpop.f32.mrf.mxu3  ;;  %v5156_v42 = vor.u32 %v5155_v16, %v5152_v24  ;;  %v5166_v2 = vor.u32 %v5165_v51, %v7679_v28  ;;  %v4226_v18 = vunpack.c.l.b16 %v4112_v1  ;;  %v7704_v55 = vor.u32 %v4122_v29, %v7683_v19 }
 0x236   : > { %v4775_v44 = vadd.f32 %v4743_v46, %v4666_v50  ;;  %4458 = vst.msk [vmem:[#allocation3 + $0x18] sm:$0xff] %vm942_vm11, %v4426_v33  ;;  %v7657_v49 = vpop.f32.mrf.mxu0  ;;  %v4395_v13 = vld [vmem:[#allocation3 + $0x20] sm:$0xff]  ;;  %v5169_v33 = vshll.u32 %v4872_v30, 16  ;;  %v4874_v30 = vld [vmem:[#allocation2 + $0xe8] sm:$0xf] }
 0x237   : > { %v5460_v11 = vld [vmem:[#allocation3 + $0x8] sm:$0xff]  ;;  %3773 = vst.msk [vmem:[#allocation3 + $0x28] sm:$0xff] %vm942_vm11, %v3741_v3  ;;  %v5157_v5 = vrot.slane %v5156_v42, 4  ;;  %v4246_v24 = vpack.c.b16 %v4226_v18, %v7660_v63  ;;  %v5183_v40 = vshll.u32 %v4874_v30, 16  ;;  %v3840_v42 = vld [vmem:[#allocation2 + $0xf0] sm:$0x8] }
 0x238   : > { %4807 = vst.msk [vmem:[#allocation3 + $0x10] sm:$0xff] %vm942_vm11, %v4775_v44  ;;  %v5492_v50 = vadd.f32 %v5460_v11, %v7591_v14  ;;  %6007 = vmatmul.msk.bf16.gmra.mxu2 %vm800_vm5, %v4245_v36  ;;  %v3121_v36 = vld [vmem:[#allocation2 + $0xe4] sm:$0xf]  ;;  %v4130_v44 = vrot.slane %v4128_v58, 7  ;;  %v4131_v11 = vshll.u32 %v7664_v21, 16  ;;  %v5171_v32 = vrot.slane %v5169_v33, 5 }
 0x239   : > { %v5555_v4 = vld [vmem:[#allocation3] sm:$0xff]  ;;  %v3443_v22 = vshrl.u32 %v3121_v36, 16  ;;  %v3446_v61 = vshll.u32 %v3121_v36, 16  ;;  %v5162_v35 = vsel %vm6536_vm10, %v5157_v5, %v7679_v28  ;;  %v7744_v33 = vld [vmem:[#allocation2 + $0xf8] sm:$0xf] }
 0x23a   : > { %v5591_v14 = vadd.f32 %v7654_v54, %v5555_v4  ;;  %5524 = vst.msk [vmem:[#allocation3 + $0x8] sm:$0xff] %vm942_vm11, %v5492_v50  ;;  %6088 = vmatmul.msk.bf16.gmra.mxu3 %vm800_vm5, %v6157_v8  ;;  %v3456_v8 = vshrl.u32 %v3122_v38, 16  ;;  %v5167_v50 = vrot.slane %v5166_v2, 4  ;;  %v4126_v4 = vrot.slane %v7683_v19, 4  ;;  %v6158_v19 = vld [vmem:[#allocation2 + $0xd4] sm:$0xff] }
 0x23b   : > { %v4321_v39 = vpop.f32.mrf.mxu2  ;;  %v3639_v31 = vpop.f32.mrf.mxu1  ;;  %v3445_v41 = vrot.slane %v3443_v22, 4  ;;  %v3448_v17 = vrot.slane %v3446_v61, 5  ;;  %v4133_v1 = vor.u32 %v4131_v11, %v4130_v44  ;;  %v4150_v5 = vshrl.u32 %v7744_v33, 16 }
 0x23c   : > { %5623 = vst.msk [vmem:[%s7673_s15] sm:$0xff] %vm942_vm11, %v5591_v14  ;;  %v4427_v37 = vadd.f32 %v4395_v13, %v4321_v39  ;;  %v3742_v0 = vadd.f32 %v3710_v34, %v3639_v31  ;;  %v3123_v14 = vld [vmem:[#allocation2 + $0xec] sm:$0x1]  ;;  %v3560_v31 = vpack.c.b16 %v7711_v57, %v7708_v27  ;;  %v4125_v34 = vsel %vm6261_vm4, %v7701_v23, %v7704_v55 }
 0x23d   : > { %v4744_v56 = vld [vmem:[#allocation3 + $0x18] sm:$0xff]  ;;  %v4671_v45 = vpop.f32.mrf.mxu3  ;;  %v5172_v36 = vsel %vm6536_vm10, %v5167_v50, %v5171_v32  ;;  %v3462_v58 = vshll.u32 %v3123_v14, 16  ;;  %v7746_v23 = vrot.slane %v5183_v40, 5  ;;  %v4136_v57 = vshrl.u32 %v3840_v42, 16 }
 0x23e   : > { %v4776_v3 = vadd.f32 %v4744_v56, %v4668_v47  ;;  %4459 = vst.msk [vmem:[#allocation3 + $0x20] sm:$0xff] %vm942_vm11, %v4427_v37  ;;  %5975 = vmatmul.msk.bf16.gmra.mxu1 %vm800_vm5, %v3559_v20  ;;  %v7697_v43 = vpop.f32.mrf.mxu0  ;;  %v3452_v47 = vshll.u32 %v3122_v38, 16  ;;  %v4396_v48 = vld [vmem:[#allocation3 + $0x28] sm:$0xff]  ;;  %v3458_v20 = vrot.slane %v3456_v8, 4  ;;  %v3449_v37 = vor.u32 %v3448_v17, %v3445_v41  ;;  %v3124_v41 = vld [vmem:[#allocation2 + $0xf4] sm:$0xf] }
 0x23f   : > { %v5461_v46 = vld [vmem:[#allocation3 + $0x10] sm:$0xff]  ;;  %3774 = vst.msk [vmem:[#allocation3 + $0x30] sm:$0xff] %vm942_vm11, %v3742_v0  ;;  %v5174_v0 = vshrl.u32 %v4873_v26, 16  ;;  %v4141_v38 = vshrl.u32 %v7719_v62, 16  ;;  %v5177_v56 = vshll.u32 %v4873_v26, 16  ;;  %v5294_v61 = vunpack.c.l.b16 %v5172_v36 }
 0x240   : > { %4808 = vst.msk [vmem:[#allocation3 + $0x18] sm:$0xff] %vm942_vm11, %v4776_v3  ;;  %v5493_v52 = vadd.f32 %v5461_v46, %v7618_v12  ;;  %v3711_v12 = vld [vmem:[#allocation3 + $0x38] sm:$0xff]  ;;  %v7717_v13 = vrot.slane %v3452_v47, 5  ;;  %v5187_v3 = vshrl.u32 %v4874_v30, 16  ;;  %v3450_v47 = vrot.slane %v3449_v37, 4 }
 0x241   : > { %v5556_v60 = vld [vmem:[#allocation3 + $0x8] sm:$0xff]  ;;  %6105 = vmatmul.msk.bf16.gmra.mxu0 %vm800_vm5, %v5313_v53  ;;  %v5176_v46 = vrot.slane %v5174_v0, 4  ;;  %v5179_v18 = vrot.slane %v5177_v56, 5  ;;  %v7755_v11 = vrot.slane %v4141_v38, 7  ;;  %v4144_v50 = vshll.u32 %v7719_v62, 16 }
 0x242   : > { %v5592_v6 = vadd.f32 %v7654_v54, %v5556_v60  ;;  %5525 = vst.msk [vmem:[#allocation3 + $0x10] sm:$0xff] %vm942_vm11, %v5493_v52  ;;  %v3459_v25 = vor.u32 %v3458_v20, %v7717_v13  ;;  %v4875_v52 = vld [vmem:[#allocation2 + $0xec] sm:$0x1]  ;;  %v5189_v27 = vrot.slane %v5187_v3, 4  ;;  %v3712_v60 = vld [vmem:[#allocation3 + $0x40] sm:$0xff]  ;;  %v3455_v62 = vsel %vm6536_vm10, %v3450_v47, %v7717_v13 }
 0x243   : > { %v4323_v9 = vpop.f32.mrf.mxu2  ;;  %v3641_v59 = vpop.f32.mrf.mxu1  ;;  %v3125_v30 = vld [vmem:[#allocation2 + $0xf8] sm:$0xf]  ;;  %v4146_v36 = vor.u32 %v4144_v50, %v7755_v11  ;;  %v4148_v40 = vrot.slane %v7755_v11, 4 }
 0x244   : > { %5624 = vst.msk [vmem:[%s7673_s15 + $0x8] sm:$0xff] %vm942_vm11, %v5592_v6  ;;  %v4428_v21 = vadd.f32 %v4396_v48, %v4323_v9  ;;  %v3743_v16 = vadd.f32 %v3711_v12, %v3641_v59  ;;  %v3464_v48 = vrot.slane %v3462_v58, 5  ;;  %v3460_v12 = vrot.slane %v3459_v25, 4 }
 0x245   : > { %v4745_v51 = vld [vmem:[#allocation3 + $0x20] sm:$0xff]  ;;  %v4673_v39 = vpop.f32.mrf.mxu3  ;;  %v5190_v26 = vor.u32 %v5189_v27, %v7746_v23  ;;  %v3476_v38 = vshll.u32 %v3125_v30, 16 }
 0x246   : > { %v4777_v63 = vadd.f32 %v4745_v51, %v4671_v45  ;;  %4460 = vst.msk [vmem:[#allocation3 + $0x28] sm:$0xff] %vm942_vm11, %v4428_v21  ;;  %v7734_v29 = vpop.f32.mrf.mxu0  ;;  %v5293_v45 = vunpack.c.l.b16 %v5162_v35  ;;  %v4397_v22 = vld [vmem:[#allocation3 + $0x30] sm:$0xff]  ;;  %v5193_v21 = vshll.u32 %v4875_v52, 16  ;;  %v3467_v35 = vshrl.u32 %v3124_v41, 16 }
 0x247   : > { %v5462_v53 = vld [vmem:[#allocation3 + $0x18] sm:$0xff]  ;;  %3775 = vst.msk [vmem:[#allocation3 + $0x38] sm:$0xff] %vm942_vm11, %v3743_v16  ;;  %v4227_v16 = vunpack.c.l.b16 %v4125_v34  ;;  %v3465_v34 = vsel %vm6536_vm10, %v3460_v12, %v3464_v48  ;;  %v7794_v48 = vrot.slane %v3476_v38, 5 }
 0x248   : > { %4809 = vst.msk [vmem:[#allocation3 + $0x20] sm:$0xff] %vm942_vm11, %v4777_v63  ;;  %v5494_v28 = vadd.f32 %v5462_v53, %v7657_v49  ;;  %6008 = vmatmul.msk.bf16.gmra.mxu2 %vm800_vm5, %v4246_v24  ;;  %v7753_v49 = vsel %vm6261_vm4, %v4126_v4, %v4133_v1  ;;  %v5314_v59 = vpack.c.b16 %v5294_v61, %v5293_v45  ;;  %v4152_v1 = vrot.slane %v4150_v5, 7  ;;  %v4876_v45 = vld [vmem:[#allocation2 + $0xf4] sm:$0xf]  ;;  %v6159_v5 = vld [vmem:[#allocation2 + $0xe4] sm:$0xff] }
 0x249   : > { %v5557_v2 = vld [vmem:[#allocation3 + $0x10] sm:$0xff]  ;;  %v5180_v4 = vor.u32 %v5179_v18, %v5176_v46  ;;  %v4228_v14 = vunpack.c.l.b16 %v7753_v49  ;;  %v3470_v63 = vshll.u32 %v3124_v41, 16  ;;  %v5191_v53 = vrot.slane %v5190_v26, 4  ;;  %v4877_v46 = vld [vmem:[#allocation2 + $0xf8] sm:$0xf] }
 0x24a   : > { %v5593_v55 = vadd.f32 %v7654_v54, %v5557_v2  ;;  %5526 = vst.msk [vmem:[#allocation3 + $0x18] sm:$0xff] %vm942_vm11, %v5494_v28  ;;  %6089 = vmatmul.msk.bf16.gmra.mxu3 %vm800_vm5, %v6158_v19  ;;  %v5993_v19 = vrot.slane %v4136_v57, 11  ;;  %v5195_v58 = vrot.slane %v5193_v21, 5  ;;  %v3480_v28 = vshrl.u32 %v3125_v30, 16  ;;  %v7806_v26 = vld [vmem:[#allocation2 + $0x108] sm:$0xf] }
 0x24b   : > { %v4326_v44 = vpop.f32.mrf.mxu2  ;;  %v3644_v8 = vpop.f32.mrf.mxu1  ;;  %v5181_v0 = vrot.slane %v5180_v4, 4  ;;  %v7783_v3 = vunpack.c.l.b16 %v3465_v34  ;;  %v3472_v61 = vrot.slane %v3470_v63, 5  ;;  %v5198_v57 = vshrl.u32 %v4876_v45, 16  ;;  %v307_v30 = vld [vmem:[#allocation2 + $0x10c] sm:$0x1] }
 0x24c   : > { %5625 = vst.msk [vmem:[%s7673_s15 + $0x10] sm:$0xff] %vm942_vm11, %v5593_v55  ;;  %v4429_v32 = vadd.f32 %v4397_v22, %v4326_v44  ;;  %v3744_v6 = vadd.f32 %v3712_v60, %v3644_v8  ;;  %v3469_v22 = vrot.slane %v3467_v35, 4  ;;  %v4247_v55 = vpack.c.b16 %v4228_v14, %v4227_v16  ;;  %v3126_v60 = vld [vmem:[#allocation2 + $0xfc] sm:$0x1] }
 0x24d   : > { %v4746_v17 = vld [vmem:[#allocation3 + $0x28] sm:$0xff]  ;;  %v4676_v9 = vpop.f32.mrf.mxu3  ;;  %v4147_v47 = vsel %vm6261_vm4, %v5993_v19, %v4146_v36  ;;  %v5186_v44 = vsel %vm6536_vm10, %v5181_v0, %v7746_v23  ;;  %v5196_v8 = vsel %vm6536_vm10, %v5191_v53, %v5195_v58  ;;  %v5201_v12 = vshll.u32 %v4876_v45, 16  ;;  %v3714_v53 = vld [vmem:[#allocation3 + $0x50] sm:$0xff] }
 0x24e   : > { %v4778_v24 = vadd.f32 %v4746_v17, %v4673_v39  ;;  %4461 = vst.msk [vmem:[#allocation3 + $0x30] sm:$0xff] %vm942_vm11, %v4429_v32  ;;  %5976 = vmatmul.msk.bf16.gmra.mxu1 %vm800_vm5, %v3560_v31  ;;  %v7765_v20 = vpop.f32.mrf.mxu0  ;;  %v4153_v39 = vshll.u32 %v7744_v33, 16  ;;  %v4398_v37 = vld [vmem:[#allocation3 + $0x38] sm:$0xff]  ;;  %v3713_v33 = vld [vmem:[#allocation3 + $0x48] sm:$0xff]  ;;  %v5207_v50 = vshll.u32 %v4877_v46, 16  ;;  %v3473_v4 = vor.u32 %v3472_v61, %v3469_v22 }
 0x24f   : > { %v5463_v51 = vld [vmem:[#allocation3 + $0x20] sm:$0xff]  ;;  %3776 = vst.msk [vmem:[#allocation3 + $0x40] sm:$0xff] %vm942_vm11, %v3744_v6  ;;  %v3482_v6 = vrot.slane %v3480_v28, 4  ;;  %v5296_v16 = vunpack.c.l.b16 %v5196_v8  ;;  %v3486_v14 = vshll.u32 %v3126_v60, 16  ;;  %v5203_v35 = vrot.slane %v5201_v12, 5 }
 0x250   : > { %4810 = vst.msk [vmem:[#allocation3 + $0x28] sm:$0xff] %vm942_vm11, %v4778_v24  ;;  %v5495_v31 = vadd.f32 %v5463_v51, %v7697_v43  ;;  %v7780_v43 = vunpack.c.l.b16 %v3455_v62  ;;  %v4155_v2 = vor.u32 %v4153_v39, %v4152_v1  ;;  %v5295_v24 = vunpack.c.l.b16 %v5186_v44  ;;  %v7811_v62 = vld [vmem:[#allocation2 + $0x100] sm:$0x8] }
 0x251   : > { %v5558_v13 = vld [vmem:[#allocation3 + $0x18] sm:$0xff]  ;;  %6106 = vmatmul.msk.bf16.gmra.mxu0 %vm800_vm5, %v5314_v59  ;;  %v4229_v59 = vunpack.c.l.b16 %v4147_v47  ;;  %v5200_v39 = vrot.slane %v5198_v57, 4  ;;  %v7813_v63 = vrot.slane %v5207_v50, 5  ;;  %v3483_v19 = vor.u32 %v3482_v6, %v7794_v48  ;;  %v3128_v57 = vld [vmem:[#allocation2 + $0x108] sm:$0xf] }
 0x252   : > { %v5594_v56 = vadd.f32 %v7654_v54, %v5558_v13  ;;  %5527 = vst.msk [vmem:[#allocation3 + $0x20] sm:$0xff] %vm942_vm11, %v5495_v31  ;;  %v3561_v23 = vpack.c.b16 %v7783_v3, %v7780_v43  ;;  %v4156_v17 = vsel %vm6261_vm4, %v4148_v40, %v4155_v2  ;;  %v5211_v31 = vshrl.u32 %v4877_v46, 16  ;;  %v4878_v13 = vld [vmem:[#allocation2 + $0xfc] sm:$0x1]  ;;  %v3127_v46 = vld [vmem:[#allocation2 + $0x104] sm:$0xf] }
 0x253   : > { %v4328_v25 = vpop.f32.mrf.mxu2  ;;  %v3646_v42 = vpop.f32.mrf.mxu1  ;;  %v3474_v58 = vrot.slane %v3473_v4, 4  ;;  %v4172_v38 = vshrl.u32 %v7806_v26, 16  ;;  %v308_v43 = vsel %vm6501_vm7, 0, %v307_v30  ;;  %v3488_v45 = vrot.slane %v3486_v14, 5 }
 0x254   : > { %5626 = vst.msk [vmem:[%s7673_s15 + $0x18] sm:$0xff] %vm942_vm11, %v5594_v56  ;;  %v4430_v18 = vadd.f32 %v4398_v37, %v4328_v25  ;;  %v3745_v49 = vadd.f32 %v3713_v33, %v3646_v42  ;;  %v5213_v56 = vrot.slane %v5211_v31, 4  ;;  %v4158_v25 = vshrl.u32 %v7811_v62, 16 }
 0x255   : > { %v4747_v52 = vld [vmem:[#allocation3 + $0x30] sm:$0xff]  ;;  %v4678_v27 = vpop.f32.mrf.mxu3  ;;  %v5315_v3 = vpack.c.b16 %v5296_v16, %v5295_v24  ;;  %v5204_v2 = vor.u32 %v5203_v35, %v5200_v39  ;;  %v5217_v61 = vshll.u32 %v4878_v13, 16  ;;  %309 = vst [vmem:[#allocation2 + $0x10c] sm:$0x1] %v308_v43  ;;  %v4174_v8 = vrot.slane %v4172_v38, 7  ;;  %v3715_v16 = vld [vmem:[#allocation3 + $0x58] sm:$0xff] }
 0x256   : > { %v4779_v11 = vadd.f32 %v4747_v52, %v4676_v9  ;;  %4462 = vst.msk [vmem:[#allocation3 + $0x38] sm:$0xff] %vm942_vm11, %v4430_v18  ;;  %v7797_v32 = vpop.f32.mrf.mxu0  ;;  %v7804_v9 = vld [vmem:[#allocation2 + $0x104] sm:$0xf]  ;;  %v5214_v22 = vor.u32 %v5213_v56, %v7813_v63  ;;  %v4175_v60 = vshll.u32 %v7806_v26, 16  ;;  %v3494_v6 = vshll.u32 %v3127_v46, 16 }
 0x257   : > { %v5464_v41 = vld [vmem:[#allocation3 + $0x28] sm:$0xff]  ;;  %3777 = vst.msk [vmem:[#allocation3 + $0x48] sm:$0xff] %vm942_vm11, %v3745_v49  ;;  %v4399_v1 = vld [vmem:[#allocation3 + $0x40] sm:$0xff]  ;;  %v4163_v36 = vshrl.u32 %v7804_v9, 16  ;;  %v3484_v49 = vrot.slane %v3483_v19, 4  ;;  %v4166_v52 = vshll.u32 %v7804_v9, 16 }
 0x258   : > { %4811 = vst.msk [vmem:[#allocation3 + $0x30] sm:$0xff] %vm942_vm11, %v4779_v11  ;;  %v5496_v21 = vadd.f32 %v5464_v41, %v7734_v29  ;;  %6009 = vmatmul.msk.bf16.gmra.mxu2 %vm800_vm5, %v4247_v55  ;;  %v4230_v29 = vunpack.c.l.b16 %v4156_v17  ;;  %v3479_v41 = vsel %vm6536_vm10, %v3474_v58, %v7794_v48  ;;  %v5215_v17 = vrot.slane %v5214_v22, 4  ;;  %v6160_v58 = vld [vmem:[#allocation2 + $0xf4] sm:$0xff] }
 0x259   : > { %v5559_v51 = vld [vmem:[#allocation3 + $0x20] sm:$0xff]  ;;  %v4165_v47 = vrot.slane %v4163_v36, 7  ;;  %v5219_v4 = vrot.slane %v5217_v61, 5  ;;  %v3504_v26 = vshrl.u32 %v3128_v57, 16  ;;  %v5994_v14 = vrot.slane %v4158_v25, 11 }
 0x25a   : > { %v5595_v34 = vadd.f32 %v7654_v54, %v5559_v51  ;;  %5528 = vst.msk [vmem:[#allocation3 + $0x28] sm:$0xff] %vm942_vm11, %v5496_v21  ;;  %6090 = vmatmul.msk.bf16.gmra.mxu3 %vm800_vm5, %v6159_v5  ;;  %v4248_v11 = vpack.c.b16 %v4230_v29, %v4229_v59  ;;  %v3491_v5 = vshrl.u32 %v3127_v46, 16  ;;  %v3500_v59 = vshll.u32 %v3128_v57, 16  ;;  %v4879_v51 = vld [vmem:[#allocation2 + $0x104] sm:$0xf] }
 0x25b   : > { %v4331_v37 = vpop.f32.mrf.mxu2  ;;  %v3649_v0 = vpop.f32.mrf.mxu1  ;;  %v4168_v62 = vor.u32 %v4166_v52, %v4165_v47  ;;  %v4170_v30 = vrot.slane %v4165_v47, 4  ;;  %v4177_v48 = vor.u32 %v4175_v60, %v4174_v8  ;;  %v3496_v31 = vrot.slane %v3494_v6, 5  ;;  %v3716_v6 = vld [vmem:[#allocation3 + $0x60] sm:$0xff] }
 0x25c   : > { %5627 = vst.msk [vmem:[%s7673_s15 + $0x20] sm:$0xff] %vm942_vm11, %v5595_v34  ;;  %v4431_v40 = vadd.f32 %v4399_v1, %v4331_v37  ;;  %v3746_v28 = vadd.f32 %v3714_v53, %v3649_v0  ;;  %v3493_v35 = vrot.slane %v3491_v5, 4  ;;  %v4880_v34 = vld [vmem:[#allocation2 + $0x108] sm:$0xf]  ;;  %v3544_v36 = vunpack.c.l.b16 %v3479_v41  ;;  %v3129_v25 = vld [vmem:[#allocation2 + $0x10c] sm:$0x1] }
 0x25d   : > { %v4748_v42 = vld [vmem:[#allocation3 + $0x38] sm:$0xff]  ;;  %v4681_v33 = vpop.f32.mrf.mxu3  ;;  %v5220_v0 = vsel %vm6536_vm10, %v5215_v17, %v5219_v4  ;;  %v7854_v56 = vrot.slane %v3500_v59, 5  ;;  %v3506_v43 = vrot.slane %v3504_v26, 4  ;;  %v4881_v46 = vld [vmem:[#allocation2 + $0x10c] sm:$0x1]  ;;  %v5235_v8 = vshrl.u32 %v4880_v34, 16 }
 0x25e   : > { %v4780_v18 = vadd.f32 %v4748_v42, %v4678_v27  ;;  %4463 = vst.msk [vmem:[#allocation3 + $0x40] sm:$0xff] %vm942_vm11, %v4431_v40  ;;  %5977 = vmatmul.msk.bf16.gmra.mxu1 %vm800_vm5, %v3561_v23  ;;  %v7829_v55 = vpop.f32.mrf.mxu0  ;;  %v4400_v50 = vld [vmem:[#allocation3 + $0x48] sm:$0xff]  ;;  %v5205_v23 = vrot.slane %v5204_v2, 4  ;;  %v5222_v40 = vshrl.u32 %v4879_v51, 16  ;;  %v5225_v42 = vshll.u32 %v4879_v51, 16 }
 0x25f   : > { %v5465_v44 = vld [vmem:[#allocation3 + $0x30] sm:$0xff]  ;;  %3778 = vst.msk [vmem:[#allocation3 + $0x50] sm:$0xff] %vm942_vm11, %v3746_v28  ;;  %v5298_v22 = vunpack.c.l.b16 %v5220_v0  ;;  %v3497_v61 = vor.u32 %v3496_v31, %v3493_v35  ;;  %v3507_v57 = vor.u32 %v3506_v43, %v7854_v56  ;;  %v313_v41 = vld [vmem:[#allocation2 + $0x11c] sm:$0x1]  ;;  %v3717_v43 = vld [vmem:[#allocation3 + $0x68] sm:$0xff] }
 0x260   : > { %4812 = vst.msk [vmem:[#allocation3 + $0x38] sm:$0xff] %vm942_vm11, %v4780_v18  ;;  %v5497_v27 = vadd.f32 %v5465_v44, %v7765_v20  ;;  %v3489_v20 = vsel %vm6536_vm10, %v3484_v49, %v3488_v45  ;;  %v5210_v37 = vsel %vm6536_vm10, %v5205_v23, %v7813_v63  ;;  %v4169_v45 = vsel %vm6261_vm4, %v5994_v14, %v4168_v62 }
 0x261   : > { %v5560_v12 = vld [vmem:[#allocation3 + $0x28] sm:$0xff]  ;;  %6107 = vmatmul.msk.bf16.gmra.mxu0 %vm800_vm5, %v5315_v3  ;;  %v3545_v13 = vunpack.c.l.b16 %v3489_v20  ;;  %v7861_v63 = vsel %vm6261_vm4, %v4170_v30, %v4177_v48  ;;  %v5297_v2 = vunpack.c.l.b16 %v5210_v37  ;;  %v5224_v47 = vrot.slane %v5222_v40, 4 }
 0x262   : > { %v5596_v9 = vadd.f32 %v7654_v54, %v5560_v12  ;;  %5529 = vst.msk [vmem:[#allocation3 + $0x30] sm:$0xff] %vm942_vm11, %v5497_v27  ;;  %v5227_v52 = vrot.slane %v5225_v42, 5  ;;  %v3510_v27 = vshll.u32 %v3129_v25, 16  ;;  %v4231_v12 = vunpack.c.l.b16 %v4169_v45 }
 0x263   : > { %v4333_v21 = vpop.f32.mrf.mxu2  ;;  %v3651_v24 = vpop.f32.mrf.mxu1  ;;  %v4232_v4 = vunpack.c.l.b16 %v7861_v63  ;;  %v5241_v20 = vshll.u32 %v4881_v46, 16  ;;  %v3508_v51 = vrot.slane %v3507_v57, 4  ;;  %v6161_v57 = vld [vmem:[#allocation2 + $0x104] sm:$0xff] }
 0x264   : > { %5628 = vst.msk [vmem:[%s7673_s15 + $0x28] sm:$0xff] %vm942_vm11, %v5596_v9  ;;  %v4432_v1 = vadd.f32 %v4400_v50, %v4333_v21  ;;  %v3747_v39 = vadd.f32 %v3715_v16, %v3651_v24  ;;  %v5237_v50 = vrot.slane %v5235_v8, 4  ;;  %v7875_v9 = vld [vmem:[#allocation2 + $0x114] sm:$0xf]  ;;  %v5316_v21 = vpack.c.b16 %v5298_v22, %v5297_v2  ;;  %v7877_v16 = vld [vmem:[#allocation2 + $0x118] sm:$0xf] }
 0x265   : > { %v4749_v29 = vld [vmem:[#allocation3 + $0x40] sm:$0xff]  ;;  %v4683_v19 = vpop.f32.mrf.mxu3  ;;  %v3498_v24 = vrot.slane %v3497_v61, 4  ;;  %v5228_v14 = vor.u32 %v5227_v52, %v5224_v47  ;;  %v4185_v31 = vshrl.u32 %v7875_v9, 16 }
 0x266   : > { %v4781_v53 = vadd.f32 %v4749_v29, %v4681_v33  ;;  %4464 = vst.msk [vmem:[#allocation3 + $0x48] sm:$0xff] %vm942_vm11, %v4432_v1  ;;  %v7852_v38 = vpop.f32.mrf.mxu0  ;;  %v5231_v33 = vshll.u32 %v4880_v34, 16  ;;  %v4401_v49 = vld [vmem:[#allocation3 + $0x50] sm:$0xff]  ;;  %v3512_v1 = vrot.slane %v3510_v27, 5 }
 0x267   : > { %v5466_v28 = vld [vmem:[#allocation3 + $0x38] sm:$0xff]  ;;  %3779 = vst.msk [vmem:[#allocation3 + $0x58] sm:$0xff] %vm942_vm11, %v3747_v39  ;;  %v314_v39 = vsel %vm6501_vm7, 0, %v313_v41  ;;  %v3846_v29 = vld [vmem:[#allocation2 + $0x110] sm:$0x8]  ;;  %v3503_v10 = vsel %vm6536_vm10, %v3498_v24, %v7854_v56  ;;  %v5229_v0 = vrot.slane %v5228_v14, 4 }
 0x268   : > { %4813 = vst.msk [vmem:[#allocation3 + $0x40] sm:$0xff] %vm942_vm11, %v4781_v53  ;;  %v5498_v3 = vadd.f32 %v5466_v28, %v7797_v32  ;;  %6010 = vmatmul.msk.bf16.gmra.mxu2 %vm800_vm5, %v4248_v11  ;;  %v7866_v44 = vrot.slane %v5231_v33, 5  ;;  %v3562_v32 = vpack.c.b16 %v3545_v13, %v3544_v36  ;;  %v5243_v36 = vrot.slane %v5241_v20, 5  ;;  %v4882_v28 = vld [vmem:[#allocation2 + $0x114] sm:$0xf] }
 0x269   : > { %v5561_v18 = vld [vmem:[#allocation3 + $0x30] sm:$0xff]  ;;  %315 = vst [vmem:[#allocation2 + $0x11c] sm:$0x1] %v314_v39  ;;  %v3513_v40 = vsel %vm6536_vm10, %v3508_v51, %v3512_v1  ;;  %v4180_v25 = vshrl.u32 %v3846_v29, 16  ;;  %v4187_v42 = vrot.slane %v4185_v31, 7  ;;  %v4188_v56 = vshll.u32 %v7875_v9, 16 }
 0x26a   : > { %v5597_v60 = vadd.f32 %v7654_v54, %v5561_v18  ;;  %5530 = vst.msk [vmem:[#allocation3 + $0x38] sm:$0xff] %vm942_vm11, %v5498_v3  ;;  %6091 = vmatmul.msk.bf16.gmra.mxu3 %vm800_vm5, %v6160_v58  ;;  %v5238_v62 = vor.u32 %v5237_v50, %v7866_v44  ;;  %v4197_v33 = vshll.u32 %v7877_v16, 16  ;;  %v4883_v3 = vld [vmem:[#allocation2 + $0x118] sm:$0xf]  ;;  %v3546_v61 = vunpack.c.l.b16 %v3503_v10  ;;  %v3718_v51 = vld [vmem:[#allocation3 + $0x70] sm:$0xff] }
 0x26b   : > { %v4336_v11 = vpop.f32.mrf.mxu2  ;;  %v3654_v5 = vpop.f32.mrf.mxu1  ;;  %v3547_v47 = vunpack.c.l.b16 %v3513_v40  ;;  %v5234_v52 = vsel %vm6536_vm10, %v5229_v0, %v7866_v44  ;;  %v5995_v50 = vrot.slane %v4180_v25, 11  ;;  %v4190_v41 = vor.u32 %v4188_v56, %v4187_v42 }
 0x26c   : > { %5629 = vst.msk [vmem:[%s7673_s15 + $0x30] sm:$0xff] %vm942_vm11, %v5597_v60  ;;  %v4433_v23 = vadd.f32 %v4401_v49, %v4336_v11  ;;  %v3748_v17 = vadd.f32 %v3716_v6, %v3654_v5  ;;  %v5239_v53 = vrot.slane %v5238_v62, 4  ;;  %v5246_v60 = vshrl.u32 %v4882_v28, 16 }
 0x26d   : > { %v4750_v59 = vld [vmem:[#allocation3 + $0x48] sm:$0xff]  ;;  %v4686_v26 = vpop.f32.mrf.mxu3  ;;  %v5249_v11 = vshll.u32 %v4882_v28, 16  ;;  %v5255_v5 = vshll.u32 %v4883_v3, 16  ;;  %v5259_v6 = vshrl.u32 %v4883_v3, 16  ;;  %v3563_v20 = vpack.c.b16 %v3547_v47, %v3546_v61  ;;  %v3719_v3 = vld [vmem:[#allocation3 + $0x78] sm:$0xff] }
 0x26e   : > { %v4782_v30 = vadd.f32 %v4750_v59, %v4683_v19  ;;  %4465 = vst.msk [vmem:[#allocation3 + $0x50] sm:$0xff] %vm942_vm11, %v4433_v23  ;;  %5978 = vmatmul.msk.bf16.gmra.mxu1 %vm800_vm5, %v3562_v32  ;;  %v7882_v48 = vpop.f32.mrf.mxu0  ;;  %v4194_v19 = vshrl.u32 %v7877_v16, 16  ;;  %v4402_v37 = vld [vmem:[#allocation3 + $0x58] sm:$0xff]  ;;  %v5244_v8 = vsel %vm6536_vm10, %v5239_v53, %v5243_v36  ;;  %v4192_v23 = vrot.slane %v4187_v42, 4 }
 0x26f   : > { %v5467_v35 = vld [vmem:[#allocation3 + $0x40] sm:$0xff]  ;;  %3780 = vst.msk [vmem:[#allocation3 + $0x60] sm:$0xff] %vm942_vm11, %v3748_v17  ;;  %v5299_v59 = vunpack.c.l.b16 %v5234_v52  ;;  %v5251_v16 = vrot.slane %v5249_v11, 5  ;;  %v5261_v14 = vrot.slane %v5259_v6, 4  ;;  %v4191_v29 = vsel %vm6261_vm4, %v5995_v50, %v4190_v41 }
 0x270   : > { %4814 = vst.msk [vmem:[#allocation3 + $0x48] sm:$0xff] %vm942_vm11, %v4782_v30  ;;  %v5499_v34 = vadd.f32 %v5467_v35, %v7829_v55  ;;  %v4249_v55 = vpack.c.b16 %v4232_v4, %v4231_v12  ;;  %v4196_v46 = vrot.slane %v4194_v19, 7  ;;  %v4884_v1 = vld [vmem:[#allocation2 + $0x11c] sm:$0x1]  ;;  %v4233_v15 = vunpack.c.l.b16 %v4191_v29 }
 0x271   : > { %v5562_v13 = vld [vmem:[#allocation3 + $0x38] sm:$0xff]  ;;  %6108 = vmatmul.msk.bf16.gmra.mxu0 %vm800_vm5, %v5316_v21  ;;  %v5248_v21 = vrot.slane %v5246_v60, 4  ;;  %v5265_v53 = vshll.u32 %v4884_v1, 16 }
 0x272   : > { %v5598_v58 = vadd.f32 %v7654_v54, %v5562_v13  ;;  %5531 = vst.msk [vmem:[#allocation3 + $0x40] sm:$0xff] %vm942_vm11, %v5499_v34  ;;  %v4199_v17 = vor.u32 %v4197_v33, %v4196_v46 }
 0x273   : > { %v4338_v45 = vpop.f32.mrf.mxu2  ;;  %v3656_v63 = vpop.f32.mrf.mxu1  ;;  %v5252_v10 = vor.u32 %v5251_v16, %v5248_v21  ;;  %v5267_v42 = vrot.slane %v5265_v53, 5 }
 0x274   : > { %5630 = vst.msk [vmem:[%s7673_s15 + $0x38] sm:$0xff] %vm942_vm11, %v5598_v58  ;;  %v4434_v2 = vadd.f32 %v4402_v37, %v4338_v45  ;;  %v3749_v22 = vadd.f32 %v3717_v43, %v3656_v63  ;;  %v4200_v19 = vsel %vm6261_vm4, %v4192_v23, %v4199_v17 }
 0x275   : > { %v4751_v18 = vld [vmem:[#allocation3 + $0x50] sm:$0xff]  ;;  %v4688_v49 = vpop.f32.mrf.mxu3  ;;  %v4234_v43 = vunpack.c.l.b16 %v4200_v19  ;;  %v5253_v63 = vrot.slane %v5252_v10, 4 }
 0x276   : > { %v4783_v32 = vadd.f32 %v4751_v18, %v4686_v26  ;;  %4466 = vst.msk [vmem:[#allocation3 + $0x58] sm:$0xff] %vm942_vm11, %v4434_v2  ;;  %v7909_v27 = vpop.f32.mrf.mxu0  ;;  %v4403_v9 = vld [vmem:[#allocation3 + $0x60] sm:$0xff]  ;;  %v5300_v26 = vunpack.c.l.b16 %v5244_v8 }
 0x277   : > { %v5468_v12 = vld [vmem:[#allocation3 + $0x48] sm:$0xff]  ;;  %3781 = vst.msk [vmem:[#allocation3 + $0x68] sm:$0xff] %vm942_vm11, %v3749_v22 }
 0x278   : > { %4815 = vst.msk [vmem:[#allocation3 + $0x50] sm:$0xff] %vm942_vm11, %v4783_v32  ;;  %v5500_v44 = vadd.f32 %v5468_v12, %v7852_v38  ;;  %6011 = vmatmul.msk.bf16.gmra.mxu2 %vm800_vm5, %v4249_v55  ;;  %v5257_v38 = vrot.slane %v5255_v5, 5  ;;  %v5317_v36 = vpack.c.b16 %v5300_v26, %v5299_v59 }
 0x279   : > { %v5563_v4 = vld [vmem:[#allocation3 + $0x40] sm:$0xff] }
 0x27a   : > { %v5599_v24 = vadd.f32 %v7654_v54, %v5563_v4  ;;  %5532 = vst.msk [vmem:[#allocation3 + $0x48] sm:$0xff] %vm942_vm11, %v5500_v44  ;;  %6092 = vmatmul.msk.bf16.gmra.mxu3 %vm800_vm5, %v6161_v57  ;;  %v5262_v0 = vor.u32 %v5261_v14, %v5257_v38  ;;  %v5258_v52 = vsel %vm6536_vm10, %v5253_v63, %v5257_v38  ;;  %v3720_v44 = vld [vmem:[#allocation3 + $0x80] sm:$0xff] }
 0x27b   : > { %v4341_v62 = vpop.f32.mrf.mxu2  ;;  %v3659_v30 = vpop.f32.mrf.mxu1  ;;  %v5301_v5 = vunpack.c.l.b16 %v5258_v52 }
 0x27c   : > { %5631 = vst.msk [vmem:[%s7673_s15 + $0x40] sm:$0xff] %vm942_vm11, %v5599_v24  ;;  %v4435_v39 = vadd.f32 %v4403_v9, %v4341_v62  ;;  %v3750_v35 = vadd.f32 %v3718_v51, %v3659_v30  ;;  %v5263_v25 = vrot.slane %v5262_v0, 4  ;;  %v7955_v24 = vld [vmem:[%s8095_s2] ss:$0 sm:$0xff]  ;;  %v3721_v62 = vld [vmem:[#allocation3 + $0x88] sm:$0xff]  ;;  %v3722_v0 = vld [vmem:[#allocation3 + $0x90] sm:$0xff] }
 0x27d   : > { %v4752_v31 = vld [vmem:[#allocation3 + $0x58] sm:$0xff]  ;;  %v4691_v34 = vpop.f32.mrf.mxu3 }
 0x27e   : > { %v4784_v13 = vadd.f32 %v4752_v31, %v4688_v49  ;;  %4467 = vst.msk [vmem:[#allocation3 + $0x60] sm:$0xff] %vm942_vm11, %v4435_v39  ;;  %5979 = vmatmul.msk.bf16.gmra.mxu1 %vm800_vm5, %v3563_v20  ;;  %v5409_v37 = vpop.f32.mrf.mxu0  ;;  %v4404_v28 = vld [vmem:[#allocation3 + $0x68] sm:$0xff]  ;;  %v6162_v49 = vld [vmem:[#allocation2 + $0x114] sm:$0xff]  ;;  %v5268_v8 = vsel %vm6536_vm10, %v5263_v25, %v5267_v42 }
 0x27f   : > { %v5469_v58 = vld [vmem:[#allocation3 + $0x50] sm:$0xff]  ;;  %3782 = vst.msk [vmem:[#allocation3 + $0x70] sm:$0xff] %vm942_vm11, %v3750_v35  ;;  %v5302_v6 = vunpack.c.l.b16 %v5268_v8 }
 0x280   : > { %4816 = vst.msk [vmem:[#allocation3 + $0x58] sm:$0xff] %vm942_vm11, %v4784_v13  ;;  %v5501_v55 = vadd.f32 %v5469_v58, %v7882_v48  ;;  %v4250_v48 = vpack.c.b16 %v4234_v43, %v4233_v15 }
 0x281   : > { %v5564_v40 = vld [vmem:[#allocation3 + $0x48] sm:$0xff]  ;;  %6109 = vmatmul.msk.bf16.gmra.mxu0 %vm800_vm5, %v5317_v36  ;;  %v5318_v4 = vpack.c.b16 %v5302_v6, %v5301_v5 }
 0x282   : > { %v5600_v45 = vadd.f32 %v7654_v54, %v5564_v40  ;;  %5533 = vst.msk [vmem:[#allocation3 + $0x50] sm:$0xff] %vm942_vm11, %v5501_v55 }
 0x283   : > { %v4343_v56 = vpop.f32.mrf.mxu2  ;;  %v3661_v33 = vpop.f32.mrf.mxu1 }
 0x284   : > { %5632 = vst.msk [vmem:[%s7673_s15 + $0x48] sm:$0xff] %vm942_vm11, %v5600_v45  ;;  %v4436_v2 = vadd.f32 %v4404_v28, %v4343_v56  ;;  %v3751_v22 = vadd.f32 %v3719_v3, %v3661_v33  ;;  %v3723_v3 = vld [vmem:[#allocation3 + $0x98] sm:$0xff] }
 0x285   : > { %v4753_v61 = vld [vmem:[#allocation3 + $0x60] sm:$0xff]  ;;  %v4693_v46 = vpop.f32.mrf.mxu3 }
 0x286   : > { %v4785_v18 = vadd.f32 %v4753_v61, %v4691_v34  ;;  %4468 = vst.msk [vmem:[#allocation3 + $0x68] sm:$0xff] %vm942_vm11, %v4436_v2  ;;  %v5411_v47 = vpop.f32.mrf.mxu0  ;;  %v4405_v11 = vld [vmem:[#allocation3 + $0x70] sm:$0xff] }
 0x287   : > { %v5470_v60 = vld [vmem:[#allocation3 + $0x58] sm:$0xff]  ;;  %3783 = vst.msk [vmem:[#allocation3 + $0x78] sm:$0xff] %vm942_vm11, %v3751_v22 }
 0x288   : > { %4817 = vst.msk [vmem:[#allocation3 + $0x60] sm:$0xff] %vm942_vm11, %v4785_v18  ;;  %v5502_v32 = vadd.f32 %v5470_v60, %v7909_v27  ;;  %6012 = vmatmul.msk.bf16.gmra.mxu2 %vm800_vm5, %v4250_v48 }
 0x289   : > { %v5565_v57 = vld [vmem:[#allocation3 + $0x50] sm:$0xff] }
 0x28a   : > { %v5601_v12 = vadd.f32 %v7654_v54, %v5565_v57  ;;  %5534 = vst.msk [vmem:[#allocation3 + $0x58] sm:$0xff] %vm942_vm11, %v5502_v32  ;;  %6093 = vmatmul.msk.bf16.gmra.mxu3 %vm800_vm5, %v6162_v49 }
 0x28b   : > { %v4346_v7 = vpop.f32.mrf.mxu2  ;;  %v3664_v50 = vpop.f32.mrf.mxu1 }
 0x28c   : > { %5633 = vst.msk [vmem:[%s7673_s15 + $0x50] sm:$0xff] %vm942_vm11, %v5601_v12  ;;  %v4437_v41 = vadd.f32 %v4405_v11, %v4346_v7  ;;  %v3752_v23 = vadd.f32 %v3720_v44, %v3664_v50  ;;  %v3724_v11 = vld [vmem:[#allocation3 + $0xa0] sm:$0xff] }
 0x28d   : > { %v4754_v27 = vld [vmem:[#allocation3 + $0x68] sm:$0xff]  ;;  %v4696_v17 = vpop.f32.mrf.mxu3 }
 0x28e   : > { %v4786_v9 = vadd.f32 %v4754_v27, %v4693_v46  ;;  %4469 = vst.msk [vmem:[#allocation3 + $0x70] sm:$0xff] %vm942_vm11, %v4437_v41  ;;  %v5414_v20 = vpop.f32.mrf.mxu0  ;;  %v4406_v21 = vld [vmem:[#allocation3 + $0x78] sm:$0xff] }
 0x28f   : > { %v5471_v54 = vld [vmem:[#allocation3 + $0x60] sm:$0xff]  ;;  %3784 = vst.msk [vmem:[#allocation3 + $0x80] sm:$0xff] %vm942_vm11, %v3752_v23 }
 0x290   : > { %4818 = vst.msk [vmem:[#allocation3 + $0x68] sm:$0xff] %vm942_vm11, %v4786_v9  ;;  %v5503_v59 = vadd.f32 %v5471_v54, %v5409_v37  ;;  %v3725_v54 = vld [vmem:[#allocation3 + $0xa8] sm:$0xff] }
 0x291   : > { %v5566_v26 = vld [vmem:[#allocation3 + $0x58] sm:$0xff]  ;;  %6110 = vmatmul.msk.bf16.gmra.mxu0 %vm800_vm5, %v5318_v4 }
 0x292   : > { %v5602_v16 = vadd.f32 %v7955_v24, %v5566_v26  ;;  %5535 = vst.msk [vmem:[#allocation3 + $0x60] sm:$0xff] %vm942_vm11, %v5503_v59 }
 0x293   : > { %v4348_v38 = vpop.f32.mrf.mxu2  ;;  %v3666_v14 = vpop.f32.mrf.mxu1 }
 0x294   : > { %5634 = vst.msk [vmem:[%s7673_s15 + $0x58] sm:$0xff] %vm942_vm11, %v5602_v16  ;;  %v4438_v30 = vadd.f32 %v4406_v21, %v4348_v38  ;;  %v3753_v51 = vadd.f32 %v3721_v62, %v3666_v14 }
 0x295   : > { %v4755_v1 = vld [vmem:[#allocation3 + $0x70] sm:$0xff]  ;;  %v4698_v39 = vpop.f32.mrf.mxu3 }
 0x296   : > { %v4787_v35 = vadd.f32 %v4755_v1, %v4696_v17  ;;  %4470 = vst.msk [vmem:[#allocation3 + $0x78] sm:$0xff] %vm942_vm11, %v4438_v30  ;;  %v5416_v31 = vpop.f32.mrf.mxu0  ;;  %v4407_v36 = vld [vmem:[#allocation3 + $0x80] sm:$0xff] }
 0x297   : > { %v5472_v34 = vld [vmem:[#allocation3 + $0x68] sm:$0xff]  ;;  %3785 = vst.msk [vmem:[#allocation3 + $0x88] sm:$0xff] %vm942_vm11, %v3753_v51 }
 0x298   : > { %4819 = vst.msk [vmem:[#allocation3 + $0x70] sm:$0xff] %vm942_vm11, %v4787_v35  ;;  %v5504_v29 = vadd.f32 %v5472_v34, %v5411_v47  ;;  %v3726_v34 = vld [vmem:[#allocation3 + $0xb0] sm:$0xff] }
 0x299   : > { %v5567_v19 = vld [vmem:[#allocation3 + $0x60] sm:$0xff] }
 0x29a   : > { %v5603_v13 = vadd.f32 %v7955_v24, %v5567_v19  ;;  %5536 = vst.msk [vmem:[#allocation3 + $0x68] sm:$0xff] %vm942_vm11, %v5504_v29 }
 0x29b   : > { %v4351_v37 = vpop.f32.mrf.mxu2  ;;  %v3669_v10 = vpop.f32.mrf.mxu1 }
 0x29c   : > { %5635 = vst.msk [vmem:[%s7673_s15 + $0x60] sm:$0xff] %vm942_vm11, %v5603_v13  ;;  %v4439_v53 = vadd.f32 %v4407_v36, %v4351_v37  ;;  %v3754_v58 = vadd.f32 %v3722_v0, %v3669_v10 }
 0x29d   : > { %v4756_v55 = vld [vmem:[#allocation3 + $0x78] sm:$0xff]  ;;  %v4701_v15 = vpop.f32.mrf.mxu3 }
 0x29e   : > { %v4788_v43 = vadd.f32 %v4756_v55, %v4698_v39  ;;  %4471 = vst.msk [vmem:[#allocation3 + $0x80] sm:$0xff] %vm942_vm11, %v4439_v53  ;;  %v5419_v40 = vpop.f32.mrf.mxu0  ;;  %v4408_v25 = vld [vmem:[#allocation3 + $0x88] sm:$0xff] }
 0x29f   : > { %v5473_v28 = vld [vmem:[#allocation3 + $0x70] sm:$0xff]  ;;  %3786 = vst.msk [vmem:[#allocation3 + $0x90] sm:$0xff] %vm942_vm11, %v3754_v58 }
 0x2a0   : > { %4820 = vst.msk [vmem:[#allocation3 + $0x78] sm:$0xff] %vm942_vm11, %v4788_v43  ;;  %v5505_v45 = vadd.f32 %v5473_v28, %v5414_v20  ;;  %v3727_v28 = vld [vmem:[#allocation3 + $0xb8] sm:$0xff] }
 0x2a1   : > { %v5568_v63 = vld [vmem:[#allocation3 + $0x68] sm:$0xff] }
 0x2a2   : > { %v5604_v42 = vadd.f32 %v7955_v24, %v5568_v63  ;;  %5537 = vst.msk [vmem:[#allocation3 + $0x70] sm:$0xff] %vm942_vm11, %v5505_v45 }
 0x2a3   : > { %v4353_v56 = vpop.f32.mrf.mxu2  ;;  %v3671_v33 = vpop.f32.mrf.mxu1 }
 0x2a4   : > { %5636 = vst.msk [vmem:[%s7673_s15 + $0x68] sm:$0xff] %vm942_vm11, %v5604_v42  ;;  %v4440_v2 = vadd.f32 %v4408_v25, %v4353_v56  ;;  %v3755_v48 = vadd.f32 %v3723_v3, %v3671_v33 }
 0x2a5   : > { %v4757_v22 = vld [vmem:[#allocation3 + $0x80] sm:$0xff]  ;;  %v4703_v61 = vpop.f32.mrf.mxu3 }
 0x2a6   : > { %v4789_v46 = vadd.f32 %v4757_v22, %v4701_v15  ;;  %4472 = vst.msk [vmem:[#allocation3 + $0x88] sm:$0xff] %vm942_vm11, %v4440_v2  ;;  %v5421_v18 = vpop.f32.mrf.mxu0  ;;  %v4409_v8 = vld [vmem:[#allocation3 + $0x90] sm:$0xff] }
 0x2a7   : > { %v5474_v49 = vld [vmem:[#allocation3 + $0x78] sm:$0xff]  ;;  %3787 = vst.msk [vmem:[#allocation3 + $0x98] sm:$0xff] %vm942_vm11, %v3755_v48 }
 0x2a8   : > { %4821 = vst.msk [vmem:[#allocation3 + $0x80] sm:$0xff] %vm942_vm11, %v4789_v46  ;;  %v5506_v47 = vadd.f32 %v5474_v49, %v5416_v31  ;;  %v3728_v49 = vld [vmem:[#allocation3 + $0xc0] sm:$0xff] }
 0x2a9   : > { %v5569_v52 = vld [vmem:[#allocation3 + $0x70] sm:$0xff] }
 0x2aa   : > { %v5605_v60 = vadd.f32 %v7955_v24, %v5569_v52  ;;  %5538 = vst.msk [vmem:[#allocation3 + $0x78] sm:$0xff] %vm942_vm11, %v5506_v47 }
 0x2ab   : > { %v4356_v32 = vpop.f32.mrf.mxu2  ;;  %v3674_v57 = vpop.f32.mrf.mxu1 }
 0x2ac   : > { %5637 = vst.msk [vmem:[%s7673_s15 + $0x70] sm:$0xff] %vm942_vm11, %v5605_v60  ;;  %v4441_v5 = vadd.f32 %v4409_v8, %v4356_v32  ;;  %v3756_v6 = vadd.f32 %v3724_v11, %v3674_v57 }
 0x2ad   : > { %v4758_v12 = vld [vmem:[#allocation3 + $0x88] sm:$0xff]  ;;  %v4706_v7 = vpop.f32.mrf.mxu3 }
 0x2ae   : > { %v4790_v50 = vadd.f32 %v4758_v12, %v4703_v61  ;;  %4473 = vst.msk [vmem:[#allocation3 + $0x90] sm:$0xff] %vm942_vm11, %v4441_v5  ;;  %v5424_v44 = vpop.f32.mrf.mxu0  ;;  %v4410_v17 = vld [vmem:[#allocation3 + $0x98] sm:$0xff] }
 0x2af   : > { %v5475_v41 = vld [vmem:[#allocation3 + $0x80] sm:$0xff]  ;;  %3788 = vst.msk [vmem:[#allocation3 + $0xa0] sm:$0xff] %vm942_vm11, %v3756_v6 }
 0x2b0   : > { %4822 = vst.msk [vmem:[#allocation3 + $0x88] sm:$0xff] %vm942_vm11, %v4790_v50  ;;  %v5507_v23 = vadd.f32 %v5475_v41, %v5419_v40  ;;  %v3729_v41 = vld [vmem:[#allocation3 + $0xc8] sm:$0xff] }
 0x2b1   : > { %v5570_v27 = vld [vmem:[#allocation3 + $0x78] sm:$0xff] }
 0x2b2   : > { %v5606_v4 = vadd.f32 %v7955_v24, %v5570_v27  ;;  %5539 = vst.msk [vmem:[#allocation3 + $0x80] sm:$0xff] %vm942_vm11, %v5507_v23 }
 0x2b3   : > { %v4358_v9 = vpop.f32.mrf.mxu2  ;;  %v3676_v20 = vpop.f32.mrf.mxu1 }
 0x2b4   : > { %5638 = vst.msk [vmem:[%s7673_s15 + $0x78] sm:$0xff] %vm942_vm11, %v5606_v4  ;;  %v4442_v59 = vadd.f32 %v4410_v17, %v4358_v9  ;;  %v3757_v26 = vadd.f32 %v3725_v54, %v3676_v20 }
 0x2b5   : > { %v4759_v21 = vld [vmem:[#allocation3 + $0x90] sm:$0xff]  ;;  %v4708_v16 = vpop.f32.mrf.mxu3 }
 0x2b6   : > { %v4791_v38 = vadd.f32 %v4759_v21, %v4706_v7  ;;  %4474 = vst.msk [vmem:[#allocation3 + $0x98] sm:$0xff] %vm942_vm11, %v4442_v59  ;;  %v5426_v14 = vpop.f32.mrf.mxu0  ;;  %v4411_v1 = vld [vmem:[#allocation3 + $0xa0] sm:$0xff] }
 0x2b7   : > { %v5476_v62 = vld [vmem:[#allocation3 + $0x88] sm:$0xff]  ;;  %3789 = vst.msk [vmem:[#allocation3 + $0xa8] sm:$0xff] %vm942_vm11, %v3757_v26 }
 0x2b8   : > { %4823 = vst.msk [vmem:[#allocation3 + $0x90] sm:$0xff] %vm942_vm11, %v4791_v38  ;;  %v5508_v30 = vadd.f32 %v5476_v62, %v5421_v18  ;;  %v3730_v62 = vld [vmem:[#allocation3 + $0xd0] sm:$0xff] }
 0x2b9   : > { %v5571_v51 = vld [vmem:[#allocation3 + $0x80] sm:$0xff] }
 0x2ba   : > { %v5607_v39 = vadd.f32 %v7955_v24, %v5571_v51  ;;  %5540 = vst.msk [vmem:[#allocation3 + $0x88] sm:$0xff] %vm942_vm11, %v5508_v30 }
 0x2bb   : > { %v4361_v35 = vpop.f32.mrf.mxu2  ;;  %v3679_v31 = vpop.f32.mrf.mxu1 }
 0x2bc   : > { %5639 = vst.msk [vmem:[%s7673_s15 + $0x80] sm:$0xff] %vm942_vm11, %v5607_v39  ;;  %v4443_v29 = vadd.f32 %v4411_v1, %v4361_v35  ;;  %v3758_v19 = vadd.f32 %v3726_v34, %v3679_v31 }
 0x2bd   : > { %v4760_v36 = vld [vmem:[#allocation3 + $0x98] sm:$0xff]  ;;  %v4711_v13 = vpop.f32.mrf.mxu3 }
 0x2be   : > { %v4792_v37 = vadd.f32 %v4760_v36, %v4708_v16  ;;  %4475 = vst.msk [vmem:[#allocation3 + $0xa0] sm:$0xff] %vm942_vm11, %v4443_v29  ;;  %v5429_v10 = vpop.f32.mrf.mxu0  ;;  %v4412_v55 = vld [vmem:[#allocation3 + $0xa8] sm:$0xff] }
 0x2bf   : > { %v5477_v0 = vld [vmem:[#allocation3 + $0x90] sm:$0xff]  ;;  %3790 = vst.msk [vmem:[#allocation3 + $0xb0] sm:$0xff] %vm942_vm11, %v3758_v19 }
 0x2c0   : > { %4824 = vst.msk [vmem:[#allocation3 + $0x98] sm:$0xff] %vm942_vm11, %v4792_v37  ;;  %v5509_v53 = vadd.f32 %v5477_v0, %v5424_v44  ;;  %v3731_v0 = vld [vmem:[#allocation3 + $0xd8] sm:$0xff] }
 0x2c1   : > { %v5572_v58 = vld [vmem:[#allocation3 + $0x88] sm:$0xff] }
 0x2c2   : > { %v5608_v15 = vadd.f32 %v7955_v24, %v5572_v58  ;;  %5541 = vst.msk [vmem:[#allocation3 + $0x90] sm:$0xff] %vm942_vm11, %v5509_v53 }
 0x2c3   : > { %v4363_v43 = vpop.f32.mrf.mxu2  ;;  %v3681_v40 = vpop.f32.mrf.mxu1 }
 0x2c4   : > { %5640 = vst.msk [vmem:[%s7673_s15 + $0x88] sm:$0xff] %vm942_vm11, %v5608_v15  ;;  %v4444_v45 = vadd.f32 %v4412_v55, %v4363_v43  ;;  %v3759_v63 = vadd.f32 %v3727_v28, %v3681_v40 }
 0x2c5   : > { %v4761_v25 = vld [vmem:[#allocation3 + $0xa0] sm:$0xff]  ;;  %v4713_v42 = vpop.f32.mrf.mxu3 }
 0x2c6   : > { %v4793_v56 = vadd.f32 %v4761_v25, %v4711_v13  ;;  %4476 = vst.msk [vmem:[#allocation3 + $0xa8] sm:$0xff] %vm942_vm11, %v4444_v45  ;;  %v5431_v33 = vpop.f32.mrf.mxu0  ;;  %v4413_v22 = vld [vmem:[#allocation3 + $0xb0] sm:$0xff] }
 0x2c7   : > { %v5478_v3 = vld [vmem:[#allocation3 + $0x98] sm:$0xff]  ;;  %3791 = vst.msk [vmem:[#allocation3 + $0xb8] sm:$0xff] %vm942_vm11, %v3759_v63 }
 0x2c8   : > { %4825 = vst.msk [vmem:[#allocation3 + $0xa0] sm:$0xff] %vm942_vm11, %v4793_v56  ;;  %v5510_v2 = vadd.f32 %v5478_v3, %v5426_v14  ;;  %v3732_v3 = vld [vmem:[#allocation3 + $0xe0] sm:$0xff] }
 0x2c9   : > { %v5573_v48 = vld [vmem:[#allocation3 + $0x90] sm:$0xff] }
 0x2ca   : > { %v5609_v61 = vadd.f32 %v7955_v24, %v5573_v48  ;;  %5542 = vst.msk [vmem:[#allocation3 + $0x98] sm:$0xff] %vm942_vm11, %v5510_v2 }
 0x2cb   : > { %v4366_v46 = vpop.f32.mrf.mxu2  ;;  %v3684_v18 = vpop.f32.mrf.mxu1 }
 0x2cc   : > { %5641 = vst.msk [vmem:[%s7673_s15 + $0x90] sm:$0xff] %vm942_vm11, %v5609_v61  ;;  %v4445_v47 = vadd.f32 %v4413_v22, %v4366_v46  ;;  %v3760_v52 = vadd.f32 %v3728_v49, %v3684_v18 }
 0x2cd   : > { %v4762_v8 = vld [vmem:[#allocation3 + $0xa8] sm:$0xff]  ;;  %v4716_v60 = vpop.f32.mrf.mxu3 }
 0x2ce   : > { %v4794_v32 = vadd.f32 %v4762_v8, %v4713_v42  ;;  %4477 = vst.msk [vmem:[#allocation3 + $0xb0] sm:$0xff] %vm942_vm11, %v4445_v47  ;;  %v5434_v57 = vpop.f32.mrf.mxu0  ;;  %v4414_v12 = vld [vmem:[#allocation3 + $0xb8] sm:$0xff] }
 0x2cf   : > { %v5479_v11 = vld [vmem:[#allocation3 + $0xa0] sm:$0xff]  ;;  %3792 = vst.msk [vmem:[#allocation3 + $0xc0] sm:$0xff] %vm942_vm11, %v3760_v52 }
 0x2d0   : > { %4826 = vst.msk [vmem:[#allocation3 + $0xa8] sm:$0xff] %vm942_vm11, %v4794_v32  ;;  %v5511_v5 = vadd.f32 %v5479_v11, %v5429_v10 }
 0x2d1   : > { %v5574_v6 = vld [vmem:[#allocation3 + $0x98] sm:$0xff] }
 0x2d2   : > { %v5610_v7 = vadd.f32 %v7955_v24, %v5574_v6  ;;  %5543 = vst.msk [vmem:[#allocation3 + $0xa0] sm:$0xff] %vm942_vm11, %v5511_v5 }
 0x2d3   : > { %v4368_v50 = vpop.f32.mrf.mxu2  ;;  %v3686_v44 = vpop.f32.mrf.mxu1 }
 0x2d4   : > { %5642 = vst.msk [vmem:[%s7673_s15 + $0x98] sm:$0xff] %vm942_vm11, %v5610_v7  ;;  %v4446_v23 = vadd.f32 %v4414_v12, %v4368_v50  ;;  %v3761_v27 = vadd.f32 %v3729_v41, %v3686_v44 }
 0x2d5   : > { %v4763_v17 = vld [vmem:[#allocation3 + $0xb0] sm:$0xff]  ;;  %v4718_v4 = vpop.f32.mrf.mxu3 }
 0x2d6   : > { %v4795_v9 = vadd.f32 %v4763_v17, %v4716_v60  ;;  %4478 = vst.msk [vmem:[#allocation3 + $0xb8] sm:$0xff] %vm942_vm11, %v4446_v23  ;;  %v5436_v20 = vpop.f32.mrf.mxu0  ;;  %v4415_v21 = vld [vmem:[#allocation3 + $0xc0] sm:$0xff] }
 0x2d7   : > { %v5480_v54 = vld [vmem:[#allocation3 + $0xa8] sm:$0xff]  ;;  %3793 = vst.msk [vmem:[#allocation3 + $0xc8] sm:$0xff] %vm942_vm11, %v3761_v27 }
 0x2d8   : > { %4827 = vst.msk [vmem:[#allocation3 + $0xb0] sm:$0xff] %vm942_vm11, %v4795_v9  ;;  %v5512_v59 = vadd.f32 %v5480_v54, %v5431_v33 }
 0x2d9   : > { %v5575_v26 = vld [vmem:[#allocation3 + $0xa0] sm:$0xff] }
 0x2da   : > { %v5611_v16 = vadd.f32 %v7955_v24, %v5575_v26  ;;  %5544 = vst.msk [vmem:[#allocation3 + $0xa8] sm:$0xff] %vm942_vm11, %v5512_v59 }
 0x2db   : > { %v4371_v38 = vpop.f32.mrf.mxu2  ;;  %v3689_v14 = vpop.f32.mrf.mxu1 }
 0x2dc   : > { %5643 = vst.msk [vmem:[%s7673_s15 + $0xa0] sm:$0xff] %vm942_vm11, %v5611_v16  ;;  %v4447_v30 = vadd.f32 %v4415_v21, %v4371_v38  ;;  %v3762_v51 = vadd.f32 %v3730_v62, %v3689_v14 }
 0x2dd   : > { %v4764_v1 = vld [vmem:[#allocation3 + $0xb8] sm:$0xff]  ;;  %v4721_v39 = vpop.f32.mrf.mxu3 }
 0x2de   : > { %v4796_v35 = vadd.f32 %v4764_v1, %v4718_v4  ;;  %4479 = vst.msk [vmem:[#allocation3 + $0xc0] sm:$0xff] %vm942_vm11, %v4447_v30  ;;  %v5439_v29 = vpop.f32.mrf.mxu0  ;;  %v4416_v36 = vld [vmem:[#allocation3 + $0xc8] sm:$0xff] }
 0x2df   : > { %v5481_v31 = vld [vmem:[#allocation3 + $0xb0] sm:$0xff]  ;;  %3794 = vst.msk [vmem:[#allocation3 + $0xd0] sm:$0xff] %vm942_vm11, %v3762_v51 }
 0x2e0   : > { %4828 = vst.msk [vmem:[#allocation3 + $0xb8] sm:$0xff] %vm942_vm11, %v4796_v35  ;;  %v5513_v34 = vadd.f32 %v5481_v31, %v5434_v57  ;;  %v3733_v57 = vld [vmem:[#allocation3 + $0xe8] sm:$0xff]  ;;  %v3735_v31 = vld [vmem:[#allocation3 + $0xf8] sm:$0xff] }
 0x2e1   : > { %v5576_v19 = vld [vmem:[#allocation3 + $0xa8] sm:$0xff] }
 0x2e2   : > { %v5612_v13 = vadd.f32 %v7955_v24, %v5576_v19  ;;  %5545 = vst.msk [vmem:[#allocation3 + $0xb0] sm:$0xff] %vm942_vm11, %v5513_v34 }
 0x2e3   : > { %v4373_v37 = vpop.f32.mrf.mxu2  ;;  %v3691_v10 = vpop.f32.mrf.mxu1 }
 0x2e4   : > { %5644 = vst.msk [vmem:[%s7673_s15 + $0xa8] sm:$0xff] %vm942_vm11, %v5612_v13  ;;  %v4448_v53 = vadd.f32 %v4416_v36, %v4373_v37  ;;  %v3763_v58 = vadd.f32 %v3731_v0, %v3691_v10 }
 0x2e5   : > { %v4765_v55 = vld [vmem:[#allocation3 + $0xc0] sm:$0xff]  ;;  %v4723_v15 = vpop.f32.mrf.mxu3 }
 0x2e6   : > { %v4797_v43 = vadd.f32 %v4765_v55, %v4721_v39  ;;  %4480 = vst.msk [vmem:[#allocation3 + $0xc8] sm:$0xff] %vm942_vm11, %v4448_v53  ;;  %v4417_v63 = vld [vmem:[#allocation3 + $0xd0] sm:$0xff]  ;;  %v5441_v42 = vpop.f32.mrf.mxu0 }
 0x2e7   : > { %v5482_v40 = vld [vmem:[#allocation3 + $0xb8] sm:$0xff]  ;;  %3795 = vst.msk [vmem:[#allocation3 + $0xd8] sm:$0xff] %vm942_vm11, %v3763_v58 }
 0x2e8   : > { %4829 = vst.msk [vmem:[#allocation3 + $0xc0] sm:$0xff] %vm942_vm11, %v4797_v43  ;;  %v5514_v28 = vadd.f32 %v5482_v40, %v5436_v20  ;;  %v3734_v20 = vld [vmem:[#allocation3 + $0xf0] sm:$0xff] }
 0x2e9   : > { %v5577_v45 = vld [vmem:[#allocation3 + $0xb0] sm:$0xff] }
 0x2ea   : > { %v5613_v25 = vadd.f32 %v7955_v24, %v5577_v45  ;;  %5546 = vst.msk [vmem:[#allocation3 + $0xb8] sm:$0xff] %vm942_vm11, %v5514_v28 }
 0x2eb   : > { %v4376_v56 = vpop.f32.mrf.mxu2  ;;  %v3694_v33 = vpop.f32.mrf.mxu1 }
 0x2ec   : > { %5645 = vst.msk [vmem:[%s7673_s15 + $0xb0] sm:$0xff] %vm942_vm11, %v5613_v25  ;;  %v4449_v2 = vadd.f32 %v4417_v63, %v4376_v56  ;;  %v3764_v48 = vadd.f32 %v3732_v3, %v3694_v33 }
 0x2ed   : > { %v4766_v22 = vld [vmem:[#allocation3 + $0xc8] sm:$0xff]  ;;  %v4726_v61 = vpop.f32.mrf.mxu3 }
 0x2ee   : > { %v4798_v46 = vadd.f32 %v4766_v22, %v4723_v15  ;;  %4481 = vst.msk [vmem:[#allocation3 + $0xd0] sm:$0xff] %vm942_vm11, %v4449_v2  ;;  %v4418_v52 = vld [vmem:[#allocation3 + $0xd8] sm:$0xff]  ;;  %v5444_v5 = vpop.f32.mrf.mxu0 }
 0x2ef   : > { %v5483_v18 = vld [vmem:[#allocation3 + $0xc0] sm:$0xff]  ;;  %3796 = vst.msk [vmem:[#allocation3 + $0xe0] sm:$0xff] %vm942_vm11, %v3764_v48 }
 0x2f0   : > { %4830 = vst.msk [vmem:[#allocation3 + $0xc8] sm:$0xff] %vm942_vm11, %v4798_v46  ;;  %v5515_v49 = vadd.f32 %v5483_v18, %v5439_v29 }
 0x2f1   : > { %v5578_v47 = vld [vmem:[#allocation3 + $0xb8] sm:$0xff] }
 0x2f2   : > { %v5614_v8 = vadd.f32 %v7955_v24, %v5578_v47  ;;  %5547 = vst.msk [vmem:[#allocation3 + $0xc0] sm:$0xff] %vm942_vm11, %v5515_v49 }
 0x2f3   : > { %v4378_v60 = vpop.f32.mrf.mxu2  ;;  %v3696_v32 = vpop.f32.mrf.mxu1 }
 0x2f4   : > { %5646 = vst.msk [vmem:[%s7673_s15 + $0xb8] sm:$0xff] %vm942_vm11, %v5614_v8  ;;  %v4450_v11 = vadd.f32 %v4418_v52, %v4378_v60  ;;  %v3765_v6 = vadd.f32 %v3733_v57, %v3696_v32 }
 0x2f5   : > { %v4767_v12 = vld [vmem:[#allocation3 + $0xd0] sm:$0xff]  ;;  %v4728_v7 = vpop.f32.mrf.mxu3 }
 0x2f6   : > { %v4799_v50 = vadd.f32 %v4767_v12, %v4726_v61  ;;  %4482 = vst.msk [vmem:[#allocation3 + $0xd8] sm:$0xff] %vm942_vm11, %v4450_v11  ;;  %v4419_v27 = vld [vmem:[#allocation3 + $0xe0] sm:$0xff]  ;;  %v5446_v16 = vpop.f32.mrf.mxu0 }
 0x2f7   : > { %v5484_v44 = vld [vmem:[#allocation3 + $0xc8] sm:$0xff]  ;;  %3797 = vst.msk [vmem:[#allocation3 + $0xe8] sm:$0xff] %vm942_vm11, %v3765_v6 }
 0x2f8   : > { %4831 = vst.msk [vmem:[#allocation3 + $0xd0] sm:$0xff] %vm942_vm11, %v4799_v50  ;;  %v5516_v41 = vadd.f32 %v5484_v44, %v5441_v42 }
 0x2f9   : > { %v5579_v23 = vld [vmem:[#allocation3 + $0xc0] sm:$0xff] }
 0x2fa   : > { %v5615_v17 = vadd.f32 %v7955_v24, %v5579_v23  ;;  %5548 = vst.msk [vmem:[#allocation3 + $0xc8] sm:$0xff] %vm942_vm11, %v5516_v41 }
 0x2fb   : > { %v4381_v4 = vpop.f32.mrf.mxu2  ;;  %v3699_v9 = vpop.f32.mrf.mxu1 }
 0x2fc   : > { %5647 = vst.msk [vmem:[%s7673_s15 + $0xc0] sm:$0xff] %vm942_vm11, %v5615_v17  ;;  %v4451_v54 = vadd.f32 %v4419_v27, %v4381_v4  ;;  %v3766_v59 = vadd.f32 %v3734_v20, %v3699_v9 }
 0x2fd   : > { %v4768_v26 = vld [vmem:[#allocation3 + $0xd8] sm:$0xff]  ;;  %v4731_v14 = vpop.f32.mrf.mxu3 }
 0x2fe   : > { %v4800_v21 = vadd.f32 %v4768_v26, %v4728_v7  ;;  %4483 = vst.msk [vmem:[#allocation3 + $0xe0] sm:$0xff] %vm942_vm11, %v4451_v54  ;;  %v4420_v51 = vld [vmem:[#allocation3 + $0xe8] sm:$0xff]  ;;  %v5449_v10 = vpop.f32.mrf.mxu0 }
 0x2ff   : > { %v5485_v38 = vld [vmem:[#allocation3 + $0xd0] sm:$0xff]  ;;  %3798 = vst.msk [vmem:[#allocation3 + $0xf0] sm:$0xff] %vm942_vm11, %v3766_v59 }
 0x300   : > { %4832 = vst.msk [vmem:[#allocation3 + $0xd8] sm:$0xff] %vm942_vm11, %v4800_v21  ;;  %v5517_v62 = vadd.f32 %v5485_v38, %v5444_v5 }
 0x301   : > { %v5580_v30 = vld [vmem:[#allocation3 + $0xc8] sm:$0xff] }
 0x302   : > { %v5616_v1 = vadd.f32 %v7955_v24, %v5580_v30  ;;  %5549 = vst.msk [vmem:[#allocation3 + $0xd0] sm:$0xff] %vm942_vm11, %v5517_v62 }
 0x303   : > { %v4383_v39 = vpop.f32.mrf.mxu2  ;;  %v3701_v35 = vpop.f32.mrf.mxu1 }
 0x304   : > { %5648 = vst.msk [vmem:[%s7673_s15 + $0xc8] sm:$0xff] %vm942_vm11, %v5616_v1  ;;  %v4452_v34 = vadd.f32 %v4420_v51, %v4383_v39  ;;  %v3767_v29 = vadd.f32 %v3735_v31, %v3701_v35 }
 0x305   : > { %v4769_v19 = vld [vmem:[#allocation3 + $0xe0] sm:$0xff]  ;;  %v4733_v53 = vpop.f32.mrf.mxu3 }
 0x306   : > { %v4801_v36 = vadd.f32 %v4769_v19, %v4731_v14  ;;  %4484 = vst.msk [vmem:[#allocation3 + $0xe8] sm:$0xff] %vm942_vm11, %v4452_v34  ;;  %v4421_v58 = vld [vmem:[#allocation3 + $0xf0] sm:$0xff]  ;;  %v5451_v33 = vpop.f32.mrf.mxu0 }
 0x307   : > { %v5486_v13 = vld [vmem:[#allocation3 + $0xd8] sm:$0xff]  ;;  %3799 = vst.msk [vmem:[#allocation3 + $0xf8] sm:$0xff] %vm942_vm11, %v3767_v29 }
 0x308   : > { %4833 = vst.msk [vmem:[#allocation3 + $0xe0] sm:$0xff] %vm942_vm11, %v4801_v36  ;;  %v5518_v37 = vadd.f32 %v5486_v13, %v5446_v16 }
 0x309   : > { %v5581_v0 = vld [vmem:[#allocation3 + $0xd0] sm:$0xff] }
 0x30a   : > { %v5617_v55 = vadd.f32 %v7955_v24, %v5581_v0  ;;  %5550 = vst.msk [vmem:[#allocation3 + $0xd8] sm:$0xff] %vm942_vm11, %v5518_v37 }
 0x30b   : > { %v4386_v15 = vpop.f32.mrf.mxu2 }
 0x30c   : > { %5649 = vst.msk [vmem:[%s7673_s15 + $0xd0] sm:$0xff] %vm942_vm11, %v5617_v55  ;;  %v4453_v43 = vadd.f32 %v4421_v58, %v4386_v15 }
 0x30d   : > { %v4770_v40 = vld [vmem:[#allocation3 + $0xe8] sm:$0xff]  ;;  %v4736_v3 = vpop.f32.mrf.mxu3 }
 0x30e   : > { %v4802_v28 = vadd.f32 %v4770_v40, %v4733_v53  ;;  %4485 = vst.msk [vmem:[#allocation3 + $0xf0] sm:$0xff] %vm942_vm11, %v4453_v43  ;;  %v4422_v42 = vld [vmem:[#allocation3 + $0xf8] sm:$0xff]  ;;  %v5454_v60 = vpop.f32.mrf.mxu0 }
 0x30f   : > { %v5487_v45 = vld [vmem:[#allocation3 + $0xe0] sm:$0xff] }
 0x310   : > { %4834 = vst.msk [vmem:[#allocation3 + $0xe8] sm:$0xff] %vm942_vm11, %v4802_v28  ;;  %v5519_v63 = vadd.f32 %v5487_v45, %v5449_v10 }
 0x311   : > { %v5582_v25 = vld [vmem:[#allocation3 + $0xd8] sm:$0xff] }
 0x312   : > { %v5618_v56 = vadd.f32 %v7955_v24, %v5582_v25  ;;  %5551 = vst.msk [vmem:[#allocation3 + $0xe0] sm:$0xff] %vm942_vm11, %v5519_v63 }
 0x313   : > { %v4388_v2 = vpop.f32.mrf.mxu2 }
 0x314   : > { %5650 = vst.msk [vmem:[%s7673_s15 + $0xd8] sm:$0xff] %vm942_vm11, %v5618_v56  ;;  %v4454_v48 = vadd.f32 %v4422_v42, %v4388_v2 }
 0x315   : > { %v4771_v22 = vld [vmem:[#allocation3 + $0xf0] sm:$0xff]  ;;  %v4738_v52 = vpop.f32.mrf.mxu3 }
 0x316   : > { %v4803_v61 = vadd.f32 %v4771_v22, %v4736_v3  ;;  %4486 = vst.msk [vmem:[#allocation3 + $0xf8] sm:$0xff] %vm942_vm11, %v4454_v48  ;;  %v5456_v12 = vpop.f32.mrf.mxu0 }
 0x317   : > { %v5488_v46 = vld [vmem:[#allocation3 + $0xe8] sm:$0xff] }
 0x318   : > { %4835 = vst.msk [vmem:[#allocation3 + $0xf0] sm:$0xff] %vm942_vm11, %v4803_v61  ;;  %v5520_v18 = vadd.f32 %v5488_v46, %v5451_v33 }
 0x319   : > { %v5583_v49 = vld [vmem:[#allocation3 + $0xe0] sm:$0xff] }
 0x31a   : > { %v5619_v47 = vadd.f32 %v7955_v24, %v5583_v49  ;;  %5552 = vst.msk [vmem:[#allocation3 + $0xe8] sm:$0xff] %vm942_vm11, %v5520_v18 }
 0x31c   : > { %5651 = vst.msk [vmem:[%s7673_s15 + $0xe0] sm:$0xff] %vm942_vm11, %v5619_v47 }
 0x31d   : > { %v4772_v8 = vld [vmem:[#allocation3 + $0xf8] sm:$0xff] }
 0x31e   : > { %v4804_v32 = vadd.f32 %v4772_v8, %v4738_v52 }
 0x31f   : > { %v5489_v57 = vld [vmem:[#allocation3 + $0xf0] sm:$0xff] }
 0x320   : > { %4836 = vst.msk [vmem:[#allocation3 + $0xf8] sm:$0xff] %vm942_vm11, %v4804_v32  ;;  %v5521_v11 = vadd.f32 %v5489_v57, %v5454_v60 }
 0x321   : > { %v5584_v5 = vld [vmem:[#allocation3 + $0xe8] sm:$0xff] }
 0x322   : > { %v5620_v6 = vadd.f32 %v7955_v24, %v5584_v5  ;;  %5553 = vst.msk [vmem:[#allocation3 + $0xf0] sm:$0xff] %vm942_vm11, %v5521_v11 }
 0x324   : > { %5652 = vst.msk [vmem:[%s7673_s15 + $0xe8] sm:$0xff] %vm942_vm11, %v5620_v6 }
 0x327   : > { %v5490_v7 = vld [vmem:[#allocation3 + $0xf8] sm:$0xff] }
 0x328   : > { %v5522_v50 = vadd.f32 %v5490_v7, %v5456_v12 }
 0x329   : > { %v5585_v44 = vld [vmem:[#allocation3 + $0xf0] sm:$0xff] }
 0x32a   : > { %v5621_v41 = vadd.f32 %v7955_v24, %v5585_v44  ;;  %5554 = vst.msk [vmem:[#allocation3 + $0xf8] sm:$0xff] %vm942_vm11, %v5522_v50 }
 0x32c   : > { %5653 = vst.msk [vmem:[%s7673_s15 + $0xf0] sm:$0xff] %vm942_vm11, %v5621_v41 }
 0x331   : > { %v5586_v23 = vld [vmem:[#allocation3 + $0xf8] sm:$0xff] }
 0x332   : > { %v5622_v27 = vadd.f32 %v7955_v24, %v5586_v23 }
 0x334   : > { %5654 = vst.msk [vmem:[%s7673_s15 + $0xf8] sm:$0xff] %vm942_vm11, %v5622_v27 }
 0x335 PF: > { %s13_s12 = sadd.s32 1, %s6183_s12  }
 0x336   : > { %p10_p4 = scmp.ge.s32.totalorder %s13_s12, 4  }
 0x338   :  { %12 = sbr.rel (!%p10_p4) target bundleno = 1 (0x1), region = 72 }

</bundles_post_ra>
